<compile_context>
chip_gen: v6e
topology: v6e:2x2x1
jax: 0.10.0
libtpu: 0.0.40
codegen_flags: <defaults>
</compile_context>

<pallas_src>
import math
from functools import partial

import jax
import jax.numpy as jnp
from jax import lax
from jax.experimental import pallas as pl
from jax.experimental.pallas import tpu as pltpu

GAMMA = 5.0 / 3.0        # eos.gamma_th
E = 4                    # ensemble members (len(pressnet))
H = 32                   # hidden width of each pressnet MLP
EH = E * H               # 128 == MXU tile height
LANE = 128
CHUNK = 8                # sublane rows per sub-slab -> (8, 128) vreg tiles
SUBS = 8                 # sub-slabs per grid step (64 rows = 8192 cells / step)
NEWTON_ITERS = 8         # Newton from cs_a converges well within 8 iters (f32)

_S2 = GAMMA - 1.0
_S = math.sqrt(_S2)
_GG1 = GAMMA / (GAMMA - 1.0)
_C_LO = 1e-8
_C_HI = min(_S, 1.0) * (1.0 - 1e-6)


def _mlp_bf16_default():
    """bf16 MXU/EUP for the pressnet pays off on v6e / v7x; keep f32 on v5e-."""
    try:
        kind = jax.devices()[0].device_kind.lower()
    except Exception:
        return False
    return ("v6" in kind) or ("v7" in kind)


# ----------------------------- in-kernel math helpers -----------------------------

def _fast_recip(d):
    # approx EUP reciprocal + one VPU Newton refinement (~f32 accuracy)
    r = pl.reciprocal(d, approx=True)
    return r * (2.0 - d * r)


def _atanh(x):
    return 0.5 * jnp.log((1.0 + x) * _fast_recip(1.0 - x))


def _g_of_cs(cs):
    # (2/s) * atanh(cs/s) == (1/s) * log((s+cs)/(s-cs))
    return (1.0 / _S) * jnp.log((_S + cs) * _fast_recip(_S - cs))


def _csnd(q, h):
    # cs = sqrt(gamma * q / h); q = p/rho
    return jnp.sqrt(GAMMA * q) * lax.rsqrt(h)


def _raref_fan_at_zero(rho_a, q_a, cs_a, K):
    """Self-similar rarefaction-fan state at xi = 0.

    Solves atanh(c) + g(c) = K by Newton from cs_a.  Operates on the
    L/R-stacked (2*CHUNK, LANE) slab (both Newton chains fused).
    Returns (rho, p, h, c);  v = +c for the left fan, -c for the right fan.
    """
    c = jnp.clip(cs_a, _C_LO, _C_HI)
    for _ in range(NEWTON_ITERS):
        # pure approx reciprocals: errors self-correct inside the iteration
        t1 = 0.5 * jnp.log((1.0 + c) * pl.reciprocal(1.0 - c, approx=True))
        t2 = (1.0 / _S) * jnp.log((_S + c) * pl.reciprocal(_S - c, approx=True))
        Fc = t1 + t2 - K
        Fp = (pl.reciprocal(1.0 - c * c, approx=True)
              + 2.0 * pl.reciprocal(_S2 - c * c, approx=True))
        c = jnp.clip(c - Fc * pl.reciprocal(Fp, approx=True), _C_LO, _C_HI)
    q = c * c * (GAMMA - 1.0) * _fast_recip(GAMMA * (GAMMA - 1.0 - c * c))  # p/rho
    r = q * _fast_recip(q_a)
    rho = rho_a * r * jnp.sqrt(r)        # r^(1/(gamma-1)) == r^1.5 for gamma = 5/3
    p = q * rho
    h = 1.0 + _GG1 * q
    return rho, p, h, c


# ----------------------------------- kernel -----------------------------------

def _draref_kernel(plr_ref, flr_ref, w1_ref, b1_ref, w2_ref, b2_ref, out_ref,
                   *, n_sub, mlp_bf16):
    f32 = jnp.float32
    cdt = jnp.bfloat16 if mlp_bf16 else f32

    # weights are loop-invariant: load / cast once per grid step
    W1 = w1_ref[...].astype(cdt)         # (EH, 6)
    b1 = b1_ref[...].astype(f32)         # (EH, 1)
    W2 = w2_ref[...].astype(cdt)         # (E, EH)  block-diagonal
    b2 = b2_ref[...].astype(f32)         # (E, 1)

    def sub_slab(s, carry):
        plr = plr_ref[s].astype(f32)     # (6, CHUNK, LANE): rhoL,rhoR,pL,pR,vL,vR
        flr = flr_ref[s].astype(f32)     # (6, CHUNK, LANE): F0L,F0R,F1L,F1R,F2L,F2R

        rhoL, rhoR = plr[0], plr[1]
        pL, pR = plr[2], plr[3]
        vL, vR = plr[4], plr[5]

        logs = jnp.log(plr[0:4])         # log rhoL, log rhoR, log pL, log pR
        log_pL, log_pR = logs[2], logs[3]

        # -------- pressnet ensemble: two lane-dense 2-D MXU matmuls --------
        n = CHUNK * LANE
        feat = jnp.concatenate([logs, plr[4:6]], axis=0).reshape(6, n)   # channel-major
        hid = jnp.dot(W1, feat.astype(cdt), preferred_element_type=f32)  # (EH, n) f32 acc
        hid = jnp.tanh((hid + b1).astype(cdt))                           # bf16 tanh on v6e/v7x
        out2 = jnp.dot(W2, hid, preferred_element_type=f32) + b2         # (E, n) f32 acc
        out2 = out2.reshape(E, CHUNK, LANE)

        # -------- ensemble-invariant SRHD quantities (hoisted once) --------
        qL = pL * _fast_recip(rhoL)
        qR = pR * _fast_recip(rhoR)
        csL = _csnd(qL, 1.0 + _GG1 * qL)
        csR = _csnd(qR, 1.0 + _GG1 * qR)
        atanh_vL = _atanh(vL)
        atanh_vR = _atanh(vR)
        gL = _g_of_cs(csL)
        gR = _g_of_cs(csR)
        pmin = jnp.minimum(pL, pR)       # Compactification(affine, a=0, b=min(pL,pR))

        # -------- evaluate ensemble, first-min argmin (lean tracked set) --------
        best = None
        best_res = None
        for e in range(E):
            z = out2[e]                                   # (CHUNK, LANE)
            xi = 0.5 * (1.0 + jnp.tanh(0.5 * z))          # sigmoid, overflow-free
            pC = xi * pmin                                # mapping.xi_to_x(xi)
            log_pC = jnp.log(pC)

            tl = jnp.exp(0.2 * (log_pC - log_pL))         # (pC/pL)^(1/5)
            qcl = qL * tl * tl                            # qL * (pC/pL)^((g-1)/g)
            ccl = _csnd(qcl, 1.0 + _GG1 * qcl)
            vsL = jnp.tanh(atanh_vL + gL - _g_of_cs(ccl))

            tr = jnp.exp(0.2 * (log_pC - log_pR))
            qcr = qR * tr * tr
            ccr = _csnd(qcr, 1.0 + _GG1 * qcr)
            vsR = jnp.tanh(atanh_vR - gR + _g_of_cs(ccr))

            res = jnp.abs(vsL - vsR)
            cand = (pC, log_pC, vsL, vsR)
            if best is None:
                best_res, best = res, cand
            else:
                take = res < best_res                     # first-min argmin
                best_res = jnp.where(take, res, best_res)
                best = tuple(jnp.where(take, c, b) for c, b in zip(cand, best))

        pressC, log_pCb, vstarL, vstarR = best

        # winner's central states (isentropic relations, gamma = 5/3)
        tl = jnp.exp(0.2 * (log_pCb - log_pL))
        rhoCL = rhoL * tl * tl * tl
        qCL = qL * tl * tl
        hCL = 1.0 + _GG1 * qCL
        csCL = _csnd(qCL, hCL)
        tr = jnp.exp(0.2 * (log_pCb - log_pR))
        rhoCR = rhoR * tr * tr * tr
        qCR = qR * tr * tr
        hCR = 1.0 + _GG1 * qCR
        csCR = _csnd(qCR, hCR)

        # -------- wave speeds: masks only need numerator signs --------
        # denominators (1 -/+ v*cs) > 0 for physical states (|v|,cs < 1)
        lambdaC = 0.5 * (vstarR + vstarL)
        numL = vL - csL                  # sign(lambdaL)
        numRL = lambdaC - csCL           # sign(lambdaRL)
        numRR = lambdaC + csCR           # sign(lambdaRR)
        numR = vR + csR                  # sign(lambdaR)

        # ----------------------------- contact fluxes -----------------------------
        WC = lax.rsqrt(1.0 - lambdaC * lambdaC)
        densCL = WC * rhoCL
        densCR = WC * rhoCR
        momCL = WC * WC * rhoCL * hCL * lambdaC
        momCR = WC * WC * rhoCR * hCR * lambdaC
        FCL = (densCL * lambdaC,
               densCL * (WC * hCL - 1.0) * lambdaC,
               momCL * lambdaC + pressC)
        FCR = (densCR * lambdaC,
               densCR * (WC * hCR - 1.0) * lambdaC,
               momCR * lambdaC + pressC)

        # -------- rarefaction-fan fluxes at xi = 0 (fused L/R Newton) --------
        rho_a = jnp.concatenate([rhoL, rhoR], axis=0)             # (2*CHUNK, LANE)
        q_a = jnp.concatenate([qL, qR], axis=0)
        cs_a = jnp.concatenate([csL, csR], axis=0)
        K = jnp.concatenate([atanh_vL + gL, gR - atanh_vR], axis=0)
        rho_f, p_f, h_f, c_f = _raref_fan_at_zero(rho_a, q_a, cs_a, K)
        W_f = lax.rsqrt(1.0 - c_f * c_f)
        dens_f = W_f * rho_f
        whm1_f = W_f * h_f - 1.0
        mom2_f = W_f * W_f * rho_f * h_f * c_f * c_f              # W^2 rho h v^2 (sign-free)
        v_RL = c_f[:CHUNK]
        v_RR = -c_f[CHUNK:]
        FRL = (dens_f[:CHUNK] * v_RL,
               dens_f[:CHUNK] * whm1_f[:CHUNK] * v_RL,
               mom2_f[:CHUNK] + p_f[:CHUNK])
        FRR = (dens_f[CHUNK:] * v_RR,
               dens_f[CHUNK:] * whm1_f[CHUNK:] * v_RR,
               mom2_f[CHUNK:] + p_f[CHUNK:])

        # ----------------------------- upwind select -----------------------------
        mask_L = numL >= 0.0
        mask_RL = (numL < 0.0) & (numRL >= 0.0)
        mask_CL = (numRL < 0.0) & (lambdaC > 0.0)
        mask_CR = (lambdaC <= 0.0) & (numRR > 0.0)
        mask_RR = (numRR <= 0.0) & (numR > 0.0)
        mask_R = numR <= 0.0

        FLt = (flr[0], flr[2], flr[4])
        FRt = (flr[1], flr[3], flr[5])
        outs = []
        for c in range(3):
            fx = jnp.zeros_like(lambdaC)
            fx = jnp.where(mask_L, FLt[c], fx)
            fx = jnp.where(mask_RL, FRL[c], fx)
            fx = jnp.where(mask_CL, FCL[c], fx)
            fx = jnp.where(mask_CR, FCR[c], fx)
            fx = jnp.where(mask_RR, FRR[c], fx)
            fx = jnp.where(mask_R, FRt[c], fx)
            outs.append(fx)
        out_ref[s] = jnp.stack(outs, axis=0).astype(out_ref.dtype)
        return carry

    lax.fori_loop(0, n_sub, sub_slab, 0)


# ----------------------------------- wrappers -----------------------------------

def _pack_params(params):
    """Pack pressnet params into MXU-friendly lane-dense matrices."""
    w1, b1, w2, b2 = params                       # (E,6,H), (E,H), (E,H), (E,)
    W1p = jnp.transpose(w1, (0, 2, 1)).reshape(EH, 6).astype(jnp.float32)
    b1p = b1.reshape(EH, 1).astype(jnp.float32)
    W2p = (jnp.eye(E, dtype=jnp.float32)[:, :, None]
           * w2.astype(jnp.float32)[:, None, :]).reshape(E, EH)   # block-diagonal
    b2p = b2.reshape(E, 1).astype(jnp.float32)
    return W1p, b1p, W2p, b2p


def solve_packed(plr, flr, packed_params, *, mlp_bf16=False):
    """Channel-major entry point (preferred for per-timestep use, no transposes).

    plr, flr: (NT, 6, CHUNK, LANE) with channels [rhoL,rhoR,pL,pR,vL,vR] /
    [F0L,F0R,F1L,F1R,F2L,F2R].  Returns (NT, 3, CHUNK, LANE).
    """
    NT = plr.shape[0]
    n_sub = SUBS
    while NT % n_sub != 0:                        # adapt sub-slab count to NT
        n_sub //= 2
    grid = (NT // n_sub,)
    W1p, b1p, W2p, b2p = packed_params
    kernel = partial(_draref_kernel, n_sub=n_sub, mlp_bf16=mlp_bf16)
    return pl.pallas_call(
        kernel,
        out_shape=jax.ShapeDtypeStruct((NT, 3, CHUNK, LANE), flr.dtype),
        grid_spec=pltpu.PrefetchScalarGridSpec(
            num_scalar_prefetch=0,
            grid=grid,
            in_specs=[
                pl.BlockSpec((n_sub, 6, CHUNK, LANE), lambda i: (i, 0, 0, 0)),
                pl.BlockSpec((n_sub, 6, CHUNK, LANE), lambda i: (i, 0, 0, 0)),
                pl.BlockSpec((EH, 6), lambda i: (0, 0)),
                pl.BlockSpec((EH, 1), lambda i: (0, 0)),
                pl.BlockSpec((E, EH), lambda i: (0, 0)),
                pl.BlockSpec((E, 1), lambda i: (0, 0)),
            ],
            out_specs=pl.BlockSpec((n_sub, 3, CHUNK, LANE), lambda i: (i, 0, 0, 0)),
        ),
        compiler_params=pltpu.CompilerParams(
            dimension_semantics=("parallel",)),
    )(plr, flr, W1p, b1p, W2p, b2p)


@partial(jax.jit, static_argnums=(6,))
def _forward_impl(P, F, w1, b1, w2, b2, mlp_bf16):
    N = P.shape[0]
    NT = N // (CHUNK * LANE)
    # channel-major packing: (NT, 6, CHUNK, LANE); cells on (sublane, lane)
    plr = P.reshape(NT, CHUNK, LANE, 6).transpose(0, 3, 1, 2)
    flr = F.reshape(NT, CHUNK, LANE, 6).transpose(0, 3, 1, 2)
    packed = _pack_params((w1, b1, w2, b2))
    out = solve_packed(plr, flr, packed, mlp_bf16=mlp_bf16)
    return out.transpose(0, 2, 3, 1).reshape(N, 3)


def ensemble_draref_forward(P, U, F, cmax, cmin, params, mlp_bf16=None):
    """Mirrors EnsembleDRarefSolver.forward.

    P: (ncells, 3, 2) primitives (rho, p, v) x (L, R); F: (ncells, 3, 2) fluxes.
    U, cmax, cmin unused (as in the PyTorch module).  Returns (ncells, 3).
    For per-timestep production use, keep state channel-major and call
    solve_packed() to avoid the HBM layout transposes every call.
    """
    del U, cmax, cmin
    N = P.shape[0]
    assert N % (CHUNK * LANE) == 0, "ncells must be a multiple of %d" % (CHUNK * LANE)
    if mlp_bf16 is None:
        mlp_bf16 = _mlp_bf16_default()
    w1, b1, w2, b2 = params
    return _forward_impl(P, F, w1, b1, w2, b2, bool(mlp_bf16))


# ------------------------------------ main ------------------------------------

if __name__ == "__main__":
    key = jax.random.PRNGKey(0)
    N = 32768                 # 4 parallel grid steps of 8192 cells (2 per v7x core)
    k1, k2, k3, kw = jax.random.split(key, 4)

    # physically valid primitive states (rho > 0, p > 0, |v| < 1)
    rho = jax.random.uniform(k1, (N, 2), minval=0.1, maxval=2.0)
    p = jax.random.uniform(k2, (N, 2), minval=0.05, maxval=1.0)
    v = jax.random.uniform(k3, (N, 2), minval=-0.5, maxval=0.5)
    P = jnp.stack([rho, p, v], axis=1).astype(jnp.float32)           # (N, 3, 2)

    gamma = GAMMA
    W = 1.0 / jnp.sqrt(1.0 - v ** 2)
    hsp = 1.0 + gamma / (gamma - 1.0) * p / rho
    D = rho * W
    S = rho * hsp * W ** 2 * v
    tau = rho * hsp * W ** 2 - p - D
    U = jnp.stack([D, tau, S], axis=1).astype(jnp.float32)           # (N, 3, 2)
    Fphys = jnp.stack([D * v, (tau + p) * v, S * v + p], axis=1).astype(jnp.float32)

    cs = jnp.sqrt(gamma * p / (rho * hsp))
    lamp = (v + cs) / (1.0 + v * cs)
    lamm = (v - cs) / (1.0 - v * cs)
    cmax = jnp.maximum(lamp[:, 0], lamp[:, 1]).astype(jnp.float32)
    cmin = jnp.minimum(lamm[:, 0], lamm[:, 1]).astype(jnp.float32)

    # deterministic synthetic pressnet ensemble parameters
    kws = jax.random.split(kw, 4)
    w1 = 0.5 * jax.random.normal(kws[0], (E, 6, H), dtype=jnp.float32)
    b1 = 0.1 * jax.random.normal(kws[1], (E, H), dtype=jnp.float32)
    w2 = 0.5 * jax.random.normal(kws[2], (E, H), dtype=jnp.float32)
    b2 = 0.1 * jax.random.normal(kws[3], (E,), dtype=jnp.float32)

    fluxes = ensemble_draref_forward(P, U, Fphys, cmax, cmin, (w1, b1, w2, b2))
    fluxes = jax.block_until_ready(fluxes)

    assert fluxes.shape == (N, 3)
    assert bool(jnp.all(jnp.isfinite(fluxes)))
    print("KERNEL_OK")
</pallas_src>

<mosaic_0001>
module attributes {stable_mosaic.version = 11 : i64} {
  func.func @_draref_kernel(%arg0: i32, %arg1: memref<8x6x8x128xf32, #tpu.memory_space<vmem>>, %arg2: memref<8x6x8x128xf32, #tpu.memory_space<vmem>>, %arg3: memref<128x6xf32, #tpu.memory_space<vmem>>, %arg4: memref<128x1xf32, #tpu.memory_space<vmem>>, %arg5: memref<4x128xf32, #tpu.memory_space<vmem>>, %arg6: memref<4x1xf32, #tpu.memory_space<vmem>>, %arg7: memref<8x3x8x128xf32, #tpu.memory_space<vmem>>) attributes {dimension_semantics = [#tpu.dimension_semantics<parallel>], iteration_bounds = array<i64: 4>, scalar_prefetch = 0 : i64, scratch_operands = 0 : i64, tpu.core_type = #tpu.core_type<tc>, window_params = [{transform_indices = @transform_0, window_bounds = array<i64: 8, 6, 8, 128>}, {transform_indices = @transform_1, window_bounds = array<i64: 8, 6, 8, 128>}, {pipeline_mode = #tpu.pipeline_mode<synchronous>, transform_indices = @transform_2, window_bounds = array<i64: 128, 6>}, {pipeline_mode = #tpu.pipeline_mode<synchronous>, transform_indices = @transform_3, window_bounds = array<i64: 128, 1>}, {pipeline_mode = #tpu.pipeline_mode<synchronous>, transform_indices = @transform_4, window_bounds = array<i64: 4, 128>}, {pipeline_mode = #tpu.pipeline_mode<synchronous>, transform_indices = @transform_5, window_bounds = array<i64: 4, 1>}, {transform_indices = @transform_6, window_bounds = array<i64: 8, 3, 8, 128>}]} {
    %c0 = arith.constant 0 : index
    %c0_0 = arith.constant 0 : index
    %0 = vector.load %arg3[%c0, %c0_0] : memref<128x6xf32, #tpu.memory_space<vmem>>, vector<128x6xf32>
    %c0_1 = arith.constant 0 : index
    %c0_2 = arith.constant 0 : index
    %1 = vector.load %arg4[%c0_1, %c0_2] : memref<128x1xf32, #tpu.memory_space<vmem>>, vector<128x1xf32>
    %c0_3 = arith.constant 0 : index
    %c0_4 = arith.constant 0 : index
    %2 = vector.load %arg5[%c0_3, %c0_4] : memref<4x128xf32, #tpu.memory_space<vmem>>, vector<4x128xf32>
    %c0_5 = arith.constant 0 : index
    %c0_6 = arith.constant 0 : index
    %3 = vector.load %arg6[%c0_5, %c0_6] : memref<4x1xf32, #tpu.memory_space<vmem>>, vector<4x1xf32>
    %c0_i32 = arith.constant 0 : i32
    %c8_i32 = arith.constant 8 : i32
    %4 = arith.addi %c0_i32, %c8_i32 : i32
    %c1_i32 = arith.constant 1 : i32
    scf.for %arg8 = %c0_i32 to %4 step %c1_i32  : i32 {
      %5 = arith.index_cast %arg8 : i32 to index
      %c0_8 = arith.constant 0 : index
      %c0_9 = arith.constant 0 : index
      %c0_10 = arith.constant 0 : index
      %6 = vector.load %arg1[%5, %c0_8, %c0_9, %c0_10] : memref<8x6x8x128xf32, #tpu.memory_space<vmem>>, vector<1x6x8x128xf32>
      %7 = vector.shape_cast %6 : vector<1x6x8x128xf32> to vector<6x8x128xf32>
      %8 = arith.index_cast %arg8 : i32 to index
      %c0_11 = arith.constant 0 : index
      %c0_12 = arith.constant 0 : index
      %c0_13 = arith.constant 0 : index
      %9 = vector.load %arg2[%8, %c0_11, %c0_12, %c0_13] : memref<8x6x8x128xf32, #tpu.memory_space<vmem>>, vector<1x6x8x128xf32>
      %10 = vector.shape_cast %9 : vector<1x6x8x128xf32> to vector<6x8x128xf32>
      %11 = vector.extract_strided_slice %7 {offsets = [0, 0, 0], sizes = [1, 8, 128], strides = [1, 1, 1]} : vector<6x8x128xf32> to vector<1x8x128xf32>
      %12 = vector.shape_cast %11 : vector<1x8x128xf32> to vector<8x128xf32>
      %13 = vector.extract_strided_slice %7 {offsets = [1, 0, 0], sizes = [1, 8, 128], strides = [1, 1, 1]} : vector<6x8x128xf32> to vector<1x8x128xf32>
      %14 = vector.shape_cast %13 : vector<1x8x128xf32> to vector<8x128xf32>
      %15 = vector.extract_strided_slice %7 {offsets = [2, 0, 0], sizes = [1, 8, 128], strides = [1, 1, 1]} : vector<6x8x128xf32> to vector<1x8x128xf32>
      %16 = vector.shape_cast %15 : vector<1x8x128xf32> to vector<8x128xf32>
      %17 = vector.extract_strided_slice %7 {offsets = [3, 0, 0], sizes = [1, 8, 128], strides = [1, 1, 1]} : vector<6x8x128xf32> to vector<1x8x128xf32>
      %18 = vector.shape_cast %17 : vector<1x8x128xf32> to vector<8x128xf32>
      %19 = vector.extract_strided_slice %7 {offsets = [4, 0, 0], sizes = [1, 8, 128], strides = [1, 1, 1]} : vector<6x8x128xf32> to vector<1x8x128xf32>
      %20 = vector.shape_cast %19 : vector<1x8x128xf32> to vector<8x128xf32>
      %21 = vector.extract_strided_slice %7 {offsets = [5, 0, 0], sizes = [1, 8, 128], strides = [1, 1, 1]} : vector<6x8x128xf32> to vector<1x8x128xf32>
      %22 = vector.shape_cast %21 : vector<1x8x128xf32> to vector<8x128xf32>
      %23 = vector.extract_strided_slice %7 {offsets = [0, 0, 0], sizes = [4, 8, 128], strides = [1, 1, 1]} : vector<6x8x128xf32> to vector<4x8x128xf32>
      %24 = math.log %23 : vector<4x8x128xf32>
      %25 = vector.extract_strided_slice %24 {offsets = [2, 0, 0], sizes = [1, 8, 128], strides = [1, 1, 1]} : vector<4x8x128xf32> to vector<1x8x128xf32>
      %26 = vector.shape_cast %25 : vector<1x8x128xf32> to vector<8x128xf32>
      %27 = vector.extract_strided_slice %24 {offsets = [3, 0, 0], sizes = [1, 8, 128], strides = [1, 1, 1]} : vector<4x8x128xf32> to vector<1x8x128xf32>
      %28 = vector.shape_cast %27 : vector<1x8x128xf32> to vector<8x128xf32>
      %29 = vector.extract_strided_slice %7 {offsets = [4, 0, 0], sizes = [2, 8, 128], strides = [1, 1, 1]} : vector<6x8x128xf32> to vector<2x8x128xf32>
      %30 = tpu.concatenate %24, %29 in 0 : vector<4x8x128xf32>, vector<2x8x128xf32> -> vector<6x8x128xf32>
      %31 = vector.shape_cast %30 : vector<6x8x128xf32> to vector<6x1024xf32>
      %cst = arith.constant dense<0.000000e+00> : vector<128x1024xf32>
      %32 = tpu.matmul %0, %31, %cst {dimension_numbers = #tpu.dot_dimension_numbers<[1], [0], [0], [1], [0, 0, 1, 1], [], []>} : vector<128x6xf32>, vector<6x1024xf32>, vector<128x1024xf32> -> vector<128x1024xf32>
      %33 = vector.broadcast %1 : vector<128x1xf32> to vector<128x1024xf32>
      %34 = arith.addf %32, %33 : vector<128x1024xf32>
      %35 = math.tanh %34 : vector<128x1024xf32>
      %cst_14 = arith.constant dense<0.000000e+00> : vector<4x1024xf32>
      %36 = tpu.matmul %2, %35, %cst_14 {dimension_numbers = #tpu.dot_dimension_numbers<[1], [0], [0], [1], [0, 0, 1, 1], [], []>} : vector<4x128xf32>, vector<128x1024xf32>, vector<4x1024xf32> -> vector<4x1024xf32>
      %37 = vector.broadcast %3 : vector<4x1xf32> to vector<4x1024xf32>
      %38 = arith.addf %36, %37 : vector<4x1024xf32>
      %39 = vector.shape_cast %38 : vector<4x1024xf32> to vector<4x8x128xf32>
      %40 = tpu.reciprocal %12 {approx = true} : vector<8x128xf32> -> vector<8x128xf32>
      %41 = arith.mulf %12, %40 : vector<8x128xf32>
      %cst_15 = arith.constant 2.000000e+00 : f32
      %42 = vector.broadcast %cst_15 : f32 to vector<8x128xf32>
      %43 = arith.subf %42, %41 : vector<8x128xf32>
      %44 = arith.mulf %40, %43 : vector<8x128xf32>
      %45 = arith.mulf %16, %44 : vector<8x128xf32>
      %46 = tpu.reciprocal %14 {approx = true} : vector<8x128xf32> -> vector<8x128xf32>
      %47 = arith.mulf %14, %46 : vector<8x128xf32>
      %cst_16 = arith.constant 2.000000e+00 : f32
      %48 = vector.broadcast %cst_16 : f32 to vector<8x128xf32>
      %49 = arith.subf %48, %47 : vector<8x128xf32>
      %50 = arith.mulf %46, %49 : vector<8x128xf32>
      %51 = arith.mulf %18, %50 : vector<8x128xf32>
      %cst_17 = arith.constant 2.500000e+00 : f32
      %52 = vector.broadcast %cst_17 : f32 to vector<8x128xf32>
      %53 = arith.mulf %52, %45 : vector<8x128xf32>
      %cst_18 = arith.constant 1.000000e+00 : f32
      %54 = vector.broadcast %cst_18 : f32 to vector<8x128xf32>
      %55 = arith.addf %54, %53 : vector<8x128xf32>
      %cst_19 = arith.constant 1.66666663 : f32
      %56 = vector.broadcast %cst_19 : f32 to vector<8x128xf32>
      %57 = arith.mulf %56, %45 : vector<8x128xf32>
      %58 = math.sqrt %57 : vector<8x128xf32>
      %59 = math.rsqrt %55 : vector<8x128xf32>
      %60 = arith.mulf %58, %59 : vector<8x128xf32>
      %cst_20 = arith.constant 2.500000e+00 : f32
      %61 = vector.broadcast %cst_20 : f32 to vector<8x128xf32>
      %62 = arith.mulf %61, %51 : vector<8x128xf32>
      %cst_21 = arith.constant 1.000000e+00 : f32
      %63 = vector.broadcast %cst_21 : f32 to vector<8x128xf32>
      %64 = arith.addf %63, %62 : vector<8x128xf32>
      %cst_22 = arith.constant 1.66666663 : f32
      %65 = vector.broadcast %cst_22 : f32 to vector<8x128xf32>
      %66 = arith.mulf %65, %51 : vector<8x128xf32>
      %67 = math.sqrt %66 : vector<8x128xf32>
      %68 = math.rsqrt %64 : vector<8x128xf32>
      %69 = arith.mulf %67, %68 : vector<8x128xf32>
      %cst_23 = arith.constant 1.000000e+00 : f32
      %70 = vector.broadcast %cst_23 : f32 to vector<8x128xf32>
      %71 = arith.addf %70, %20 : vector<8x128xf32>
      %cst_24 = arith.constant 1.000000e+00 : f32
      %72 = vector.broadcast %cst_24 : f32 to vector<8x128xf32>
      %73 = arith.subf %72, %20 : vector<8x128xf32>
      %74 = tpu.reciprocal %73 {approx = true} : vector<8x128xf32> -> vector<8x128xf32>
      %75 = arith.mulf %73, %74 : vector<8x128xf32>
      %cst_25 = arith.constant 2.000000e+00 : f32
      %76 = vector.broadcast %cst_25 : f32 to vector<8x128xf32>
      %77 = arith.subf %76, %75 : vector<8x128xf32>
      %78 = arith.mulf %74, %77 : vector<8x128xf32>
      %79 = arith.mulf %71, %78 : vector<8x128xf32>
      %80 = math.log %79 : vector<8x128xf32>
      %cst_26 = arith.constant 5.000000e-01 : f32
      %81 = vector.broadcast %cst_26 : f32 to vector<8x128xf32>
      %82 = arith.mulf %81, %80 : vector<8x128xf32>
      %cst_27 = arith.constant 1.000000e+00 : f32
      %83 = vector.broadcast %cst_27 : f32 to vector<8x128xf32>
      %84 = arith.addf %83, %22 : vector<8x128xf32>
      %cst_28 = arith.constant 1.000000e+00 : f32
      %85 = vector.broadcast %cst_28 : f32 to vector<8x128xf32>
      %86 = arith.subf %85, %22 : vector<8x128xf32>
      %87 = tpu.reciprocal %86 {approx = true} : vector<8x128xf32> -> vector<8x128xf32>
      %88 = arith.mulf %86, %87 : vector<8x128xf32>
      %cst_29 = arith.constant 2.000000e+00 : f32
      %89 = vector.broadcast %cst_29 : f32 to vector<8x128xf32>
      %90 = arith.subf %89, %88 : vector<8x128xf32>
      %91 = arith.mulf %87, %90 : vector<8x128xf32>
      %92 = arith.mulf %84, %91 : vector<8x128xf32>
      %93 = math.log %92 : vector<8x128xf32>
      %cst_30 = arith.constant 5.000000e-01 : f32
      %94 = vector.broadcast %cst_30 : f32 to vector<8x128xf32>
      %95 = arith.mulf %94, %93 : vector<8x128xf32>
      %cst_31 = arith.constant 0.816496611 : f32
      %96 = vector.broadcast %cst_31 : f32 to vector<8x128xf32>
      %97 = arith.addf %96, %60 : vector<8x128xf32>
      %cst_32 = arith.constant 0.816496611 : f32
      %98 = vector.broadcast %cst_32 : f32 to vector<8x128xf32>
      %99 = arith.subf %98, %60 : vector<8x128xf32>
      %100 = tpu.reciprocal %99 {approx = true} : vector<8x128xf32> -> vector<8x128xf32>
      %101 = arith.mulf %99, %100 : vector<8x128xf32>
      %cst_33 = arith.constant 2.000000e+00 : f32
      %102 = vector.broadcast %cst_33 : f32 to vector<8x128xf32>
      %103 = arith.subf %102, %101 : vector<8x128xf32>
      %104 = arith.mulf %100, %103 : vector<8x128xf32>
      %105 = arith.mulf %97, %104 : vector<8x128xf32>
      %106 = math.log %105 : vector<8x128xf32>
      %cst_34 = arith.constant 1.22474492 : f32
      %107 = vector.broadcast %cst_34 : f32 to vector<8x128xf32>
      %108 = arith.mulf %107, %106 : vector<8x128xf32>
      %cst_35 = arith.constant 0.816496611 : f32
      %109 = vector.broadcast %cst_35 : f32 to vector<8x128xf32>
      %110 = arith.addf %109, %69 : vector<8x128xf32>
      %cst_36 = arith.constant 0.816496611 : f32
      %111 = vector.broadcast %cst_36 : f32 to vector<8x128xf32>
      %112 = arith.subf %111, %69 : vector<8x128xf32>
      %113 = tpu.reciprocal %112 {approx = true} : vector<8x128xf32> -> vector<8x128xf32>
      %114 = arith.mulf %112, %113 : vector<8x128xf32>
      %cst_37 = arith.constant 2.000000e+00 : f32
      %115 = vector.broadcast %cst_37 : f32 to vector<8x128xf32>
      %116 = arith.subf %115, %114 : vector<8x128xf32>
      %117 = arith.mulf %113, %116 : vector<8x128xf32>
      %118 = arith.mulf %110, %117 : vector<8x128xf32>
      %119 = math.log %118 : vector<8x128xf32>
      %cst_38 = arith.constant 1.22474492 : f32
      %120 = vector.broadcast %cst_38 : f32 to vector<8x128xf32>
      %121 = arith.mulf %120, %119 : vector<8x128xf32>
      %122 = arith.minimumf %16, %18 : vector<8x128xf32>
      %123 = vector.extract_strided_slice %39 {offsets = [0, 0, 0], sizes = [1, 8, 128], strides = [1, 1, 1]} : vector<4x8x128xf32> to vector<1x8x128xf32>
      %124 = vector.shape_cast %123 : vector<1x8x128xf32> to vector<8x128xf32>
      %cst_39 = arith.constant 5.000000e-01 : f32
      %125 = vector.broadcast %cst_39 : f32 to vector<8x128xf32>
      %126 = arith.mulf %125, %124 : vector<8x128xf32>
      %127 = math.tanh %126 : vector<8x128xf32>
      %cst_40 = arith.constant 1.000000e+00 : f32
      %128 = vector.broadcast %cst_40 : f32 to vector<8x128xf32>
      %129 = arith.addf %128, %127 : vector<8x128xf32>
      %cst_41 = arith.constant 5.000000e-01 : f32
      %130 = vector.broadcast %cst_41 : f32 to vector<8x128xf32>
      %131 = arith.mulf %130, %129 : vector<8x128xf32>
      %132 = arith.mulf %131, %122 : vector<8x128xf32>
      %133 = math.log %132 : vector<8x128xf32>
      %134 = arith.subf %133, %26 : vector<8x128xf32>
      %cst_42 = arith.constant 2.000000e-01 : f32
      %135 = vector.broadcast %cst_42 : f32 to vector<8x128xf32>
      %136 = arith.mulf %135, %134 : vector<8x128xf32>
      %137 = math.exp %136 : vector<8x128xf32>
      %138 = arith.mulf %45, %137 : vector<8x128xf32>
      %139 = arith.mulf %138, %137 : vector<8x128xf32>
      %cst_43 = arith.constant 2.500000e+00 : f32
      %140 = vector.broadcast %cst_43 : f32 to vector<8x128xf32>
      %141 = arith.mulf %140, %139 : vector<8x128xf32>
      %cst_44 = arith.constant 1.000000e+00 : f32
      %142 = vector.broadcast %cst_44 : f32 to vector<8x128xf32>
      %143 = arith.addf %142, %141 : vector<8x128xf32>
      %cst_45 = arith.constant 1.66666663 : f32
      %144 = vector.broadcast %cst_45 : f32 to vector<8x128xf32>
      %145 = arith.mulf %144, %139 : vector<8x128xf32>
      %146 = math.sqrt %145 : vector<8x128xf32>
      %147 = math.rsqrt %143 : vector<8x128xf32>
      %148 = arith.mulf %146, %147 : vector<8x128xf32>
      %149 = arith.addf %82, %108 : vector<8x128xf32>
      %cst_46 = arith.constant 0.816496611 : f32
      %150 = vector.broadcast %cst_46 : f32 to vector<8x128xf32>
      %151 = arith.addf %150, %148 : vector<8x128xf32>
      %cst_47 = arith.constant 0.816496611 : f32
      %152 = vector.broadcast %cst_47 : f32 to vector<8x128xf32>
      %153 = arith.subf %152, %148 : vector<8x128xf32>
      %154 = tpu.reciprocal %153 {approx = true} : vector<8x128xf32> -> vector<8x128xf32>
      %155 = arith.mulf %153, %154 : vector<8x128xf32>
      %cst_48 = arith.constant 2.000000e+00 : f32
      %156 = vector.broadcast %cst_48 : f32 to vector<8x128xf32>
      %157 = arith.subf %156, %155 : vector<8x128xf32>
      %158 = arith.mulf %154, %157 : vector<8x128xf32>
      %159 = arith.mulf %151, %158 : vector<8x128xf32>
      %160 = math.log %159 : vector<8x128xf32>
      %cst_49 = arith.constant 1.22474492 : f32
      %161 = vector.broadcast %cst_49 : f32 to vector<8x128xf32>
      %162 = arith.mulf %161, %160 : vector<8x128xf32>
      %163 = arith.subf %149, %162 : vector<8x128xf32>
      %164 = math.tanh %163 : vector<8x128xf32>
      %165 = arith.subf %133, %28 : vector<8x128xf32>
      %cst_50 = arith.constant 2.000000e-01 : f32
      %166 = vector.broadcast %cst_50 : f32 to vector<8x128xf32>
      %167 = arith.mulf %166, %165 : vector<8x128xf32>
      %168 = math.exp %167 : vector<8x128xf32>
      %169 = arith.mulf %51, %168 : vector<8x128xf32>
      %170 = arith.mulf %169, %168 : vector<8x128xf32>
      %cst_51 = arith.constant 2.500000e+00 : f32
      %171 = vector.broadcast %cst_51 : f32 to vector<8x128xf32>
      %172 = arith.mulf %171, %170 : vector<8x128xf32>
      %cst_52 = arith.constant 1.000000e+00 : f32
      %173 = vector.broadcast %cst_52 : f32 to vector<8x128xf32>
      %174 = arith.addf %173, %172 : vector<8x128xf32>
      %cst_53 = arith.constant 1.66666663 : f32
      %175 = vector.broadcast %cst_53 : f32 to vector<8x128xf32>
      %176 = arith.mulf %175, %170 : vector<8x128xf32>
      %177 = math.sqrt %176 : vector<8x128xf32>
      %178 = math.rsqrt %174 : vector<8x128xf32>
      %179 = arith.mulf %177, %178 : vector<8x128xf32>
      %180 = arith.subf %95, %121 : vector<8x128xf32>
      %cst_54 = arith.constant 0.816496611 : f32
      %181 = vector.broadcast %cst_54 : f32 to vector<8x128xf32>
      %182 = arith.addf %181, %179 : vector<8x128xf32>
      %cst_55 = arith.constant 0.816496611 : f32
      %183 = vector.broadcast %cst_55 : f32 to vector<8x128xf32>
      %184 = arith.subf %183, %179 : vector<8x128xf32>
      %185 = tpu.reciprocal %184 {approx = true} : vector<8x128xf32> -> vector<8x128xf32>
      %186 = arith.mulf %184, %185 : vector<8x128xf32>
      %cst_56 = arith.constant 2.000000e+00 : f32
      %187 = vector.broadcast %cst_56 : f32 to vector<8x128xf32>
      %188 = arith.subf %187, %186 : vector<8x128xf32>
      %189 = arith.mulf %185, %188 : vector<8x128xf32>
      %190 = arith.mulf %182, %189 : vector<8x128xf32>
      %191 = math.log %190 : vector<8x128xf32>
      %cst_57 = arith.constant 1.22474492 : f32
      %192 = vector.broadcast %cst_57 : f32 to vector<8x128xf32>
      %193 = arith.mulf %192, %191 : vector<8x128xf32>
      %194 = arith.addf %180, %193 : vector<8x128xf32>
      %195 = math.tanh %194 : vector<8x128xf32>
      %196 = arith.subf %164, %195 : vector<8x128xf32>
      %197 = math.absf %196 : vector<8x128xf32>
      %198 = vector.extract_strided_slice %39 {offsets = [1, 0, 0], sizes = [1, 8, 128], strides = [1, 1, 1]} : vector<4x8x128xf32> to vector<1x8x128xf32>
      %199 = vector.shape_cast %198 : vector<1x8x128xf32> to vector<8x128xf32>
      %cst_58 = arith.constant 5.000000e-01 : f32
      %200 = vector.broadcast %cst_58 : f32 to vector<8x128xf32>
      %201 = arith.mulf %200, %199 : vector<8x128xf32>
      %202 = math.tanh %201 : vector<8x128xf32>
      %cst_59 = arith.constant 1.000000e+00 : f32
      %203 = vector.broadcast %cst_59 : f32 to vector<8x128xf32>
      %204 = arith.addf %203, %202 : vector<8x128xf32>
      %cst_60 = arith.constant 5.000000e-01 : f32
      %205 = vector.broadcast %cst_60 : f32 to vector<8x128xf32>
      %206 = arith.mulf %205, %204 : vector<8x128xf32>
      %207 = arith.mulf %206, %122 : vector<8x128xf32>
      %208 = math.log %207 : vector<8x128xf32>
      %209 = arith.subf %208, %26 : vector<8x128xf32>
      %cst_61 = arith.constant 2.000000e-01 : f32
      %210 = vector.broadcast %cst_61 : f32 to vector<8x128xf32>
      %211 = arith.mulf %210, %209 : vector<8x128xf32>
      %212 = math.exp %211 : vector<8x128xf32>
      %213 = arith.mulf %45, %212 : vector<8x128xf32>
      %214 = arith.mulf %213, %212 : vector<8x128xf32>
      %cst_62 = arith.constant 2.500000e+00 : f32
      %215 = vector.broadcast %cst_62 : f32 to vector<8x128xf32>
      %216 = arith.mulf %215, %214 : vector<8x128xf32>
      %cst_63 = arith.constant 1.000000e+00 : f32
      %217 = vector.broadcast %cst_63 : f32 to vector<8x128xf32>
      %218 = arith.addf %217, %216 : vector<8x128xf32>
      %cst_64 = arith.constant 1.66666663 : f32
      %219 = vector.broadcast %cst_64 : f32 to vector<8x128xf32>
      %220 = arith.mulf %219, %214 : vector<8x128xf32>
      %221 = math.sqrt %220 : vector<8x128xf32>
      %222 = math.rsqrt %218 : vector<8x128xf32>
      %223 = arith.mulf %221, %222 : vector<8x128xf32>
      %224 = arith.addf %82, %108 : vector<8x128xf32>
      %cst_65 = arith.constant 0.816496611 : f32
      %225 = vector.broadcast %cst_65 : f32 to vector<8x128xf32>
      %226 = arith.addf %225, %223 : vector<8x128xf32>
      %cst_66 = arith.constant 0.816496611 : f32
      %227 = vector.broadcast %cst_66 : f32 to vector<8x128xf32>
      %228 = arith.subf %227, %223 : vector<8x128xf32>
      %229 = tpu.reciprocal %228 {approx = true} : vector<8x128xf32> -> vector<8x128xf32>
      %230 = arith.mulf %228, %229 : vector<8x128xf32>
      %cst_67 = arith.constant 2.000000e+00 : f32
      %231 = vector.broadcast %cst_67 : f32 to vector<8x128xf32>
      %232 = arith.subf %231, %230 : vector<8x128xf32>
      %233 = arith.mulf %229, %232 : vector<8x128xf32>
      %234 = arith.mulf %226, %233 : vector<8x128xf32>
      %235 = math.log %234 : vector<8x128xf32>
      %cst_68 = arith.constant 1.22474492 : f32
      %236 = vector.broadcast %cst_68 : f32 to vector<8x128xf32>
      %237 = arith.mulf %236, %235 : vector<8x128xf32>
      %238 = arith.subf %224, %237 : vector<8x128xf32>
      %239 = math.tanh %238 : vector<8x128xf32>
      %240 = arith.subf %208, %28 : vector<8x128xf32>
      %cst_69 = arith.constant 2.000000e-01 : f32
      %241 = vector.broadcast %cst_69 : f32 to vector<8x128xf32>
      %242 = arith.mulf %241, %240 : vector<8x128xf32>
      %243 = math.exp %242 : vector<8x128xf32>
      %244 = arith.mulf %51, %243 : vector<8x128xf32>
      %245 = arith.mulf %244, %243 : vector<8x128xf32>
      %cst_70 = arith.constant 2.500000e+00 : f32
      %246 = vector.broadcast %cst_70 : f32 to vector<8x128xf32>
      %247 = arith.mulf %246, %245 : vector<8x128xf32>
      %cst_71 = arith.constant 1.000000e+00 : f32
      %248 = vector.broadcast %cst_71 : f32 to vector<8x128xf32>
      %249 = arith.addf %248, %247 : vector<8x128xf32>
      %cst_72 = arith.constant 1.66666663 : f32
      %250 = vector.broadcast %cst_72 : f32 to vector<8x128xf32>
      %251 = arith.mulf %250, %245 : vector<8x128xf32>
      %252 = math.sqrt %251 : vector<8x128xf32>
      %253 = math.rsqrt %249 : vector<8x128xf32>
      %254 = arith.mulf %252, %253 : vector<8x128xf32>
      %255 = arith.subf %95, %121 : vector<8x128xf32>
      %cst_73 = arith.constant 0.816496611 : f32
      %256 = vector.broadcast %cst_73 : f32 to vector<8x128xf32>
      %257 = arith.addf %256, %254 : vector<8x128xf32>
      %cst_74 = arith.constant 0.816496611 : f32
      %258 = vector.broadcast %cst_74 : f32 to vector<8x128xf32>
      %259 = arith.subf %258, %254 : vector<8x128xf32>
      %260 = tpu.reciprocal %259 {approx = true} : vector<8x128xf32> -> vector<8x128xf32>
      %261 = arith.mulf %259, %260 : vector<8x128xf32>
      %cst_75 = arith.constant 2.000000e+00 : f32
      %262 = vector.broadcast %cst_75 : f32 to vector<8x128xf32>
      %263 = arith.subf %262, %261 : vector<8x128xf32>
      %264 = arith.mulf %260, %263 : vector<8x128xf32>
      %265 = arith.mulf %257, %264 : vector<8x128xf32>
      %266 = math.log %265 : vector<8x128xf32>
      %cst_76 = arith.constant 1.22474492 : f32
      %267 = vector.broadcast %cst_76 : f32 to vector<8x128xf32>
      %268 = arith.mulf %267, %266 : vector<8x128xf32>
      %269 = arith.addf %255, %268 : vector<8x128xf32>
      %270 = math.tanh %269 : vector<8x128xf32>
      %271 = arith.subf %239, %270 : vector<8x128xf32>
      %272 = math.absf %271 : vector<8x128xf32>
      %273 = arith.cmpf olt, %272, %197 : vector<8x128xf32>
      %274 = arith.select %273, %272, %197 : vector<8x128xi1>, vector<8x128xf32>
      %275 = arith.select %273, %207, %132 : vector<8x128xi1>, vector<8x128xf32>
      %276 = arith.select %273, %208, %133 : vector<8x128xi1>, vector<8x128xf32>
      %277 = arith.select %273, %239, %164 : vector<8x128xi1>, vector<8x128xf32>
      %278 = arith.select %273, %270, %195 : vector<8x128xi1>, vector<8x128xf32>
      %279 = vector.extract_strided_slice %39 {offsets = [2, 0, 0], sizes = [1, 8, 128], strides = [1, 1, 1]} : vector<4x8x128xf32> to vector<1x8x128xf32>
      %280 = vector.shape_cast %279 : vector<1x8x128xf32> to vector<8x128xf32>
      %cst_77 = arith.constant 5.000000e-01 : f32
      %281 = vector.broadcast %cst_77 : f32 to vector<8x128xf32>
      %282 = arith.mulf %281, %280 : vector<8x128xf32>
      %283 = math.tanh %282 : vector<8x128xf32>
      %cst_78 = arith.constant 1.000000e+00 : f32
      %284 = vector.broadcast %cst_78 : f32 to vector<8x128xf32>
      %285 = arith.addf %284, %283 : vector<8x128xf32>
      %cst_79 = arith.constant 5.000000e-01 : f32
      %286 = vector.broadcast %cst_79 : f32 to vector<8x128xf32>
      %287 = arith.mulf %286, %285 : vector<8x128xf32>
      %288 = arith.mulf %287, %122 : vector<8x128xf32>
      %289 = math.log %288 : vector<8x128xf32>
      %290 = arith.subf %289, %26 : vector<8x128xf32>
      %cst_80 = arith.constant 2.000000e-01 : f32
      %291 = vector.broadcast %cst_80 : f32 to vector<8x128xf32>
      %292 = arith.mulf %291, %290 : vector<8x128xf32>
      %293 = math.exp %292 : vector<8x128xf32>
      %294 = arith.mulf %45, %293 : vector<8x128xf32>
      %295 = arith.mulf %294, %293 : vector<8x128xf32>
      %cst_81 = arith.constant 2.500000e+00 : f32
      %296 = vector.broadcast %cst_81 : f32 to vector<8x128xf32>
      %297 = arith.mulf %296, %295 : vector<8x128xf32>
      %cst_82 = arith.constant 1.000000e+00 : f32
      %298 = vector.broadcast %cst_82 : f32 to vector<8x128xf32>
      %299 = arith.addf %298, %297 : vector<8x128xf32>
      %cst_83 = arith.constant 1.66666663 : f32
      %300 = vector.broadcast %cst_83 : f32 to vector<8x128xf32>
      %301 = arith.mulf %300, %295 : vector<8x128xf32>
      %302 = math.sqrt %301 : vector<8x128xf32>
      %303 = math.rsqrt %299 : vector<8x128xf32>
      %304 = arith.mulf %302, %303 : vector<8x128xf32>
      %305 = arith.addf %82, %108 : vector<8x128xf32>
      %cst_84 = arith.constant 0.816496611 : f32
      %306 = vector.broadcast %cst_84 : f32 to vector<8x128xf32>
      %307 = arith.addf %306, %304 : vector<8x128xf32>
      %cst_85 = arith.constant 0.816496611 : f32
      %308 = vector.broadcast %cst_85 : f32 to vector<8x128xf32>
      %309 = arith.subf %308, %304 : vector<8x128xf32>
      %310 = tpu.reciprocal %309 {approx = true} : vector<8x128xf32> -> vector<8x128xf32>
      %311 = arith.mulf %309, %310 : vector<8x128xf32>
      %cst_86 = arith.constant 2.000000e+00 : f32
      %312 = vector.broadcast %cst_86 : f32 to vector<8x128xf32>
      %313 = arith.subf %312, %311 : vector<8x128xf32>
      %314 = arith.mulf %310, %313 : vector<8x128xf32>
      %315 = arith.mulf %307, %314 : vector<8x128xf32>
      %316 = math.log %315 : vector<8x128xf32>
      %cst_87 = arith.constant 1.22474492 : f32
      %317 = vector.broadcast %cst_87 : f32 to vector<8x128xf32>
      %318 = arith.mulf %317, %316 : vector<8x128xf32>
      %319 = arith.subf %305, %318 : vector<8x128xf32>
      %320 = math.tanh %319 : vector<8x128xf32>
      %321 = arith.subf %289, %28 : vector<8x128xf32>
      %cst_88 = arith.constant 2.000000e-01 : f32
      %322 = vector.broadcast %cst_88 : f32 to vector<8x128xf32>
      %323 = arith.mulf %322, %321 : vector<8x128xf32>
      %324 = math.exp %323 : vector<8x128xf32>
      %325 = arith.mulf %51, %324 : vector<8x128xf32>
      %326 = arith.mulf %325, %324 : vector<8x128xf32>
      %cst_89 = arith.constant 2.500000e+00 : f32
      %327 = vector.broadcast %cst_89 : f32 to vector<8x128xf32>
      %328 = arith.mulf %327, %326 : vector<8x128xf32>
      %cst_90 = arith.constant 1.000000e+00 : f32
      %329 = vector.broadcast %cst_90 : f32 to vector<8x128xf32>
      %330 = arith.addf %329, %328 : vector<8x128xf32>
      %cst_91 = arith.constant 1.66666663 : f32
      %331 = vector.broadcast %cst_91 : f32 to vector<8x128xf32>
      %332 = arith.mulf %331, %326 : vector<8x128xf32>
      %333 = math.sqrt %332 : vector<8x128xf32>
      %334 = math.rsqrt %330 : vector<8x128xf32>
      %335 = arith.mulf %333, %334 : vector<8x128xf32>
      %336 = arith.subf %95, %121 : vector<8x128xf32>
      %cst_92 = arith.constant 0.816496611 : f32
      %337 = vector.broadcast %cst_92 : f32 to vector<8x128xf32>
      %338 = arith.addf %337, %335 : vector<8x128xf32>
      %cst_93 = arith.constant 0.816496611 : f32
      %339 = vector.broadcast %cst_93 : f32 to vector<8x128xf32>
      %340 = arith.subf %339, %335 : vector<8x128xf32>
      %341 = tpu.reciprocal %340 {approx = true} : vector<8x128xf32> -> vector<8x128xf32>
      %342 = arith.mulf %340, %341 : vector<8x128xf32>
      %cst_94 = arith.constant 2.000000e+00 : f32
      %343 = vector.broadcast %cst_94 : f32 to vector<8x128xf32>
      %344 = arith.subf %343, %342 : vector<8x128xf32>
      %345 = arith.mulf %341, %344 : vector<8x128xf32>
      %346 = arith.mulf %338, %345 : vector<8x128xf32>
      %347 = math.log %346 : vector<8x128xf32>
      %cst_95 = arith.constant 1.22474492 : f32
      %348 = vector.broadcast %cst_95 : f32 to vector<8x128xf32>
      %349 = arith.mulf %348, %347 : vector<8x128xf32>
      %350 = arith.addf %336, %349 : vector<8x128xf32>
      %351 = math.tanh %350 : vector<8x128xf32>
      %352 = arith.subf %320, %351 : vector<8x128xf32>
      %353 = math.absf %352 : vector<8x128xf32>
      %354 = arith.cmpf olt, %353, %274 : vector<8x128xf32>
      %355 = arith.select %354, %353, %274 : vector<8x128xi1>, vector<8x128xf32>
      %356 = arith.select %354, %288, %275 : vector<8x128xi1>, vector<8x128xf32>
      %357 = arith.select %354, %289, %276 : vector<8x128xi1>, vector<8x128xf32>
      %358 = arith.select %354, %320, %277 : vector<8x128xi1>, vector<8x128xf32>
      %359 = arith.select %354, %351, %278 : vector<8x128xi1>, vector<8x128xf32>
      %360 = vector.extract_strided_slice %39 {offsets = [3, 0, 0], sizes = [1, 8, 128], strides = [1, 1, 1]} : vector<4x8x128xf32> to vector<1x8x128xf32>
      %361 = vector.shape_cast %360 : vector<1x8x128xf32> to vector<8x128xf32>
      %cst_96 = arith.constant 5.000000e-01 : f32
      %362 = vector.broadcast %cst_96 : f32 to vector<8x128xf32>
      %363 = arith.mulf %362, %361 : vector<8x128xf32>
      %364 = math.tanh %363 : vector<8x128xf32>
      %cst_97 = arith.constant 1.000000e+00 : f32
      %365 = vector.broadcast %cst_97 : f32 to vector<8x128xf32>
      %366 = arith.addf %365, %364 : vector<8x128xf32>
      %cst_98 = arith.constant 5.000000e-01 : f32
      %367 = vector.broadcast %cst_98 : f32 to vector<8x128xf32>
      %368 = arith.mulf %367, %366 : vector<8x128xf32>
      %369 = arith.mulf %368, %122 : vector<8x128xf32>
      %370 = math.log %369 : vector<8x128xf32>
      %371 = arith.subf %370, %26 : vector<8x128xf32>
      %cst_99 = arith.constant 2.000000e-01 : f32
      %372 = vector.broadcast %cst_99 : f32 to vector<8x128xf32>
      %373 = arith.mulf %372, %371 : vector<8x128xf32>
      %374 = math.exp %373 : vector<8x128xf32>
      %375 = arith.mulf %45, %374 : vector<8x128xf32>
      %376 = arith.mulf %375, %374 : vector<8x128xf32>
      %cst_100 = arith.constant 2.500000e+00 : f32
      %377 = vector.broadcast %cst_100 : f32 to vector<8x128xf32>
      %378 = arith.mulf %377, %376 : vector<8x128xf32>
      %cst_101 = arith.constant 1.000000e+00 : f32
      %379 = vector.broadcast %cst_101 : f32 to vector<8x128xf32>
      %380 = arith.addf %379, %378 : vector<8x128xf32>
      %cst_102 = arith.constant 1.66666663 : f32
      %381 = vector.broadcast %cst_102 : f32 to vector<8x128xf32>
      %382 = arith.mulf %381, %376 : vector<8x128xf32>
      %383 = math.sqrt %382 : vector<8x128xf32>
      %384 = math.rsqrt %380 : vector<8x128xf32>
      %385 = arith.mulf %383, %384 : vector<8x128xf32>
      %386 = arith.addf %82, %108 : vector<8x128xf32>
      %cst_103 = arith.constant 0.816496611 : f32
      %387 = vector.broadcast %cst_103 : f32 to vector<8x128xf32>
      %388 = arith.addf %387, %385 : vector<8x128xf32>
      %cst_104 = arith.constant 0.816496611 : f32
      %389 = vector.broadcast %cst_104 : f32 to vector<8x128xf32>
      %390 = arith.subf %389, %385 : vector<8x128xf32>
      %391 = tpu.reciprocal %390 {approx = true} : vector<8x128xf32> -> vector<8x128xf32>
      %392 = arith.mulf %390, %391 : vector<8x128xf32>
      %cst_105 = arith.constant 2.000000e+00 : f32
      %393 = vector.broadcast %cst_105 : f32 to vector<8x128xf32>
      %394 = arith.subf %393, %392 : vector<8x128xf32>
      %395 = arith.mulf %391, %394 : vector<8x128xf32>
      %396 = arith.mulf %388, %395 : vector<8x128xf32>
      %397 = math.log %396 : vector<8x128xf32>
      %cst_106 = arith.constant 1.22474492 : f32
      %398 = vector.broadcast %cst_106 : f32 to vector<8x128xf32>
      %399 = arith.mulf %398, %397 : vector<8x128xf32>
      %400 = arith.subf %386, %399 : vector<8x128xf32>
      %401 = math.tanh %400 : vector<8x128xf32>
      %402 = arith.subf %370, %28 : vector<8x128xf32>
      %cst_107 = arith.constant 2.000000e-01 : f32
      %403 = vector.broadcast %cst_107 : f32 to vector<8x128xf32>
      %404 = arith.mulf %403, %402 : vector<8x128xf32>
      %405 = math.exp %404 : vector<8x128xf32>
      %406 = arith.mulf %51, %405 : vector<8x128xf32>
      %407 = arith.mulf %406, %405 : vector<8x128xf32>
      %cst_108 = arith.constant 2.500000e+00 : f32
      %408 = vector.broadcast %cst_108 : f32 to vector<8x128xf32>
      %409 = arith.mulf %408, %407 : vector<8x128xf32>
      %cst_109 = arith.constant 1.000000e+00 : f32
      %410 = vector.broadcast %cst_109 : f32 to vector<8x128xf32>
      %411 = arith.addf %410, %409 : vector<8x128xf32>
      %cst_110 = arith.constant 1.66666663 : f32
      %412 = vector.broadcast %cst_110 : f32 to vector<8x128xf32>
      %413 = arith.mulf %412, %407 : vector<8x128xf32>
      %414 = math.sqrt %413 : vector<8x128xf32>
      %415 = math.rsqrt %411 : vector<8x128xf32>
      %416 = arith.mulf %414, %415 : vector<8x128xf32>
      %417 = arith.subf %95, %121 : vector<8x128xf32>
      %cst_111 = arith.constant 0.816496611 : f32
      %418 = vector.broadcast %cst_111 : f32 to vector<8x128xf32>
      %419 = arith.addf %418, %416 : vector<8x128xf32>
      %cst_112 = arith.constant 0.816496611 : f32
      %420 = vector.broadcast %cst_112 : f32 to vector<8x128xf32>
      %421 = arith.subf %420, %416 : vector<8x128xf32>
      %422 = tpu.reciprocal %421 {approx = true} : vector<8x128xf32> -> vector<8x128xf32>
      %423 = arith.mulf %421, %422 : vector<8x128xf32>
      %cst_113 = arith.constant 2.000000e+00 : f32
      %424 = vector.broadcast %cst_113 : f32 to vector<8x128xf32>
      %425 = arith.subf %424, %423 : vector<8x128xf32>
      %426 = arith.mulf %422, %425 : vector<8x128xf32>
      %427 = arith.mulf %419, %426 : vector<8x128xf32>
      %428 = math.log %427 : vector<8x128xf32>
      %cst_114 = arith.constant 1.22474492 : f32
      %429 = vector.broadcast %cst_114 : f32 to vector<8x128xf32>
      %430 = arith.mulf %429, %428 : vector<8x128xf32>
      %431 = arith.addf %417, %430 : vector<8x128xf32>
      %432 = math.tanh %431 : vector<8x128xf32>
      %433 = arith.subf %401, %432 : vector<8x128xf32>
      %434 = math.absf %433 : vector<8x128xf32>
      %435 = arith.cmpf olt, %434, %355 : vector<8x128xf32>
      %436 = arith.select %435, %369, %356 : vector<8x128xi1>, vector<8x128xf32>
      %437 = arith.select %435, %370, %357 : vector<8x128xi1>, vector<8x128xf32>
      %438 = arith.select %435, %401, %358 : vector<8x128xi1>, vector<8x128xf32>
      %439 = arith.select %435, %432, %359 : vector<8x128xi1>, vector<8x128xf32>
      %440 = arith.subf %437, %26 : vector<8x128xf32>
      %cst_115 = arith.constant 2.000000e-01 : f32
      %441 = vector.broadcast %cst_115 : f32 to vector<8x128xf32>
      %442 = arith.mulf %441, %440 : vector<8x128xf32>
      %443 = math.exp %442 : vector<8x128xf32>
      %444 = arith.mulf %12, %443 : vector<8x128xf32>
      %445 = arith.mulf %444, %443 : vector<8x128xf32>
      %446 = arith.mulf %445, %443 : vector<8x128xf32>
      %447 = arith.mulf %45, %443 : vector<8x128xf32>
      %448 = arith.mulf %447, %443 : vector<8x128xf32>
      %cst_116 = arith.constant 2.500000e+00 : f32
      %449 = vector.broadcast %cst_116 : f32 to vector<8x128xf32>
      %450 = arith.mulf %449, %448 : vector<8x128xf32>
      %cst_117 = arith.constant 1.000000e+00 : f32
      %451 = vector.broadcast %cst_117 : f32 to vector<8x128xf32>
      %452 = arith.addf %451, %450 : vector<8x128xf32>
      %cst_118 = arith.constant 1.66666663 : f32
      %453 = vector.broadcast %cst_118 : f32 to vector<8x128xf32>
      %454 = arith.mulf %453, %448 : vector<8x128xf32>
      %455 = math.sqrt %454 : vector<8x128xf32>
      %456 = math.rsqrt %452 : vector<8x128xf32>
      %457 = arith.mulf %455, %456 : vector<8x128xf32>
      %458 = arith.subf %437, %28 : vector<8x128xf32>
      %cst_119 = arith.constant 2.000000e-01 : f32
      %459 = vector.broadcast %cst_119 : f32 to vector<8x128xf32>
      %460 = arith.mulf %459, %458 : vector<8x128xf32>
      %461 = math.exp %460 : vector<8x128xf32>
      %462 = arith.mulf %14, %461 : vector<8x128xf32>
      %463 = arith.mulf %462, %461 : vector<8x128xf32>
      %464 = arith.mulf %463, %461 : vector<8x128xf32>
      %465 = arith.mulf %51, %461 : vector<8x128xf32>
      %466 = arith.mulf %465, %461 : vector<8x128xf32>
      %cst_120 = arith.constant 2.500000e+00 : f32
      %467 = vector.broadcast %cst_120 : f32 to vector<8x128xf32>
      %468 = arith.mulf %467, %466 : vector<8x128xf32>
      %cst_121 = arith.constant 1.000000e+00 : f32
      %469 = vector.broadcast %cst_121 : f32 to vector<8x128xf32>
      %470 = arith.addf %469, %468 : vector<8x128xf32>
      %cst_122 = arith.constant 1.66666663 : f32
      %471 = vector.broadcast %cst_122 : f32 to vector<8x128xf32>
      %472 = arith.mulf %471, %466 : vector<8x128xf32>
      %473 = math.sqrt %472 : vector<8x128xf32>
      %474 = math.rsqrt %470 : vector<8x128xf32>
      %475 = arith.mulf %473, %474 : vector<8x128xf32>
      %476 = arith.addf %439, %438 : vector<8x128xf32>
      %cst_123 = arith.constant 5.000000e-01 : f32
      %477 = vector.broadcast %cst_123 : f32 to vector<8x128xf32>
      %478 = arith.mulf %477, %476 : vector<8x128xf32>
      %479 = arith.subf %20, %60 : vector<8x128xf32>
      %480 = arith.subf %478, %457 : vector<8x128xf32>
      %481 = arith.addf %478, %475 : vector<8x128xf32>
      %482 = arith.addf %22, %69 : vector<8x128xf32>
      %483 = arith.mulf %478, %478 : vector<8x128xf32>
      %cst_124 = arith.constant 1.000000e+00 : f32
      %484 = vector.broadcast %cst_124 : f32 to vector<8x128xf32>
      %485 = arith.subf %484, %483 : vector<8x128xf32>
      %486 = math.rsqrt %485 : vector<8x128xf32>
      %487 = arith.mulf %486, %446 : vector<8x128xf32>
      %488 = arith.mulf %486, %464 : vector<8x128xf32>
      %489 = arith.mulf %486, %486 : vector<8x128xf32>
      %490 = arith.mulf %489, %446 : vector<8x128xf32>
      %491 = arith.mulf %490, %452 : vector<8x128xf32>
      %492 = arith.mulf %491, %478 : vector<8x128xf32>
      %493 = arith.mulf %486, %486 : vector<8x128xf32>
      %494 = arith.mulf %493, %464 : vector<8x128xf32>
      %495 = arith.mulf %494, %470 : vector<8x128xf32>
      %496 = arith.mulf %495, %478 : vector<8x128xf32>
      %497 = arith.mulf %487, %478 : vector<8x128xf32>
      %498 = arith.mulf %486, %452 : vector<8x128xf32>
      %cst_125 = arith.constant 1.000000e+00 : f32
      %499 = vector.broadcast %cst_125 : f32 to vector<8x128xf32>
      %500 = arith.subf %498, %499 : vector<8x128xf32>
      %501 = arith.mulf %487, %500 : vector<8x128xf32>
      %502 = arith.mulf %501, %478 : vector<8x128xf32>
      %503 = arith.mulf %492, %478 : vector<8x128xf32>
      %504 = arith.addf %503, %436 : vector<8x128xf32>
      %505 = arith.mulf %488, %478 : vector<8x128xf32>
      %506 = arith.mulf %486, %470 : vector<8x128xf32>
      %cst_126 = arith.constant 1.000000e+00 : f32
      %507 = vector.broadcast %cst_126 : f32 to vector<8x128xf32>
      %508 = arith.subf %506, %507 : vector<8x128xf32>
      %509 = arith.mulf %488, %508 : vector<8x128xf32>
      %510 = arith.mulf %509, %478 : vector<8x128xf32>
      %511 = arith.mulf %496, %478 : vector<8x128xf32>
      %512 = arith.addf %511, %436 : vector<8x128xf32>
      %513 = tpu.concatenate %12, %14 in 0 : vector<8x128xf32>, vector<8x128xf32> -> vector<16x128xf32>
      %514 = tpu.concatenate %45, %51 in 0 : vector<8x128xf32>, vector<8x128xf32> -> vector<16x128xf32>
      %515 = tpu.concatenate %60, %69 in 0 : vector<8x128xf32>, vector<8x128xf32> -> vector<16x128xf32>
      %516 = arith.addf %82, %108 : vector<8x128xf32>
      %517 = arith.subf %121, %95 : vector<8x128xf32>
      %518 = tpu.concatenate %516, %517 in 0 : vector<8x128xf32>, vector<8x128xf32> -> vector<16x128xf32>
      %cst_127 = arith.constant 9.99999993E-9 : f32
      %cst_128 = arith.constant 0.816495776 : f32
      %519 = vector.broadcast %cst_127 : f32 to vector<16x128xf32>
      %520 = arith.maximumf %519, %515 : vector<16x128xf32>
      %521 = vector.broadcast %cst_128 : f32 to vector<16x128xf32>
      %522 = arith.minimumf %521, %520 : vector<16x128xf32>
      %cst_129 = arith.constant 1.000000e+00 : f32
      %523 = vector.broadcast %cst_129 : f32 to vector<16x128xf32>
      %524 = arith.addf %523, %522 : vector<16x128xf32>
      %cst_130 = arith.constant 1.000000e+00 : f32
      %525 = vector.broadcast %cst_130 : f32 to vector<16x128xf32>
      %526 = arith.subf %525, %522 : vector<16x128xf32>
      %527 = tpu.reciprocal %526 {approx = true} : vector<16x128xf32> -> vector<16x128xf32>
      %528 = arith.mulf %524, %527 : vector<16x128xf32>
      %529 = math.log %528 : vector<16x128xf32>
      %cst_131 = arith.constant 5.000000e-01 : f32
      %530 = vector.broadcast %cst_131 : f32 to vector<16x128xf32>
      %531 = arith.mulf %530, %529 : vector<16x128xf32>
      %cst_132 = arith.constant 0.816496611 : f32
      %532 = vector.broadcast %cst_132 : f32 to vector<16x128xf32>
      %533 = arith.addf %532, %522 : vector<16x128xf32>
      %cst_133 = arith.constant 0.816496611 : f32
      %534 = vector.broadcast %cst_133 : f32 to vector<16x128xf32>
      %535 = arith.subf %534, %522 : vector<16x128xf32>
      %536 = tpu.reciprocal %535 {approx = true} : vector<16x128xf32> -> vector<16x128xf32>
      %537 = arith.mulf %533, %536 : vector<16x128xf32>
      %538 = math.log %537 : vector<16x128xf32>
      %cst_134 = arith.constant 1.22474492 : f32
      %539 = vector.broadcast %cst_134 : f32 to vector<16x128xf32>
      %540 = arith.mulf %539, %538 : vector<16x128xf32>
      %541 = arith.addf %531, %540 : vector<16x128xf32>
      %542 = arith.subf %541, %518 : vector<16x128xf32>
      %543 = arith.mulf %522, %522 : vector<16x128xf32>
      %cst_135 = arith.constant 1.000000e+00 : f32
      %544 = vector.broadcast %cst_135 : f32 to vector<16x128xf32>
      %545 = arith.subf %544, %543 : vector<16x128xf32>
      %546 = tpu.reciprocal %545 {approx = true} : vector<16x128xf32> -> vector<16x128xf32>
      %547 = arith.mulf %522, %522 : vector<16x128xf32>
      %cst_136 = arith.constant 0.666666686 : f32
      %548 = vector.broadcast %cst_136 : f32 to vector<16x128xf32>
      %549 = arith.subf %548, %547 : vector<16x128xf32>
      %550 = tpu.reciprocal %549 {approx = true} : vector<16x128xf32> -> vector<16x128xf32>
      %cst_137 = arith.constant 2.000000e+00 : f32
      %551 = vector.broadcast %cst_137 : f32 to vector<16x128xf32>
      %552 = arith.mulf %551, %550 : vector<16x128xf32>
      %553 = arith.addf %546, %552 : vector<16x128xf32>
      %554 = tpu.reciprocal %553 {approx = true} : vector<16x128xf32> -> vector<16x128xf32>
      %555 = arith.mulf %542, %554 : vector<16x128xf32>
      %556 = arith.subf %522, %555 : vector<16x128xf32>
      %cst_138 = arith.constant 9.99999993E-9 : f32
      %cst_139 = arith.constant 0.816495776 : f32
      %557 = vector.broadcast %cst_138 : f32 to vector<16x128xf32>
      %558 = arith.maximumf %557, %556 : vector<16x128xf32>
      %559 = vector.broadcast %cst_139 : f32 to vector<16x128xf32>
      %560 = arith.minimumf %559, %558 : vector<16x128xf32>
      %cst_140 = arith.constant 1.000000e+00 : f32
      %561 = vector.broadcast %cst_140 : f32 to vector<16x128xf32>
      %562 = arith.addf %561, %560 : vector<16x128xf32>
      %cst_141 = arith.constant 1.000000e+00 : f32
      %563 = vector.broadcast %cst_141 : f32 to vector<16x128xf32>
      %564 = arith.subf %563, %560 : vector<16x128xf32>
      %565 = tpu.reciprocal %564 {approx = true} : vector<16x128xf32> -> vector<16x128xf32>
      %566 = arith.mulf %562, %565 : vector<16x128xf32>
      %567 = math.log %566 : vector<16x128xf32>
      %cst_142 = arith.constant 5.000000e-01 : f32
      %568 = vector.broadcast %cst_142 : f32 to vector<16x128xf32>
      %569 = arith.mulf %568, %567 : vector<16x128xf32>
      %cst_143 = arith.constant 0.816496611 : f32
      %570 = vector.broadcast %cst_143 : f32 to vector<16x128xf32>
      %571 = arith.addf %570, %560 : vector<16x128xf32>
      %cst_144 = arith.constant 0.816496611 : f32
      %572 = vector.broadcast %cst_144 : f32 to vector<16x128xf32>
      %573 = arith.subf %572, %560 : vector<16x128xf32>
      %574 = tpu.reciprocal %573 {approx = true} : vector<16x128xf32> -> vector<16x128xf32>
      %575 = arith.mulf %571, %574 : vector<16x128xf32>
      %576 = math.log %575 : vector<16x128xf32>
      %cst_145 = arith.constant 1.22474492 : f32
      %577 = vector.broadcast %cst_145 : f32 to vector<16x128xf32>
      %578 = arith.mulf %577, %576 : vector<16x128xf32>
      %579 = arith.addf %569, %578 : vector<16x128xf32>
      %580 = arith.subf %579, %518 : vector<16x128xf32>
      %581 = arith.mulf %560, %560 : vector<16x128xf32>
      %cst_146 = arith.constant 1.000000e+00 : f32
      %582 = vector.broadcast %cst_146 : f32 to vector<16x128xf32>
      %583 = arith.subf %582, %581 : vector<16x128xf32>
      %584 = tpu.reciprocal %583 {approx = true} : vector<16x128xf32> -> vector<16x128xf32>
      %585 = arith.mulf %560, %560 : vector<16x128xf32>
      %cst_147 = arith.constant 0.666666686 : f32
      %586 = vector.broadcast %cst_147 : f32 to vector<16x128xf32>
      %587 = arith.subf %586, %585 : vector<16x128xf32>
      %588 = tpu.reciprocal %587 {approx = true} : vector<16x128xf32> -> vector<16x128xf32>
      %cst_148 = arith.constant 2.000000e+00 : f32
      %589 = vector.broadcast %cst_148 : f32 to vector<16x128xf32>
      %590 = arith.mulf %589, %588 : vector<16x128xf32>
      %591 = arith.addf %584, %590 : vector<16x128xf32>
      %592 = tpu.reciprocal %591 {approx = true} : vector<16x128xf32> -> vector<16x128xf32>
      %593 = arith.mulf %580, %592 : vector<16x128xf32>
      %594 = arith.subf %560, %593 : vector<16x128xf32>
      %cst_149 = arith.constant 9.99999993E-9 : f32
      %cst_150 = arith.constant 0.816495776 : f32
      %595 = vector.broadcast %cst_149 : f32 to vector<16x128xf32>
      %596 = arith.maximumf %595, %594 : vector<16x128xf32>
      %597 = vector.broadcast %cst_150 : f32 to vector<16x128xf32>
      %598 = arith.minimumf %597, %596 : vector<16x128xf32>
      %cst_151 = arith.constant 1.000000e+00 : f32
      %599 = vector.broadcast %cst_151 : f32 to vector<16x128xf32>
      %600 = arith.addf %599, %598 : vector<16x128xf32>
      %cst_152 = arith.constant 1.000000e+00 : f32
      %601 = vector.broadcast %cst_152 : f32 to vector<16x128xf32>
      %602 = arith.subf %601, %598 : vector<16x128xf32>
      %603 = tpu.reciprocal %602 {approx = true} : vector<16x128xf32> -> vector<16x128xf32>
      %604 = arith.mulf %600, %603 : vector<16x128xf32>
      %605 = math.log %604 : vector<16x128xf32>
      %cst_153 = arith.constant 5.000000e-01 : f32
      %606 = vector.broadcast %cst_153 : f32 to vector<16x128xf32>
      %607 = arith.mulf %606, %605 : vector<16x128xf32>
      %cst_154 = arith.constant 0.816496611 : f32
      %608 = vector.broadcast %cst_154 : f32 to vector<16x128xf32>
      %609 = arith.addf %608, %598 : vector<16x128xf32>
      %cst_155 = arith.constant 0.816496611 : f32
      %610 = vector.broadcast %cst_155 : f32 to vector<16x128xf32>
      %611 = arith.subf %610, %598 : vector<16x128xf32>
      %612 = tpu.reciprocal %611 {approx = true} : vector<16x128xf32> -> vector<16x128xf32>
      %613 = arith.mulf %609, %612 : vector<16x128xf32>
      %614 = math.log %613 : vector<16x128xf32>
      %cst_156 = arith.constant 1.22474492 : f32
      %615 = vector.broadcast %cst_156 : f32 to vector<16x128xf32>
      %616 = arith.mulf %615, %614 : vector<16x128xf32>
      %617 = arith.addf %607, %616 : vector<16x128xf32>
      %618 = arith.subf %617, %518 : vector<16x128xf32>
      %619 = arith.mulf %598, %598 : vector<16x128xf32>
      %cst_157 = arith.constant 1.000000e+00 : f32
      %620 = vector.broadcast %cst_157 : f32 to vector<16x128xf32>
      %621 = arith.subf %620, %619 : vector<16x128xf32>
      %622 = tpu.reciprocal %621 {approx = true} : vector<16x128xf32> -> vector<16x128xf32>
      %623 = arith.mulf %598, %598 : vector<16x128xf32>
      %cst_158 = arith.constant 0.666666686 : f32
      %624 = vector.broadcast %cst_158 : f32 to vector<16x128xf32>
      %625 = arith.subf %624, %623 : vector<16x128xf32>
      %626 = tpu.reciprocal %625 {approx = true} : vector<16x128xf32> -> vector<16x128xf32>
      %cst_159 = arith.constant 2.000000e+00 : f32
      %627 = vector.broadcast %cst_159 : f32 to vector<16x128xf32>
      %628 = arith.mulf %627, %626 : vector<16x128xf32>
      %629 = arith.addf %622, %628 : vector<16x128xf32>
      %630 = tpu.reciprocal %629 {approx = true} : vector<16x128xf32> -> vector<16x128xf32>
      %631 = arith.mulf %618, %630 : vector<16x128xf32>
      %632 = arith.subf %598, %631 : vector<16x128xf32>
      %cst_160 = arith.constant 9.99999993E-9 : f32
      %cst_161 = arith.constant 0.816495776 : f32
      %633 = vector.broadcast %cst_160 : f32 to vector<16x128xf32>
      %634 = arith.maximumf %633, %632 : vector<16x128xf32>
      %635 = vector.broadcast %cst_161 : f32 to vector<16x128xf32>
      %636 = arith.minimumf %635, %634 : vector<16x128xf32>
      %cst_162 = arith.constant 1.000000e+00 : f32
      %637 = vector.broadcast %cst_162 : f32 to vector<16x128xf32>
      %638 = arith.addf %637, %636 : vector<16x128xf32>
      %cst_163 = arith.constant 1.000000e+00 : f32
      %639 = vector.broadcast %cst_163 : f32 to vector<16x128xf32>
      %640 = arith.subf %639, %636 : vector<16x128xf32>
      %641 = tpu.reciprocal %640 {approx = true} : vector<16x128xf32> -> vector<16x128xf32>
      %642 = arith.mulf %638, %641 : vector<16x128xf32>
      %643 = math.log %642 : vector<16x128xf32>
      %cst_164 = arith.constant 5.000000e-01 : f32
      %644 = vector.broadcast %cst_164 : f32 to vector<16x128xf32>
      %645 = arith.mulf %644, %643 : vector<16x128xf32>
      %cst_165 = arith.constant 0.816496611 : f32
      %646 = vector.broadcast %cst_165 : f32 to vector<16x128xf32>
      %647 = arith.addf %646, %636 : vector<16x128xf32>
      %cst_166 = arith.constant 0.816496611 : f32
      %648 = vector.broadcast %cst_166 : f32 to vector<16x128xf32>
      %649 = arith.subf %648, %636 : vector<16x128xf32>
      %650 = tpu.reciprocal %649 {approx = true} : vector<16x128xf32> -> vector<16x128xf32>
      %651 = arith.mulf %647, %650 : vector<16x128xf32>
      %652 = math.log %651 : vector<16x128xf32>
      %cst_167 = arith.constant 1.22474492 : f32
      %653 = vector.broadcast %cst_167 : f32 to vector<16x128xf32>
      %654 = arith.mulf %653, %652 : vector<16x128xf32>
      %655 = arith.addf %645, %654 : vector<16x128xf32>
      %656 = arith.subf %655, %518 : vector<16x128xf32>
      %657 = arith.mulf %636, %636 : vector<16x128xf32>
      %cst_168 = arith.constant 1.000000e+00 : f32
      %658 = vector.broadcast %cst_168 : f32 to vector<16x128xf32>
      %659 = arith.subf %658, %657 : vector<16x128xf32>
      %660 = tpu.reciprocal %659 {approx = true} : vector<16x128xf32> -> vector<16x128xf32>
      %661 = arith.mulf %636, %636 : vector<16x128xf32>
      %cst_169 = arith.constant 0.666666686 : f32
      %662 = vector.broadcast %cst_169 : f32 to vector<16x128xf32>
      %663 = arith.subf %662, %661 : vector<16x128xf32>
      %664 = tpu.reciprocal %663 {approx = true} : vector<16x128xf32> -> vector<16x128xf32>
      %cst_170 = arith.constant 2.000000e+00 : f32
      %665 = vector.broadcast %cst_170 : f32 to vector<16x128xf32>
      %666 = arith.mulf %665, %664 : vector<16x128xf32>
      %667 = arith.addf %660, %666 : vector<16x128xf32>
      %668 = tpu.reciprocal %667 {approx = true} : vector<16x128xf32> -> vector<16x128xf32>
      %669 = arith.mulf %656, %668 : vector<16x128xf32>
      %670 = arith.subf %636, %669 : vector<16x128xf32>
      %cst_171 = arith.constant 9.99999993E-9 : f32
      %cst_172 = arith.constant 0.816495776 : f32
      %671 = vector.broadcast %cst_171 : f32 to vector<16x128xf32>
      %672 = arith.maximumf %671, %670 : vector<16x128xf32>
      %673 = vector.broadcast %cst_172 : f32 to vector<16x128xf32>
      %674 = arith.minimumf %673, %672 : vector<16x128xf32>
      %cst_173 = arith.constant 1.000000e+00 : f32
      %675 = vector.broadcast %cst_173 : f32 to vector<16x128xf32>
      %676 = arith.addf %675, %674 : vector<16x128xf32>
      %cst_174 = arith.constant 1.000000e+00 : f32
      %677 = vector.broadcast %cst_174 : f32 to vector<16x128xf32>
      %678 = arith.subf %677, %674 : vector<16x128xf32>
      %679 = tpu.reciprocal %678 {approx = true} : vector<16x128xf32> -> vector<16x128xf32>
      %680 = arith.mulf %676, %679 : vector<16x128xf32>
      %681 = math.log %680 : vector<16x128xf32>
      %cst_175 = arith.constant 5.000000e-01 : f32
      %682 = vector.broadcast %cst_175 : f32 to vector<16x128xf32>
      %683 = arith.mulf %682, %681 : vector<16x128xf32>
      %cst_176 = arith.constant 0.816496611 : f32
      %684 = vector.broadcast %cst_176 : f32 to vector<16x128xf32>
      %685 = arith.addf %684, %674 : vector<16x128xf32>
      %cst_177 = arith.constant 0.816496611 : f32
      %686 = vector.broadcast %cst_177 : f32 to vector<16x128xf32>
      %687 = arith.subf %686, %674 : vector<16x128xf32>
      %688 = tpu.reciprocal %687 {approx = true} : vector<16x128xf32> -> vector<16x128xf32>
      %689 = arith.mulf %685, %688 : vector<16x128xf32>
      %690 = math.log %689 : vector<16x128xf32>
      %cst_178 = arith.constant 1.22474492 : f32
      %691 = vector.broadcast %cst_178 : f32 to vector<16x128xf32>
      %692 = arith.mulf %691, %690 : vector<16x128xf32>
      %693 = arith.addf %683, %692 : vector<16x128xf32>
      %694 = arith.subf %693, %518 : vector<16x128xf32>
      %695 = arith.mulf %674, %674 : vector<16x128xf32>
      %cst_179 = arith.constant 1.000000e+00 : f32
      %696 = vector.broadcast %cst_179 : f32 to vector<16x128xf32>
      %697 = arith.subf %696, %695 : vector<16x128xf32>
      %698 = tpu.reciprocal %697 {approx = true} : vector<16x128xf32> -> vector<16x128xf32>
      %699 = arith.mulf %674, %674 : vector<16x128xf32>
      %cst_180 = arith.constant 0.666666686 : f32
      %700 = vector.broadcast %cst_180 : f32 to vector<16x128xf32>
      %701 = arith.subf %700, %699 : vector<16x128xf32>
      %702 = tpu.reciprocal %701 {approx = true} : vector<16x128xf32> -> vector<16x128xf32>
      %cst_181 = arith.constant 2.000000e+00 : f32
      %703 = vector.broadcast %cst_181 : f32 to vector<16x128xf32>
      %704 = arith.mulf %703, %702 : vector<16x128xf32>
      %705 = arith.addf %698, %704 : vector<16x128xf32>
      %706 = tpu.reciprocal %705 {approx = true} : vector<16x128xf32> -> vector<16x128xf32>
      %707 = arith.mulf %694, %706 : vector<16x128xf32>
      %708 = arith.subf %674, %707 : vector<16x128xf32>
      %cst_182 = arith.constant 9.99999993E-9 : f32
      %cst_183 = arith.constant 0.816495776 : f32
      %709 = vector.broadcast %cst_182 : f32 to vector<16x128xf32>
      %710 = arith.maximumf %709, %708 : vector<16x128xf32>
      %711 = vector.broadcast %cst_183 : f32 to vector<16x128xf32>
      %712 = arith.minimumf %711, %710 : vector<16x128xf32>
      %cst_184 = arith.constant 1.000000e+00 : f32
      %713 = vector.broadcast %cst_184 : f32 to vector<16x128xf32>
      %714 = arith.addf %713, %712 : vector<16x128xf32>
      %cst_185 = arith.constant 1.000000e+00 : f32
      %715 = vector.broadcast %cst_185 : f32 to vector<16x128xf32>
      %716 = arith.subf %715, %712 : vector<16x128xf32>
      %717 = tpu.reciprocal %716 {approx = true} : vector<16x128xf32> -> vector<16x128xf32>
      %718 = arith.mulf %714, %717 : vector<16x128xf32>
      %719 = math.log %718 : vector<16x128xf32>
      %cst_186 = arith.constant 5.000000e-01 : f32
      %720 = vector.broadcast %cst_186 : f32 to vector<16x128xf32>
      %721 = arith.mulf %720, %719 : vector<16x128xf32>
      %cst_187 = arith.constant 0.816496611 : f32
      %722 = vector.broadcast %cst_187 : f32 to vector<16x128xf32>
      %723 = arith.addf %722, %712 : vector<16x128xf32>
      %cst_188 = arith.constant 0.816496611 : f32
      %724 = vector.broadcast %cst_188 : f32 to vector<16x128xf32>
      %725 = arith.subf %724, %712 : vector<16x128xf32>
      %726 = tpu.reciprocal %725 {approx = true} : vector<16x128xf32> -> vector<16x128xf32>
      %727 = arith.mulf %723, %726 : vector<16x128xf32>
      %728 = math.log %727 : vector<16x128xf32>
      %cst_189 = arith.constant 1.22474492 : f32
      %729 = vector.broadcast %cst_189 : f32 to vector<16x128xf32>
      %730 = arith.mulf %729, %728 : vector<16x128xf32>
      %731 = arith.addf %721, %730 : vector<16x128xf32>
      %732 = arith.subf %731, %518 : vector<16x128xf32>
      %733 = arith.mulf %712, %712 : vector<16x128xf32>
      %cst_190 = arith.constant 1.000000e+00 : f32
      %734 = vector.broadcast %cst_190 : f32 to vector<16x128xf32>
      %735 = arith.subf %734, %733 : vector<16x128xf32>
      %736 = tpu.reciprocal %735 {approx = true} : vector<16x128xf32> -> vector<16x128xf32>
      %737 = arith.mulf %712, %712 : vector<16x128xf32>
      %cst_191 = arith.constant 0.666666686 : f32
      %738 = vector.broadcast %cst_191 : f32 to vector<16x128xf32>
      %739 = arith.subf %738, %737 : vector<16x128xf32>
      %740 = tpu.reciprocal %739 {approx = true} : vector<16x128xf32> -> vector<16x128xf32>
      %cst_192 = arith.constant 2.000000e+00 : f32
      %741 = vector.broadcast %cst_192 : f32 to vector<16x128xf32>
      %742 = arith.mulf %741, %740 : vector<16x128xf32>
      %743 = arith.addf %736, %742 : vector<16x128xf32>
      %744 = tpu.reciprocal %743 {approx = true} : vector<16x128xf32> -> vector<16x128xf32>
      %745 = arith.mulf %732, %744 : vector<16x128xf32>
      %746 = arith.subf %712, %745 : vector<16x128xf32>
      %cst_193 = arith.constant 9.99999993E-9 : f32
      %cst_194 = arith.constant 0.816495776 : f32
      %747 = vector.broadcast %cst_193 : f32 to vector<16x128xf32>
      %748 = arith.maximumf %747, %746 : vector<16x128xf32>
      %749 = vector.broadcast %cst_194 : f32 to vector<16x128xf32>
      %750 = arith.minimumf %749, %748 : vector<16x128xf32>
      %cst_195 = arith.constant 1.000000e+00 : f32
      %751 = vector.broadcast %cst_195 : f32 to vector<16x128xf32>
      %752 = arith.addf %751, %750 : vector<16x128xf32>
      %cst_196 = arith.constant 1.000000e+00 : f32
      %753 = vector.broadcast %cst_196 : f32 to vector<16x128xf32>
      %754 = arith.subf %753, %750 : vector<16x128xf32>
      %755 = tpu.reciprocal %754 {approx = true} : vector<16x128xf32> -> vector<16x128xf32>
      %756 = arith.mulf %752, %755 : vector<16x128xf32>
      %757 = math.log %756 : vector<16x128xf32>
      %cst_197 = arith.constant 5.000000e-01 : f32
      %758 = vector.broadcast %cst_197 : f32 to vector<16x128xf32>
      %759 = arith.mulf %758, %757 : vector<16x128xf32>
      %cst_198 = arith.constant 0.816496611 : f32
      %760 = vector.broadcast %cst_198 : f32 to vector<16x128xf32>
      %761 = arith.addf %760, %750 : vector<16x128xf32>
      %cst_199 = arith.constant 0.816496611 : f32
      %762 = vector.broadcast %cst_199 : f32 to vector<16x128xf32>
      %763 = arith.subf %762, %750 : vector<16x128xf32>
      %764 = tpu.reciprocal %763 {approx = true} : vector<16x128xf32> -> vector<16x128xf32>
      %765 = arith.mulf %761, %764 : vector<16x128xf32>
      %766 = math.log %765 : vector<16x128xf32>
      %cst_200 = arith.constant 1.22474492 : f32
      %767 = vector.broadcast %cst_200 : f32 to vector<16x128xf32>
      %768 = arith.mulf %767, %766 : vector<16x128xf32>
      %769 = arith.addf %759, %768 : vector<16x128xf32>
      %770 = arith.subf %769, %518 : vector<16x128xf32>
      %771 = arith.mulf %750, %750 : vector<16x128xf32>
      %cst_201 = arith.constant 1.000000e+00 : f32
      %772 = vector.broadcast %cst_201 : f32 to vector<16x128xf32>
      %773 = arith.subf %772, %771 : vector<16x128xf32>
      %774 = tpu.reciprocal %773 {approx = true} : vector<16x128xf32> -> vector<16x128xf32>
      %775 = arith.mulf %750, %750 : vector<16x128xf32>
      %cst_202 = arith.constant 0.666666686 : f32
      %776 = vector.broadcast %cst_202 : f32 to vector<16x128xf32>
      %777 = arith.subf %776, %775 : vector<16x128xf32>
      %778 = tpu.reciprocal %777 {approx = true} : vector<16x128xf32> -> vector<16x128xf32>
      %cst_203 = arith.constant 2.000000e+00 : f32
      %779 = vector.broadcast %cst_203 : f32 to vector<16x128xf32>
      %780 = arith.mulf %779, %778 : vector<16x128xf32>
      %781 = arith.addf %774, %780 : vector<16x128xf32>
      %782 = tpu.reciprocal %781 {approx = true} : vector<16x128xf32> -> vector<16x128xf32>
      %783 = arith.mulf %770, %782 : vector<16x128xf32>
      %784 = arith.subf %750, %783 : vector<16x128xf32>
      %cst_204 = arith.constant 9.99999993E-9 : f32
      %cst_205 = arith.constant 0.816495776 : f32
      %785 = vector.broadcast %cst_204 : f32 to vector<16x128xf32>
      %786 = arith.maximumf %785, %784 : vector<16x128xf32>
      %787 = vector.broadcast %cst_205 : f32 to vector<16x128xf32>
      %788 = arith.minimumf %787, %786 : vector<16x128xf32>
      %cst_206 = arith.constant 1.000000e+00 : f32
      %789 = vector.broadcast %cst_206 : f32 to vector<16x128xf32>
      %790 = arith.addf %789, %788 : vector<16x128xf32>
      %cst_207 = arith.constant 1.000000e+00 : f32
      %791 = vector.broadcast %cst_207 : f32 to vector<16x128xf32>
      %792 = arith.subf %791, %788 : vector<16x128xf32>
      %793 = tpu.reciprocal %792 {approx = true} : vector<16x128xf32> -> vector<16x128xf32>
      %794 = arith.mulf %790, %793 : vector<16x128xf32>
      %795 = math.log %794 : vector<16x128xf32>
      %cst_208 = arith.constant 5.000000e-01 : f32
      %796 = vector.broadcast %cst_208 : f32 to vector<16x128xf32>
      %797 = arith.mulf %796, %795 : vector<16x128xf32>
      %cst_209 = arith.constant 0.816496611 : f32
      %798 = vector.broadcast %cst_209 : f32 to vector<16x128xf32>
      %799 = arith.addf %798, %788 : vector<16x128xf32>
      %cst_210 = arith.constant 0.816496611 : f32
      %800 = vector.broadcast %cst_210 : f32 to vector<16x128xf32>
      %801 = arith.subf %800, %788 : vector<16x128xf32>
      %802 = tpu.reciprocal %801 {approx = true} : vector<16x128xf32> -> vector<16x128xf32>
      %803 = arith.mulf %799, %802 : vector<16x128xf32>
      %804 = math.log %803 : vector<16x128xf32>
      %cst_211 = arith.constant 1.22474492 : f32
      %805 = vector.broadcast %cst_211 : f32 to vector<16x128xf32>
      %806 = arith.mulf %805, %804 : vector<16x128xf32>
      %807 = arith.addf %797, %806 : vector<16x128xf32>
      %808 = arith.subf %807, %518 : vector<16x128xf32>
      %809 = arith.mulf %788, %788 : vector<16x128xf32>
      %cst_212 = arith.constant 1.000000e+00 : f32
      %810 = vector.broadcast %cst_212 : f32 to vector<16x128xf32>
      %811 = arith.subf %810, %809 : vector<16x128xf32>
      %812 = tpu.reciprocal %811 {approx = true} : vector<16x128xf32> -> vector<16x128xf32>
      %813 = arith.mulf %788, %788 : vector<16x128xf32>
      %cst_213 = arith.constant 0.666666686 : f32
      %814 = vector.broadcast %cst_213 : f32 to vector<16x128xf32>
      %815 = arith.subf %814, %813 : vector<16x128xf32>
      %816 = tpu.reciprocal %815 {approx = true} : vector<16x128xf32> -> vector<16x128xf32>
      %cst_214 = arith.constant 2.000000e+00 : f32
      %817 = vector.broadcast %cst_214 : f32 to vector<16x128xf32>
      %818 = arith.mulf %817, %816 : vector<16x128xf32>
      %819 = arith.addf %812, %818 : vector<16x128xf32>
      %820 = tpu.reciprocal %819 {approx = true} : vector<16x128xf32> -> vector<16x128xf32>
      %821 = arith.mulf %808, %820 : vector<16x128xf32>
      %822 = arith.subf %788, %821 : vector<16x128xf32>
      %cst_215 = arith.constant 9.99999993E-9 : f32
      %cst_216 = arith.constant 0.816495776 : f32
      %823 = vector.broadcast %cst_215 : f32 to vector<16x128xf32>
      %824 = arith.maximumf %823, %822 : vector<16x128xf32>
      %825 = vector.broadcast %cst_216 : f32 to vector<16x128xf32>
      %826 = arith.minimumf %825, %824 : vector<16x128xf32>
      %827 = arith.mulf %826, %826 : vector<16x128xf32>
      %cst_217 = arith.constant 0.666666686 : f32
      %828 = vector.broadcast %cst_217 : f32 to vector<16x128xf32>
      %829 = arith.mulf %827, %828 : vector<16x128xf32>
      %830 = arith.mulf %826, %826 : vector<16x128xf32>
      %cst_218 = arith.constant 0.666666686 : f32
      %831 = vector.broadcast %cst_218 : f32 to vector<16x128xf32>
      %832 = arith.subf %831, %830 : vector<16x128xf32>
      %cst_219 = arith.constant 1.66666663 : f32
      %833 = vector.broadcast %cst_219 : f32 to vector<16x128xf32>
      %834 = arith.mulf %833, %832 : vector<16x128xf32>
      %835 = tpu.reciprocal %834 {approx = true} : vector<16x128xf32> -> vector<16x128xf32>
      %836 = arith.mulf %834, %835 : vector<16x128xf32>
      %cst_220 = arith.constant 2.000000e+00 : f32
      %837 = vector.broadcast %cst_220 : f32 to vector<16x128xf32>
      %838 = arith.subf %837, %836 : vector<16x128xf32>
      %839 = arith.mulf %835, %838 : vector<16x128xf32>
      %840 = arith.mulf %829, %839 : vector<16x128xf32>
      %841 = tpu.reciprocal %514 {approx = true} : vector<16x128xf32> -> vector<16x128xf32>
      %842 = arith.mulf %514, %841 : vector<16x128xf32>
      %cst_221 = arith.constant 2.000000e+00 : f32
      %843 = vector.broadcast %cst_221 : f32 to vector<16x128xf32>
      %844 = arith.subf %843, %842 : vector<16x128xf32>
      %845 = arith.mulf %841, %844 : vector<16x128xf32>
      %846 = arith.mulf %840, %845 : vector<16x128xf32>
      %847 = arith.mulf %513, %846 : vector<16x128xf32>
      %848 = math.sqrt %846 : vector<16x128xf32>
      %849 = arith.mulf %847, %848 : vector<16x128xf32>
      %850 = arith.mulf %840, %849 : vector<16x128xf32>
      %cst_222 = arith.constant 2.500000e+00 : f32
      %851 = vector.broadcast %cst_222 : f32 to vector<16x128xf32>
      %852 = arith.mulf %851, %840 : vector<16x128xf32>
      %cst_223 = arith.constant 1.000000e+00 : f32
      %853 = vector.broadcast %cst_223 : f32 to vector<16x128xf32>
      %854 = arith.addf %853, %852 : vector<16x128xf32>
      %855 = arith.mulf %826, %826 : vector<16x128xf32>
      %cst_224 = arith.constant 1.000000e+00 : f32
      %856 = vector.broadcast %cst_224 : f32 to vector<16x128xf32>
      %857 = arith.subf %856, %855 : vector<16x128xf32>
      %858 = math.rsqrt %857 : vector<16x128xf32>
      %859 = arith.mulf %858, %849 : vector<16x128xf32>
      %860 = arith.mulf %858, %854 : vector<16x128xf32>
      %cst_225 = arith.constant 1.000000e+00 : f32
      %861 = vector.broadcast %cst_225 : f32 to vector<16x128xf32>
      %862 = arith.subf %860, %861 : vector<16x128xf32>
      %863 = arith.mulf %858, %858 : vector<16x128xf32>
      %864 = arith.mulf %863, %849 : vector<16x128xf32>
      %865 = arith.mulf %864, %854 : vector<16x128xf32>
      %866 = arith.mulf %865, %826 : vector<16x128xf32>
      %867 = arith.mulf %866, %826 : vector<16x128xf32>
      %868 = vector.extract_strided_slice %826 {offsets = [0, 0], sizes = [8, 128], strides = [1, 1]} : vector<16x128xf32> to vector<8x128xf32>
      %869 = vector.extract_strided_slice %826 {offsets = [8, 0], sizes = [8, 128], strides = [1, 1]} : vector<16x128xf32> to vector<8x128xf32>
      %cst_226 = arith.constant 0.000000e+00 : f32
      %870 = vector.broadcast %cst_226 : f32 to vector<8x128xf32>
      %871 = arith.subf %870, %869 : vector<8x128xf32>
      %872 = vector.extract_strided_slice %859 {offsets = [0, 0], sizes = [8, 128], strides = [1, 1]} : vector<16x128xf32> to vector<8x128xf32>
      %873 = arith.mulf %872, %868 : vector<8x128xf32>
      %874 = vector.extract_strided_slice %859 {offsets = [0, 0], sizes = [8, 128], strides = [1, 1]} : vector<16x128xf32> to vector<8x128xf32>
      %875 = vector.extract_strided_slice %862 {offsets = [0, 0], sizes = [8, 128], strides = [1, 1]} : vector<16x128xf32> to vector<8x128xf32>
      %876 = arith.mulf %874, %875 : vector<8x128xf32>
      %877 = arith.mulf %876, %868 : vector<8x128xf32>
      %878 = vector.extract_strided_slice %867 {offsets = [0, 0], sizes = [8, 128], strides = [1, 1]} : vector<16x128xf32> to vector<8x128xf32>
      %879 = vector.extract_strided_slice %850 {offsets = [0, 0], sizes = [8, 128], strides = [1, 1]} : vector<16x128xf32> to vector<8x128xf32>
      %880 = arith.addf %878, %879 : vector<8x128xf32>
      %881 = vector.extract_strided_slice %859 {offsets = [8, 0], sizes = [8, 128], strides = [1, 1]} : vector<16x128xf32> to vector<8x128xf32>
      %882 = arith.mulf %881, %871 : vector<8x128xf32>
      %883 = vector.extract_strided_slice %859 {offsets = [8, 0], sizes = [8, 128], strides = [1, 1]} : vector<16x128xf32> to vector<8x128xf32>
      %884 = vector.extract_strided_slice %862 {offsets = [8, 0], sizes = [8, 128], strides = [1, 1]} : vector<16x128xf32> to vector<8x128xf32>
      %885 = arith.mulf %883, %884 : vector<8x128xf32>
      %886 = arith.mulf %885, %871 : vector<8x128xf32>
      %887 = vector.extract_strided_slice %867 {offsets = [8, 0], sizes = [8, 128], strides = [1, 1]} : vector<16x128xf32> to vector<8x128xf32>
      %888 = vector.extract_strided_slice %850 {offsets = [8, 0], sizes = [8, 128], strides = [1, 1]} : vector<16x128xf32> to vector<8x128xf32>
      %889 = arith.addf %887, %888 : vector<8x128xf32>
      %cst_227 = arith.constant 0.000000e+00 : f32
      %890 = vector.broadcast %cst_227 : f32 to vector<8x128xf32>
      %891 = arith.cmpf oge, %479, %890 : vector<8x128xf32>
      %cst_228 = arith.constant 0.000000e+00 : f32
      %892 = vector.broadcast %cst_228 : f32 to vector<8x128xf32>
      %893 = arith.cmpf olt, %479, %892 : vector<8x128xf32>
      %cst_229 = arith.constant 0.000000e+00 : f32
      %894 = vector.broadcast %cst_229 : f32 to vector<8x128xf32>
      %895 = arith.cmpf oge, %480, %894 : vector<8x128xf32>
      %896 = arith.andi %893, %895 : vector<8x128xi1>
      %cst_230 = arith.constant 0.000000e+00 : f32
      %897 = vector.broadcast %cst_230 : f32 to vector<8x128xf32>
      %898 = arith.cmpf olt, %480, %897 : vector<8x128xf32>
      %cst_231 = arith.constant 0.000000e+00 : f32
      %899 = vector.broadcast %cst_231 : f32 to vector<8x128xf32>
      %900 = arith.cmpf ogt, %478, %899 : vector<8x128xf32>
      %901 = arith.andi %898, %900 : vector<8x128xi1>
      %cst_232 = arith.constant 0.000000e+00 : f32
      %902 = vector.broadcast %cst_232 : f32 to vector<8x128xf32>
      %903 = arith.cmpf ole, %478, %902 : vector<8x128xf32>
      %cst_233 = arith.constant 0.000000e+00 : f32
      %904 = vector.broadcast %cst_233 : f32 to vector<8x128xf32>
      %905 = arith.cmpf ogt, %481, %904 : vector<8x128xf32>
      %906 = arith.andi %903, %905 : vector<8x128xi1>
      %cst_234 = arith.constant 0.000000e+00 : f32
      %907 = vector.broadcast %cst_234 : f32 to vector<8x128xf32>
      %908 = arith.cmpf ole, %481, %907 : vector<8x128xf32>
      %cst_235 = arith.constant 0.000000e+00 : f32
      %909 = vector.broadcast %cst_235 : f32 to vector<8x128xf32>
      %910 = arith.cmpf ogt, %482, %909 : vector<8x128xf32>
      %911 = arith.andi %908, %910 : vector<8x128xi1>
      %cst_236 = arith.constant 0.000000e+00 : f32
      %912 = vector.broadcast %cst_236 : f32 to vector<8x128xf32>
      %913 = arith.cmpf ole, %482, %912 : vector<8x128xf32>
      %914 = vector.extract_strided_slice %10 {offsets = [0, 0, 0], sizes = [1, 8, 128], strides = [1, 1, 1]} : vector<6x8x128xf32> to vector<1x8x128xf32>
      %915 = vector.shape_cast %914 : vector<1x8x128xf32> to vector<8x128xf32>
      %916 = vector.extract_strided_slice %10 {offsets = [2, 0, 0], sizes = [1, 8, 128], strides = [1, 1, 1]} : vector<6x8x128xf32> to vector<1x8x128xf32>
      %917 = vector.shape_cast %916 : vector<1x8x128xf32> to vector<8x128xf32>
      %918 = vector.extract_strided_slice %10 {offsets = [4, 0, 0], sizes = [1, 8, 128], strides = [1, 1, 1]} : vector<6x8x128xf32> to vector<1x8x128xf32>
      %919 = vector.shape_cast %918 : vector<1x8x128xf32> to vector<8x128xf32>
      %920 = vector.extract_strided_slice %10 {offsets = [1, 0, 0], sizes = [1, 8, 128], strides = [1, 1, 1]} : vector<6x8x128xf32> to vector<1x8x128xf32>
      %921 = vector.shape_cast %920 : vector<1x8x128xf32> to vector<8x128xf32>
      %922 = vector.extract_strided_slice %10 {offsets = [3, 0, 0], sizes = [1, 8, 128], strides = [1, 1, 1]} : vector<6x8x128xf32> to vector<1x8x128xf32>
      %923 = vector.shape_cast %922 : vector<1x8x128xf32> to vector<8x128xf32>
      %924 = vector.extract_strided_slice %10 {offsets = [5, 0, 0], sizes = [1, 8, 128], strides = [1, 1, 1]} : vector<6x8x128xf32> to vector<1x8x128xf32>
      %925 = vector.shape_cast %924 : vector<1x8x128xf32> to vector<8x128xf32>
      %cst_237 = arith.constant 0.000000e+00 : f32
      %926 = vector.broadcast %cst_237 : f32 to vector<8x128xf32>
      %927 = arith.select %891, %915, %926 : vector<8x128xi1>, vector<8x128xf32>
      %928 = arith.select %896, %873, %927 : vector<8x128xi1>, vector<8x128xf32>
      %929 = arith.select %901, %497, %928 : vector<8x128xi1>, vector<8x128xf32>
      %930 = arith.select %906, %505, %929 : vector<8x128xi1>, vector<8x128xf32>
      %931 = arith.select %911, %882, %930 : vector<8x128xi1>, vector<8x128xf32>
      %932 = arith.select %913, %921, %931 : vector<8x128xi1>, vector<8x128xf32>
      %cst_238 = arith.constant 0.000000e+00 : f32
      %933 = vector.broadcast %cst_238 : f32 to vector<8x128xf32>
      %934 = arith.select %891, %917, %933 : vector<8x128xi1>, vector<8x128xf32>
      %935 = arith.select %896, %877, %934 : vector<8x128xi1>, vector<8x128xf32>
      %936 = arith.select %901, %502, %935 : vector<8x128xi1>, vector<8x128xf32>
      %937 = arith.select %906, %510, %936 : vector<8x128xi1>, vector<8x128xf32>
      %938 = arith.select %911, %886, %937 : vector<8x128xi1>, vector<8x128xf32>
      %939 = arith.select %913, %923, %938 : vector<8x128xi1>, vector<8x128xf32>
      %cst_239 = arith.constant 0.000000e+00 : f32
      %940 = vector.broadcast %cst_239 : f32 to vector<8x128xf32>
      %941 = arith.select %891, %919, %940 : vector<8x128xi1>, vector<8x128xf32>
      %942 = arith.select %896, %880, %941 : vector<8x128xi1>, vector<8x128xf32>
      %943 = arith.select %901, %504, %942 : vector<8x128xi1>, vector<8x128xf32>
      %944 = arith.select %906, %512, %943 : vector<8x128xi1>, vector<8x128xf32>
      %945 = arith.select %911, %889, %944 : vector<8x128xi1>, vector<8x128xf32>
      %946 = arith.select %913, %925, %945 : vector<8x128xi1>, vector<8x128xf32>
      %947 = vector.shape_cast %932 : vector<8x128xf32> to vector<1x8x128xf32>
      %948 = vector.shape_cast %939 : vector<8x128xf32> to vector<1x8x128xf32>
      %949 = vector.shape_cast %946 : vector<8x128xf32> to vector<1x8x128xf32>
      %950 = tpu.concatenate %947, %948, %949 in 0 : vector<1x8x128xf32>, vector<1x8x128xf32>, vector<1x8x128xf32> -> vector<3x8x128xf32>
      %951 = arith.index_cast %arg8 : i32 to index
      %c0_240 = arith.constant 0 : index
      %c0_241 = arith.constant 0 : index
      %c0_242 = arith.constant 0 : index
      %952 = vector.load %arg7[%951, %c0_240, %c0_241, %c0_242] : memref<8x3x8x128xf32, #tpu.memory_space<vmem>>, vector<1x3x8x128xf32>
      %953 = vector.shape_cast %952 : vector<1x3x8x128xf32> to vector<3x8x128xf32>
      %954 = vector.shape_cast %950 : vector<3x8x128xf32> to vector<1x3x8x128xf32>
      tpu.vector_store %arg7[%951, %c0_240, %c0_241, %c0_242], %954 {strides = array<i32>} : memref<8x3x8x128xf32, #tpu.memory_space<vmem>>, vector<1x3x8x128xf32>,
    }
    %c8_i32_7 = arith.constant 8 : i32
    return
  }
  func.func @transform_0(%arg0: i32) -> (i32, i32, i32, i32) {
    %c0_i32 = arith.constant 0 : i32
    %c0_i32_0 = arith.constant 0 : i32
    %c0_i32_1 = arith.constant 0 : i32
    %c0_i32_2 = arith.constant 0 : i32
    return %arg0, %c0_i32, %c0_i32_0, %c0_i32_1 : i32, i32, i32, i32
  }
  func.func @transform_1(%arg0: i32) -> (i32, i32, i32, i32) {
    %c0_i32 = arith.constant 0 : i32
    %c0_i32_0 = arith.constant 0 : i32
    %c0_i32_1 = arith.constant 0 : i32
    %c0_i32_2 = arith.constant 0 : i32
    return %arg0, %c0_i32, %c0_i32_0, %c0_i32_1 : i32, i32, i32, i32
  }
  func.func @transform_2(%arg0: i32) -> (i32, i32) {
    %c0_i32 = arith.constant 0 : i32
    %c0_i32_0 = arith.constant 0 : i32
    %c0_i32_1 = arith.constant 0 : i32
    return %c0_i32, %c0_i32_0 : i32, i32
  }
  func.func @transform_3(%arg0: i32) -> (i32, i32) {
    %c0_i32 = arith.constant 0 : i32
    %c0_i32_0 = arith.constant 0 : i32
    %c0_i32_1 = arith.constant 0 : i32
    return %c0_i32, %c0_i32_0 : i32, i32
  }
  func.func @transform_4(%arg0: i32) -> (i32, i32) {
    %c0_i32 = arith.constant 0 : i32
    %c0_i32_0 = arith.constant 0 : i32
    %c0_i32_1 = arith.constant 0 : i32
    return %c0_i32, %c0_i32_0 : i32, i32
  }
  func.func @transform_5(%arg0: i32) -> (i32, i32) {
    %c0_i32 = arith.constant 0 : i32
    %c0_i32_0 = arith.constant 0 : i32
    %c0_i32_1 = arith.constant 0 : i32
    return %c0_i32, %c0_i32_0 : i32, i32
  }
  func.func @transform_6(%arg0: i32) -> (i32, i32, i32, i32) {
    %c0_i32 = arith.constant 0 : i32
    %c0_i32_0 = arith.constant 0 : i32
    %c0_i32_1 = arith.constant 0 : i32
    %c0_i32_2 = arith.constant 0 : i32
    return %arg0, %c0_i32, %c0_i32_0, %c0_i32_1 : i32, i32, i32, i32
  }
}

</mosaic_0001>

<bundles_post_ra>
// kernel: _forward_impl.1
= control target key start
LH: loop header
LB: loop body
LE: loop exit
PB: predicated region body
PF: predicated region fallthrough
CT: control target
= control target key end

     0   :  { %s3691_s21 = smov 0   ;;  %s5469_s0 = inlined_call_operand.vmem [shape: f32[32,6,8,128], index: 0, kind: input, shape index: {}]   ;;  %s5470_s1 = inlined_call_operand.vmem [shape: f32[32,6,8,128], index: 1, kind: input, shape index: {}]   ;;  %s5471_s2 = inlined_call_operand.vmem [shape: f32[128,6], index: 2, kind: input, shape index: {}]   ;;  %s5472_s3 = inlined_call_operand.vmem [shape: f32[128,1], index: 3, kind: input, shape index: {}]   ;;  %s5473_s4 = inlined_call_operand.vmem [shape: f32[4,128], index: 4, kind: input, shape index: {}]   ;;  %s5474_s5 = inlined_call_operand.vmem [shape: f32[4,1], index: 5, kind: input, shape index: {}]   ;;  %s5475_s6 = inlined_call_operand.vmem [shape: f32[32,3,8,128], index: 6, kind: output, shape index: {}]  }
   0x1 LB: > { %s2861_s22 = sadd.s32 4294967295, %s3646_s21   ;;  %p2865_p0 = scmp.ge.s32.totalorder %s3646_s21, 1  ;;  %s3646_s21 = sphi %s3691_s21, %s16_s21  }
   0x2   : > { %p226_p1 = scmp.lt.s32.totalorder %s3646_s21, 5 }
   0x4   : > { %p227_p2 = pnand %p2865_p0, %p226_p1 }
   0x5   : > { %s2866_s23 = sshll.u32 (!%p227_p2), %s2861_s22, 3  ;;  %s3884_s14 = smov (!%p227_p2), 0  }
   0x6   : > { %230 = sbr.rel (%p227_p2) target bundleno = 918 (0x396), region = 44  ;;  %p265_p3 = scmp.lt.s32.totalorder (!%p227_p2), %s2866_s23, 31 }
   0xb   : > { %v3702_v0 = vld [vmem:[%s5471_s2] sm:$0xff]  ;;  %v3707_v1 = vld [vmem:[%s5471_s2 + $0x8] sm:$0xff]  ;;  %v3712_v2 = vld [vmem:[%s5471_s2 + $0x10] sm:$0xff]  ;;  %s5777_s23 = smov (!%p265_p3, %s2866_s23), 31 }
   0xc   : > { %5534 = vst [vmem:[#allocation2_spill] sm:$0xff] %v3702_v0  ;;  %5535 = vst [vmem:[#allocation3_spill] sm:$0xff] %v3707_v1  ;;  %v3717_v3 = vld [vmem:[%s5471_s2 + $0x18] sm:$0xff]  ;;  %v3722_v4 = vld [vmem:[%s5471_s2 + $0x20] sm:$0xff]  ;;  %s2950_s8 = smul.u32 48, %s5777_s23 }
   0xd   : > { %5536 = vst [vmem:[#allocation4_spill] sm:$0xff] %v3712_v2  ;;  %5537 = vst [vmem:[#allocation5_spill] sm:$0xff] %v3717_v3  ;;  %v3727_v5 = vld [vmem:[%s5471_s2 + $0x28] sm:$0xff]  ;;  %v3732_v6 = vld [vmem:[%s5471_s2 + $0x30] sm:$0xff]  ;;  %s2951_s15 = smul.u32 24, %s5777_s23 }
   0xe   : > { %5538 = vst [vmem:[#allocation6_spill] sm:$0xff] %v3722_v4  ;;  %5539 = vst [vmem:[#allocation7_spill] sm:$0xff] %v3727_v5  ;;  %v3737_v7 = vld [vmem:[%s5471_s2 + $0x38] sm:$0xff]  ;;  %v3742_v8 = vld [vmem:[%s5471_s2 + $0x40] sm:$0xff]  ;;  %s3807_s26 = scalar_lea.vmem %s5469_s0, %s2950_s8  ;;  %s3812_s28 = scalar_lea.vmem %s5470_s1, %s2950_s8 }
   0xf   : > { %5540 = vst [vmem:[#allocation8_spill] sm:$0xff] %v3732_v6  ;;  %5541 = vst [vmem:[#allocation9_spill] sm:$0xff] %v3737_v7  ;;  %v3747_v9 = vld [vmem:[%s5471_s2 + $0x48] sm:$0xff]  ;;  %v3752_v10 = vld [vmem:[%s5471_s2 + $0x50] sm:$0xff]  ;;  %s3832_s8 = scalar_lea.vmem %s5475_s6, %s2951_s15 }
  0x10   : > { %5542 = vst [vmem:[#allocation10_spill] sm:$0xff] %v3742_v8  ;;  %5543 = vst [vmem:[#allocation11_spill] sm:$0xff] %v3747_v9  ;;  %v3757_v11 = vld [vmem:[%s5471_s2 + $0x58] sm:$0xff]  ;;  %v3762_v12 = vld [vmem:[%s5471_s2 + $0x60] sm:$0xff] }
  0x11   : > { %5544 = vst [vmem:[#allocation12_spill] sm:$0xff] %v3752_v10  ;;  %5545 = vst [vmem:[#allocation13_spill] sm:$0xff] %v3757_v11  ;;  %v3767_v13 = vld [vmem:[%s5471_s2 + $0x68] sm:$0xff]  ;;  %v3772_v14 = vld [vmem:[%s5471_s2 + $0x70] sm:$0xff] }
  0x12   : > { %5546 = vst [vmem:[#allocation14_spill] sm:$0xff] %v3762_v12  ;;  %5547 = vst [vmem:[#allocation15_spill] sm:$0xff] %v3767_v13  ;;  %v3777_v15 = vld [vmem:[%s5471_s2 + $0x78] sm:$0xff]  ;;  %v3782_v16 = vld [vmem:[%s5472_s3] sm:$0xff] }
  0x13   : > { %5548 = vst [vmem:[#allocation16_spill] sm:$0xff] %v3772_v14  ;;  %5549 = vst [vmem:[#allocation17_spill] sm:$0xff] %v3777_v15  ;;  %v3787_v17 = vld [vmem:[%s5472_s3 + $0x8] sm:$0xff]  ;;  %v3792_v18 = vld [vmem:[%s5472_s3 + $0x10] sm:$0xff] }
  0x14   : > { %5550 = vst [vmem:[#allocation18_spill] sm:$0xff] %v3782_v16  ;;  %5551 = vst [vmem:[#allocation19_spill] sm:$0xff] %v3787_v17  ;;  %v3797_v19 = vld [vmem:[%s5472_s3 + $0x18] sm:$0xff]  ;;  %v3802_v20 = vld [vmem:[%s5472_s3 + $0x20] sm:$0xff] }
  0x15   : > { %5552 = vst [vmem:[#allocation20_spill] sm:$0xff] %v3792_v18  ;;  %5553 = vst [vmem:[#allocation21_spill] sm:$0xff] %v3797_v19  ;;  %v3817_v21 = vld [vmem:[%s5472_s3 + $0x28] sm:$0xff]  ;;  %v3822_v22 = vld [vmem:[%s5472_s3 + $0x30] sm:$0xff] }
  0x16   : > { %5554 = vst [vmem:[#allocation22_spill] sm:$0xff] %v3802_v20  ;;  %5555 = vst [vmem:[#allocation23_spill] sm:$0xff] %v3817_v21  ;;  %v3827_v23 = vld [vmem:[%s5472_s3 + $0x38] sm:$0xff]  ;;  %v3837_v24 = vld [vmem:[%s5472_s3 + $0x40] sm:$0xff] }
  0x17   : > { %5556 = vst [vmem:[#allocation24_spill] sm:$0xff] %v3822_v22  ;;  %5557 = vst [vmem:[#allocation25_spill] sm:$0xff] %v3827_v23  ;;  %v3842_v25 = vld [vmem:[%s5472_s3 + $0x48] sm:$0xff]  ;;  %v3847_v26 = vld [vmem:[%s5472_s3 + $0x50] sm:$0xff] }
  0x18   : > { %5558 = vst [vmem:[#allocation26_spill] sm:$0xff] %v3837_v24  ;;  %5559 = vst [vmem:[#allocation27_spill] sm:$0xff] %v3842_v25  ;;  %v3852_v27 = vld [vmem:[%s5472_s3 + $0x58] sm:$0xff]  ;;  %v3857_v28 = vld [vmem:[%s5472_s3 + $0x60] sm:$0xff] }
  0x19   : > { %5560 = vst [vmem:[#allocation28_spill] sm:$0xff] %v3847_v26  ;;  %5561 = vst [vmem:[#allocation29_spill] sm:$0xff] %v3852_v27  ;;  %v3862_v29 = vld [vmem:[%s5472_s3 + $0x68] sm:$0xff]  ;;  %v3867_v30 = vld [vmem:[%s5472_s3 + $0x70] sm:$0xff] }
  0x1a   : > { %5562 = vst [vmem:[#allocation30_spill] sm:$0xff] %v3857_v28  ;;  %5563 = vst [vmem:[#allocation31_spill] sm:$0xff] %v3862_v29  ;;  %v3872_v31 = vld [vmem:[%s5472_s3 + $0x78] sm:$0xff]  ;;  %v3877_v32 = vld [vmem:[%s5473_s4] sm:$0xf] }
  0x1b   : > { %5564 = vst [vmem:[#allocation32_spill] sm:$0xff] %v3867_v30  ;;  %5565 = vst [vmem:[#allocation33_spill] sm:$0xff] %v3872_v31  ;;  %v3882_v33 = vld [vmem:[%s5474_s5] sm:$0xf] }
  0x1c   : > { %5566 = vst [vmem:[#allocation34_spill] sm:$0xff] %v3877_v32  ;;  %5567 = vst [vmem:[#allocation35_spill] sm:$0xff] %v3882_v33 }
  0x1d LB: >> { %v5568_v15 = vld [vmem:[#allocation17_spill] sm:$0xff]  ;;  %v5569_v14 = vld [vmem:[#allocation16_spill] sm:$0xff]  ;;  %v5570_v13 = vld [vmem:[#allocation15_spill] sm:$0xff]  ;;  %s325_s16 = smul.u32 48, %s3650_s14  ;;  %v5476_v34 = vmov 0.0   ;;  %v3653_v35 = vmov 0   ;;  %v353_v42 = vlaneseq  ;;  %s3650_s14 = sphi %s3884_s14, %s324_s14  }
  0x1e   : >> { %v5571_v12 = vld [vmem:[#allocation14_spill] sm:$0xff]  ;;  %v5572_v11 = vld [vmem:[#allocation13_spill] sm:$0xff]  ;;  %v5573_v10 = vld [vmem:[#allocation12_spill] sm:$0xff]  ;;  %700 = vmatprep.mubr.f32.mxu0 %v5476_v34  ;;  %861 = vmatprep.mubr.f32.mxu1 %v5476_v34  ;;  %v3654_v40 = vmov 1983009808   ;;  %vm611_vm0 = vcmask 1045504  }
  0x1f   : >> { %v5574_v9 = vld [vmem:[#allocation11_spill] sm:$0xff]  ;;  %v5575_v8 = vld [vmem:[#allocation10_spill] sm:$0xff]  ;;  %v5576_v7 = vld [vmem:[#allocation9_spill] sm:$0xff]  ;;  %2973 = vset.pattern.permute.xlu1 %v3653_v35  ;;  %2972 = vset.pattern.permute.xlu0 %v3653_v35  ;;  %s3895_s17 = scalar_lea.vmem %s3807_s26, %s325_s16  ;;  %v351_v41 = vunpack.c.l.s4 %v3654_v40  ;;  %v354_v44 = vshrl.u32 %v353_v42, 7  ;;  %v3655_v46 = vmov 1934713408   ;;  %s4777_s18 = scalar_lea.vmem %s3812_s28, %s325_s16 }
  0x20   : >> { %v5577_v6 = vld [vmem:[#allocation8_spill] sm:$0xff]  ;;  %v5578_v5 = vld [vmem:[#allocation7_spill] sm:$0xff]  ;;  %v5579_v4 = vld [vmem:[#allocation6_spill] sm:$0xff]  ;;  %v413_v47 = vunpack.c.l.s4 %v3655_v46  ;;  %vm562_vm1 = vcmask 48128   ;;  %s2775_s19 = smul.u32 24, %s3650_s14  ;;  %s324_s14 = sadd.s32 1, %s3650_s14  }
  0x21   : >> { %v5580_v3 = vld [vmem:[#allocation5_spill] sm:$0xff]  ;;  %v5581_v2 = vld [vmem:[#allocation4_spill] sm:$0xff]  ;;  %v5582_v1 = vld [vmem:[#allocation3_spill] sm:$0xff]  ;;  %v352_v43 = vunpack.c.0.s8 %v351_v41  ;;  %p321_p4 = scmp.ge.s32.totalorder %s324_s14, 8  }
  0x22   : >> { %v5583_v0 = vld [vmem:[#allocation2_spill] sm:$0xff]  ;;  %v5584_v29 = vld [vmem:[#allocation31_spill] sm:$0xff]  ;;  %v5585_v31 = vld [vmem:[#allocation33_spill] sm:$0xff]  ;;  %v414_v53 = vunpack.c.0.s8 %v413_v47  ;;  %s2776_s20 = scalar_lea.vmem %s3832_s8, %s2775_s19 }
  0x23   : >> { %549 = vperm.xlu1 %2973, %v5584_v29   ;;  %559 = vperm.xlu0 %2972, %v5585_v31   ;;  %v327_v36 = vld [vmem:[%s3895_s17] sm:$0xff]  ;;  %v328_v37 = vld [vmem:[%s3895_s17 + $0x8] sm:$0xff]  ;;  %v3902_v38 = vld [vmem:[%s3895_s17 + $0x10] sm:$0xff]  ;;  %v3913_v45 = vsub.s32 %v352_v43, %v354_v44 }
  0x24   : >> { %v3905_v39 = vld [vmem:[%s3895_s17 + $0x18] sm:$0xff]  ;;  %2974 = vlog2.f32 %v327_v36  ;;  %v5586_v28 = vld [vmem:[#allocation30_spill] sm:$0xff]  ;;  %v5587_v30 = vld [vmem:[#allocation32_spill] sm:$0xff]  ;;  %v3937_v35 = vsub.s32 %v414_v53, %v354_v44 }
  0x25   : >> { %2976 = vlog2.f32 %v328_v37  ;;  %v5588_v26 = vld [vmem:[#allocation28_spill] sm:$0xff]  ;;  %v5589_v27 = vld [vmem:[#allocation29_spill] sm:$0xff]  ;;  %5590 = vst [vmem:[#allocation36_spill] sm:$0xff] %v3913_v45  ;;  %v3916_v48 = vld [vmem:[%s3895_s17 + $0x20] sm:$0xff] }
  0x26   : >> { %2978 = vlog2.f32 %v3902_v38  ;;  %v3919_v49 = vld [vmem:[%s3895_s17 + $0x28] sm:$0xff]  ;;  %v5591_v24 = vld [vmem:[#allocation26_spill] sm:$0xff]  ;;  %v387_v51 = vrot.slane %v3916_v48, %v3913_v45  ;;  %v380_v54 = vcombine.high %v3916_v48, %v5476_v34  ;;  %v5593_v22 = vld [vmem:[#allocation24_spill] sm:$0xff]  ;;  %5597 = vst [vmem:[#allocation39_spill] sm:$0xff] %v3937_v35 }
  0x27   : >> { %544 = vperm.xlu1 %2973, %v5586_v28   ;;  %554 = vperm.xlu0 %2972, %v5587_v30   ;;  %2980 = vlog2.f32 %v3905_v39  ;;  %v5592_v25 = vld [vmem:[#allocation27_spill] sm:$0xff]  ;;  %v402_v52 = vrot.slane %v3919_v49, %v3913_v45  ;;  %v5594_v23 = vld [vmem:[#allocation25_spill] sm:$0xff]  ;;  %v395_v59 = vcombine.high %v3919_v49, %v5476_v34  ;;  %v5598_v20 = vld [vmem:[#allocation22_spill] sm:$0xff] }
  0x28   : >> { %2982 = vrcp.f32 %v327_v36  ;;  %v394_v41 = vrot.slane %v380_v54, %v3913_v45  ;;  %v5599_v21 = vld [vmem:[#allocation23_spill] sm:$0xff]  ;;  %v5600_v18 = vld [vmem:[#allocation20_spill] sm:$0xff]  ;;  %v5601_v19 = vld [vmem:[#allocation21_spill] sm:$0xff] }
  0x29   : >> { %2984 = vrcp.f32 %v328_v37  ;;  %v442_v40 = vcombine.low %v387_v51, %v402_v52  ;;  %v409_v44 = vrot.slane %v395_v59, %v3913_v45  ;;  %v5604_v16 = vld [vmem:[#allocation18_spill] sm:$0xff]  ;;  %v5605_v17 = vld [vmem:[#allocation19_spill] sm:$0xff] }
  0x2a   : >> { %v5606_v33 = vld [vmem:[#allocation35_spill] sm:$0xff] }
  0x2b   : >> { %534 = vperm.xlu1 %2973, %v5588_v26   ;;  %539 = vperm.xlu0 %2972, %v5589_v27  }
  0x2f   : >> { %524 = vperm.xlu1 %2973, %v5591_v24   ;;  %529 = vperm.xlu0 %2972, %v5592_v25  }
  0x31   : >> { %v2975_v50 = vpop.eup %2974 }
  0x32   : >> { %v2977_v55 = vpop.eup %2976  ;;  %v341_v56 = vmul.f32 0.6931472, %v2975_v50 }
  0x33   : >> { %514 = vperm.xlu1 %2973, %v5593_v22   ;;  %519 = vperm.xlu0 %2972, %v5594_v23   ;;  %v2979_v57 = vpop.eup %2978  ;;  %v343_v58 = vmul.f32 0.6931472, %v2977_v55 }
  0x34   : >> { %v2981_v60 = vpop.eup %2980  ;;  %v3933_v61 = vmul.f32 0.6931472, %v2979_v57 }
  0x35   : >> { %v2983_v62 = vpop.eup %2982  ;;  %v3935_v63 = vmul.f32 0.6931472, %v2981_v60 }
  0x36   : >> { %5595 = vst [vmem:[#allocation37_spill] sm:$0xff] %v3933_v61  ;;  %v2985_v42 = vpop.eup %2984  ;;  %v348_v43 = vcombine.low %v341_v56, %v3933_v61  ;;  %v349_v46 = vcombine.high %v341_v56, %v3933_v61  ;;  %v1766_v47 = vmul.f32 %v2983_v62, %v327_v36  ;;  %v443_v36 = vcombine.high %v387_v51, %v402_v52 }
  0x37   : >> { %5596 = vst [vmem:[#allocation38_spill] sm:$0xff] %v3935_v63  ;;  %504 = vperm.xlu1 %2973, %v5598_v20   ;;  %509 = vperm.xlu0 %2972, %v5599_v21   ;;  %v364_v50 = vcombine.low %v343_v58, %v3935_v63  ;;  %v365_v55 = vcombine.high %v343_v58, %v3935_v63 }
  0x38   : >> { %v1771_v57 = vmul.f32 %v2985_v42, %v328_v37  ;;  %v356_v53 = vrot.slane %v348_v43, %v3913_v45  ;;  %v1767_v54 = vsub.f32 2.0, %v1766_v47  ;;  %v363_v60 = vrot.slane %v349_v46, %v3913_v45 }
  0x39   : >> { %v372_v34 = vrot.slane %v364_v50, %v3913_v45  ;;  %v379_v20 = vrot.slane %v365_v55, %v3913_v45  ;;  %v450_v21 = vrot.slane %v442_v40, %v3937_v35  ;;  %v458_v43 = vcombine.low %v394_v41, %v409_v44 }
  0x3a   : >> { %v1772_v56 = vsub.f32 2.0, %v1771_v57  ;;  %v1768_v22 = vmul.f32 %v2983_v62, %v1767_v54  ;;  %v457_v52 = vrot.slane %v443_v36, %v3937_v35 }
  0x3b   : >> { %494 = vperm.xlu1 %2973, %v5600_v18   ;;  %499 = vperm.xlu0 %2972, %v5601_v19   ;;  %v410_v37 = vcombine.low %v356_v53, %v372_v34  ;;  %v411_v59 = vcombine.high %v356_v53, %v372_v34  ;;  %v426_v46 = vcombine.low %v363_v60, %v379_v20 }
  0x3c   : >> { %v1773_v58 = vmul.f32 %v2985_v42, %v1772_v56  ;;  %v3955_v47 = vmul.f32 %v1768_v22, %v3902_v38  ;;  %v459_v42 = vcombine.high %v394_v41, %v409_v44  ;;  %v466_v55 = vrot.slane %v458_v43, %v3937_v35 }
  0x3d   : >> { %v418_v50 = vrot.slane %v410_v37, %v3937_v35  ;;  %v425_v34 = vrot.slane %v411_v59, %v3937_v35  ;;  %v434_v53 = vrot.slane %v426_v46, %v3937_v35  ;;  %v427_v54 = vcombine.high %v363_v60, %v379_v20 }
  0x3e   : >> { %5602 = vst [vmem:[#allocation40_spill] sm:$0xff] %v3955_v47  ;;  %v3959_v51 = vmul.f32 %v1773_v58, %v3905_v39  ;;  %v1775_v62 = vmul.f32 2.5, %v3955_v47  ;;  %v3964_v40 = vmul.f32 1.6666666, %v3955_v47  ;;  %v473_v56 = vrot.slane %v459_v42, %v3937_v35 }
  0x3f   : >> { %484 = vperm.xlu1 %2973, %v5604_v16   ;;  %489 = vperm.xlu0 %2972, %v5605_v17   ;;  %v475_v22 = vcombine.high %v418_v50, %v450_v21  ;;  %v477_v44 = vcombine.high %v425_v34, %v457_v52  ;;  %v474_v36 = vcombine.low %v418_v50, %v450_v21  ;;  %v1810_v60 = vsub.f32 1.0, %v3919_v49 }
  0x40   : >> { %5603 = vst [vmem:[#allocation41_spill] sm:$0xff] %v3959_v51  ;;  %v1787_v38 = vmul.f32 2.5, %v3959_v51  ;;  %v1789_v39 = vmul.f32 1.6666666, %v3959_v51  ;;  %v1776_v57 = vadd.f32 1.0, %v1775_v62  ;;  %2986 = vrsqrt.f32 %v3964_v40 }
  0x41   : >> { %2872 = vmatprep.subr.msk.mxu0 %vm611_vm0, %v475_v22  ;;  %v476_v37 = vcombine.low %v425_v34, %v457_v52  ;;  %2890 = vmatprep.subr.msk.mxu1 %vm611_vm0, %v477_v44  ;;  %v478_v58 = vcombine.low %v434_v53, %v466_v55  ;;  %v479_v59 = vcombine.high %v434_v53, %v466_v55  ;;  %v5607_v46 = vmov 0.0  }
  0x42   : >> { %v1788_v41 = vadd.f32 1.0, %v1787_v38  ;;  %2988 = vrsqrt.f32 %v1789_v39  ;;  %v441_v20 = vrot.slane %v427_v54, %v3937_v35  ;;  %2873 = vmatpush1.msk.msra.mxu0 %vm611_vm0, %v474_v36  ;;  %vm1780_vm2 = vcmp.eq.f32.partialorder %v3964_v40, inf }
  0x43   : >> { %2990 = vrsqrt.f32 %v1776_v57  ;;  %1410 = vperm.xlu0 %2972, %v5606_v33   ;;  %2891 = vmatpush1.msk.msra.mxu1 %vm611_vm0, %v476_v37  ;;  %v1783_v52 = vand.u32 2147483648, %v3964_v40  ;;  %vm1782_vm3 = vcmp.eq.f32.partialorder %v3964_v40, 0.0  ;;  %vm1792_vm4 = vcmp.eq.f32.partialorder %v1789_v39, inf }
  0x44   : >> { %2992 = vrsqrt.f32 %v1788_v41  ;;  %2874 = vmatmul.mubr.msk.f32.vlgmr.msra.gmra.mxu0 %vm562_vm1, %v5583_v0  ;;  %2892 = vmatmul.mubr.msk.f32.vlgmr.msra.gmra.mxu1 %vm562_vm1, %v5583_v0  ;;  %v480_v21 = vcombine.low %v441_v20, %v473_v56  ;;  %v481_v43 = vcombine.high %v441_v20, %v473_v56  ;;  %v1795_v42 = vand.u32 2147483648, %v1789_v39 }
  0x45   : >> { %2908 = vmatprep.subr.msk.mxu0 %vm611_vm0, %v479_v59  ;;  %706 = vmatprep.mubr.f32.mxu0 %v5607_v46  ;;  %2994 = vrcp.f32 %v1810_v60  ;;  %vm1794_vm5 = vcmp.eq.f32.partialorder %v1789_v39, 0.0  ;;  %v1809_v20 = vadd.f32 1.0, %v3919_v49 }
  0x46   : >> { %2926 = vmatprep.subr.msk.mxu1 %vm611_vm0, %v481_v43  ;;  %2909 = vmatpush1.msk.msra.mxu0 %vm611_vm0, %v478_v58 }
  0x47   : >> { %2927 = vmatpush1.msk.msra.mxu1 %vm611_vm0, %v480_v21  ;;  %867 = vmatprep.mubr.f32.mxu1 %v5607_v46 }
  0x48   : >> { %2875 = vmatmul.mubr.msk.f32.gmra.mxu0 %vm562_vm1, %v5582_v1  ;;  %2893 = vmatmul.mubr.msk.f32.gmra.mxu1 %vm562_vm1, %v5582_v1 }
  0x49   : >> { %712 = vmatprep.mubr.f32.mxu0 %v5607_v46  ;;  %873 = vmatprep.mubr.f32.mxu1 %v5607_v46 }
  0x4c   : >> { %2876 = vmatmul.mubr.msk.f32.gmra.mxu0 %vm562_vm1, %v5581_v2  ;;  %2894 = vmatmul.mubr.msk.f32.gmra.mxu1 %vm562_vm1, %v5581_v2 }
  0x4d   : >> { %v2987_v50 = vpop.eup %2986  ;;  %718 = vmatprep.mubr.f32.mxu0 %v5607_v46  ;;  %879 = vmatprep.mubr.f32.mxu1 %v5607_v46 }
  0x4e   : >> { %v1779_v34 = vmul.f32 %v2987_v50, %v3964_v40 }
  0x4f   : >> { %v2989_v62 = vpop.eup %2988 }
  0x50   : >> { %v2991_v22 = vpop.eup %2990  ;;  %v1791_v38 = vmul.f32 %v2989_v62, %v1789_v39  ;;  %v1781_v57 = vsel %vm1780_vm2, %v3964_v40, %v1779_v34  ;;  %2877 = vmatmul.mubr.msk.f32.gmra.mxu0 %vm562_vm1, %v5580_v3  ;;  %2895 = vmatmul.mubr.msk.f32.gmra.mxu1 %vm562_vm1, %v5580_v3 }
  0x51   : >> { %v2993_v55 = vpop.eup %2992  ;;  %v1784_v53 = vsel %vm1782_vm3, %v1783_v52, %v1781_v57  ;;  %724 = vmatprep.mubr.f32.mxu0 %v5607_v46  ;;  %885 = vmatprep.mubr.f32.mxu1 %v5607_v46 }
  0x52   : >> { %v1793_v54 = vsel %vm1792_vm4, %v1789_v39, %v1791_v38  ;;  %v4009_v41 = vmul.f32 %v2991_v22, %v1784_v53  ;;  %v2995_v37 = vpop.eup %2994 }
  0x53   : >> { %v1796_v44 = vsel %vm1794_vm5, %v1795_v42, %v1793_v54  ;;  %v1812_v58 = vmul.f32 %v2995_v37, %v1810_v60 }
  0x54   : >> { %v4015_v56 = vmul.f32 %v2993_v55, %v1796_v44  ;;  %v4021_v40 = vsub.f32 %v3916_v48, %v4009_v41  ;;  %2878 = vmatmul.mubr.msk.f32.gmra.mxu0 %vm562_vm1, %v5579_v4  ;;  %2896 = vmatmul.mubr.msk.f32.gmra.mxu1 %vm562_vm1, %v5579_v4  ;;  %v1800_v44 = vsub.f32 1.0, %v3916_v48 }
  0x55   : >> { %730 = vmatprep.mubr.f32.mxu0 %v5607_v46  ;;  %891 = vmatprep.mubr.f32.mxu1 %v5607_v46  ;;  %v1813_v59 = vsub.f32 2.0, %v1812_v58 }
  0x56   : >> { %5608 = vst [vmem:[#allocation42_spill] sm:$0xff] %v4021_v40  ;;  %v1830_v39 = vsub.f32 0.8164966, %v4015_v56  ;;  %v4026_v36 = vadd.f32 %v4015_v56, %v3919_v49  ;;  %v1829_v49 = vadd.f32 0.8164966, %v4015_v56 }
  0x57   : >> { %v1814_v60 = vmul.f32 %v2995_v37, %v1813_v59  ;;  %v2210_v37 = vmax.f32 %v4009_v41, 1e-08  ;;  %v2211_v58 = vmax.f32 %v4015_v56, 1e-08 }
  0x58   : >> { %5609 = vst [vmem:[#allocation43_spill] sm:$0xff] %v4026_v36  ;;  %2996 = vrcp.f32 %v1830_v39  ;;  %2879 = vmatmul.mubr.msk.f32.gmra.mxu0 %vm562_vm1, %v5578_v5  ;;  %2897 = vmatmul.mubr.msk.f32.gmra.mxu1 %vm562_vm1, %v5578_v5 }
  0x59   : >> { %736 = vmatprep.mubr.f32.mxu0 %v5607_v46  ;;  %897 = vmatprep.mubr.f32.mxu1 %v5607_v46  ;;  %v1815_v43 = vmul.f32 %v1814_v60, %v1809_v20  ;;  %v4126_v59 = vmin.f32 %v2210_v37, 0.8164958  ;;  %v4128_v20 = vmin.f32 %v2211_v58, 0.8164958  ;;  %v1819_v37 = vadd.f32 0.8164966, %v4009_v41 }
  0x5b   : >> { %2998 = vlog2.f32 %v1815_v43  ;;  %v2216_v56 = vsub.f32 1.0, %v4126_v59  ;;  %v2230_v43 = vsub.f32 0.8164966, %v4126_v59 }
  0x5c   : >> { %2880 = vmatmul.mubr.msk.f32.gmra.mxu0 %vm562_vm1, %v5577_v6  ;;  %2898 = vmatmul.mubr.msk.f32.gmra.mxu1 %vm562_vm1, %v5577_v6 }
  0x5d   : >> { %742 = vmatprep.mubr.f32.mxu0 %v5607_v46  ;;  %903 = vmatprep.mubr.f32.mxu1 %v5607_v46 }
  0x60   : >> { %2881 = vmatmul.mubr.msk.f32.gmra.mxu0 %vm562_vm1, %v5576_v7  ;;  %2899 = vmatmul.mubr.msk.f32.gmra.mxu1 %vm562_vm1, %v5576_v7 }
  0x61   : >> { %748 = vmatprep.mubr.f32.mxu0 %v5607_v46  ;;  %909 = vmatprep.mubr.f32.mxu1 %v5607_v46 }
  0x64   : >> { %2882 = vmatmul.mubr.msk.f32.gmra.mxu0 %vm562_vm1, %v5575_v8  ;;  %2900 = vmatmul.mubr.msk.f32.gmra.mxu1 %vm562_vm1, %v5575_v8 }
  0x65   : >> { %v2997_v21 = vpop.eup %2996  ;;  %754 = vmatprep.mubr.f32.mxu0 %v5607_v46  ;;  %915 = vmatprep.mubr.f32.mxu1 %v5607_v46 }
  0x66   : >> { %v1832_v50 = vmul.f32 %v2997_v21, %v1830_v39  ;;  %v1820_v39 = vsub.f32 0.8164966, %v4009_v41 }
  0x68   : >> { %v1833_v52 = vsub.f32 2.0, %v1832_v50  ;;  %2883 = vmatmul.mubr.msk.f32.gmra.mxu0 %vm562_vm1, %v5574_v9  ;;  %2901 = vmatmul.mubr.msk.f32.gmra.mxu1 %vm562_vm1, %v5574_v9  ;;  %v2999_v42 = vpop.eup %2998  ;;  %v2231_v50 = vsub.f32 0.8164966, %v4128_v20 }
  0x69   : >> { %760 = vmatprep.mubr.f32.mxu0 %v5607_v46  ;;  %921 = vmatprep.mubr.f32.mxu1 %v5607_v46  ;;  %v1817_v22 = vmul.f32 0.6931472, %v2999_v42  ;;  %v2246_v42 = vmul.f32 %v4126_v59, %v4126_v59 }
  0x6a   : >> { %v1834_v62 = vmul.f32 %v2997_v21, %v1833_v52  ;;  %v2217_v21 = vsub.f32 1.0, %v4128_v20 }
  0x6b   : >> { %v4090_v57 = vmul.f32 0.5, %v1817_v22 }
  0x6c   : >> { %v1835_v34 = vmul.f32 %v1834_v62, %v1829_v49  ;;  %2884 = vmatmul.mubr.msk.f32.gmra.mxu0 %vm562_vm1, %v5573_v10  ;;  %2902 = vmatmul.mubr.msk.f32.gmra.mxu1 %vm562_vm1, %v5573_v10 }
  0x6d   : >> { %766 = vmatprep.mubr.f32.mxu0 %v5607_v46  ;;  %927 = vmatprep.mubr.f32.mxu1 %v5607_v46 }
  0x6e   : >> { %3000 = vlog2.f32 %v1835_v34 }
  0x6f   : >> { %3002 = vrcp.f32 %v1800_v44 }
  0x70   : >> { %2885 = vmatmul.mubr.msk.f32.gmra.mxu0 %vm562_vm1, %v5572_v11  ;;  %2903 = vmatmul.mubr.msk.f32.gmra.mxu1 %vm562_vm1, %v5572_v11  ;;  %3004 = vrcp.f32 %v1820_v39 }
  0x71   : >> { %772 = vmatprep.mubr.f32.mxu0 %v5607_v46  ;;  %933 = vmatprep.mubr.f32.mxu1 %v5607_v46  ;;  %3006 = vrcp.f32 %v2216_v56 }
  0x72   : >> { %3008 = vrcp.f32 %v2217_v21 }
  0x73   : >> { %3010 = vrcp.f32 %v2230_v43  ;;  %v2214_v43 = vadd.f32 1.0, %v4126_v59 }
  0x74   : >> { %2886 = vmatmul.mubr.msk.f32.gmra.mxu0 %vm562_vm1, %v5571_v12  ;;  %2904 = vmatmul.mubr.msk.f32.gmra.mxu1 %vm562_vm1, %v5571_v12  ;;  %3012 = vrcp.f32 %v2231_v50  ;;  %v2248_v50 = vsub.f32 1.0, %v2246_v42 }
  0x75   : >> { %778 = vmatprep.mubr.f32.mxu0 %v5607_v46  ;;  %939 = vmatprep.mubr.f32.mxu1 %v5607_v46 }
  0x78   : >> { %2887 = vmatmul.mubr.msk.f32.gmra.mxu0 %vm562_vm1, %v5570_v13  ;;  %2905 = vmatmul.mubr.msk.f32.gmra.mxu1 %vm562_vm1, %v5570_v13 }
  0x79   : >> { %784 = vmatprep.mubr.f32.mxu0 %v5607_v46  ;;  %945 = vmatprep.mubr.f32.mxu1 %v5607_v46 }
  0x7b   : >> { %v3001_v38 = vpop.eup %3000 }
  0x7c   : >> { %v1837_v55 = vmul.f32 0.6931472, %v3001_v38  ;;  %2888 = vmatmul.mubr.msk.f32.gmra.mxu0 %vm562_vm1, %v5569_v14  ;;  %2906 = vmatmul.mubr.msk.f32.gmra.mxu1 %vm562_vm1, %v5569_v14  ;;  %v3003_v60 = vpop.eup %3002  ;;  %v2247_v38 = vmul.f32 %v4128_v20, %v4128_v20 }
  0x7d   : >> { %790 = vmatprep.mubr.f32.mxu0 %v5607_v46  ;;  %951 = vmatprep.mubr.f32.mxu1 %v5607_v46  ;;  %v3005_v49 = vpop.eup %3004  ;;  %v1802_v52 = vmul.f32 %v3003_v60, %v1800_v44 }
  0x7e   : >> { %v4092_v53 = vmul.f32 1.2247449, %v1837_v55  ;;  %v1822_v62 = vmul.f32 %v3005_v49, %v1820_v39  ;;  %v1799_v55 = vadd.f32 1.0, %v3916_v48  ;;  %v2252_v39 = vsub.f32 0.6666667, %v2246_v42  ;;  %v3007_v48 = vpop.eup %3006 }
  0x7f   : >> { %v1803_v34 = vsub.f32 2.0, %v1802_v52  ;;  %v2253_v56 = vsub.f32 0.6666667, %v2247_v38  ;;  %v3009_v52 = vpop.eup %3008 }
  0x80   : >> { %v4100_v54 = vsub.f32 %v4090_v57, %v4092_v53  ;;  %2889 = vmatmul.mubr.msk.f32.gmra.mxu0 %vm562_vm1, %v5568_v15  ;;  %2907 = vmatmul.mubr.msk.f32.gmra.mxu1 %vm562_vm1, %v5568_v15  ;;  %v1823_v22 = vsub.f32 2.0, %v1822_v62  ;;  %v2228_v62 = vadd.f32 0.8164966, %v4126_v59  ;;  %3014 = vrcp.f32 %v2252_v39  ;;  %v3011_v41 = vpop.eup %3010 }
  0x81   : >> { %1022 = vmatprep.mubr.f32.mxu0 %v5607_v46  ;;  %1183 = vmatprep.mubr.f32.mxu1 %v5607_v46  ;;  %v1804_v44 = vmul.f32 %v3003_v60, %v1803_v34  ;;  %v2215_v60 = vadd.f32 1.0, %v4128_v20  ;;  %v2249_v34 = vsub.f32 1.0, %v2247_v38  ;;  %3016 = vrcp.f32 %v2253_v56  ;;  %v3013_v42 = vpop.eup %3012 }
  0x82   : >> { %5610 = vst [vmem:[#allocation44_spill] sm:$0xff] %v4100_v54  ;;  %v1824_v58 = vmul.f32 %v3005_v49, %v1823_v22  ;;  %v2229_v22 = vadd.f32 0.8164966, %v4128_v20 }
  0x83   : >> { %v1805_v21 = vmul.f32 %v1804_v44, %v1799_v55  ;;  %v2220_v55 = vmul.f32 %v3007_v48, %v2214_v43  ;;  %v2221_v38 = vmul.f32 %v3009_v52, %v2215_v60  ;;  %v2234_v44 = vmul.f32 %v3011_v41, %v2228_v62 }
  0x84   : >> { %2910 = vmatmul.mubr.msk.f32.vlgmr.msra.gmra.mxu0 %vm562_vm1, %v5583_v0  ;;  %2928 = vmatmul.mubr.msk.f32.vlgmr.msra.gmra.mxu1 %vm562_vm1, %v5583_v0  ;;  %v1825_v49 = vmul.f32 %v1824_v58, %v1819_v37  ;;  %v2235_v39 = vmul.f32 %v3013_v42, %v2229_v22 }
  0x85   : >> { %1028 = vmatprep.mubr.f32.mxu0 %v5607_v46  ;;  %1189 = vmatprep.mubr.f32.mxu1 %v5607_v46  ;;  %3018 = vlog2.f32 %v1805_v21 }
  0x86   : >> { %3020 = vrcp.f32 %v2248_v50 }
  0x87   : >> { %3022 = vrcp.f32 %v2249_v34 }
  0x88   : >> { %2911 = vmatmul.mubr.msk.f32.gmra.mxu0 %vm562_vm1, %v5582_v1  ;;  %2929 = vmatmul.mubr.msk.f32.gmra.mxu1 %vm562_vm1, %v5582_v1  ;;  %3024 = vlog2.f32 %v1825_v49 }
  0x89   : >> { %1034 = vmatprep.mubr.f32.mxu0 %v5607_v46  ;;  %1195 = vmatprep.mubr.f32.mxu1 %v5607_v46  ;;  %3026 = vlog2.f32 %v2220_v55 }
  0x8a   : >> { %3028 = vlog2.f32 %v2221_v38 }
  0x8b   : >> { %3030 = vlog2.f32 %v2234_v44 }
  0x8c   : >> { %2912 = vmatmul.mubr.msk.f32.gmra.mxu0 %vm562_vm1, %v5581_v2  ;;  %2930 = vmatmul.mubr.msk.f32.gmra.mxu1 %vm562_vm1, %v5581_v2  ;;  %3032 = vlog2.f32 %v2235_v39 }
  0x8d   : >> { %1040 = vmatprep.mubr.f32.mxu0 %v5607_v46  ;;  %1201 = vmatprep.mubr.f32.mxu1 %v5607_v46  ;;  %v3015_v37 = vpop.eup %3014 }
  0x8e   : >> { %v3017_v58 = vpop.eup %3016  ;;  %v2256_v43 = vmul.f32 2.0, %v3015_v37 }
  0x8f   : >> { %v2257_v60 = vmul.f32 2.0, %v3017_v58 }
  0x90   : >> { %2913 = vmatmul.mubr.msk.f32.gmra.mxu0 %vm562_vm1, %v5580_v3  ;;  %2931 = vmatmul.mubr.msk.f32.gmra.mxu1 %vm562_vm1, %v5580_v3 }
  0x91   : >> { %1046 = vmatprep.mubr.f32.mxu0 %v5607_v46  ;;  %1207 = vmatprep.mubr.f32.mxu1 %v5607_v46 }
  0x92   : >> { %v3019_v56 = vpop.eup %3018 }
  0x93   : >> { %v3021_v21 = vpop.eup %3020  ;;  %v1807_v42 = vmul.f32 0.6931472, %v3019_v56 }
  0x94   : >> { %2914 = vmatmul.mubr.msk.f32.gmra.mxu0 %vm562_vm1, %v5579_v4  ;;  %2932 = vmatmul.mubr.msk.f32.gmra.mxu1 %vm562_vm1, %v5579_v4  ;;  %v3023_v48 = vpop.eup %3022  ;;  %v2258_v34 = vadd.f32 %v3021_v21, %v2256_v43 }
  0x95   : >> { %1052 = vmatprep.mubr.f32.mxu0 %v5607_v46  ;;  %1213 = vmatprep.mubr.f32.mxu1 %v5607_v46  ;;  %v3025_v50 = vpop.eup %3024  ;;  %v2259_v49 = vadd.f32 %v3023_v48, %v2257_v60  ;;  %v1808_v58 = vmul.f32 0.5, %v1807_v42 }
  0x96   : >> { %v3027_v52 = vpop.eup %3026  ;;  %v1827_v55 = vmul.f32 0.6931472, %v3025_v50  ;;  %3034 = vrcp.f32 %v2258_v34 }
  0x97   : >> { %v3029_v62 = vpop.eup %3028  ;;  %v2223_v38 = vmul.f32 0.6931472, %v3027_v52  ;;  %3036 = vrcp.f32 %v2259_v49 }
  0x98   : >> { %2915 = vmatmul.mubr.msk.f32.gmra.mxu0 %vm562_vm1, %v5578_v5  ;;  %2933 = vmatmul.mubr.msk.f32.gmra.mxu1 %vm562_vm1, %v5578_v5  ;;  %v3031_v41 = vpop.eup %3030  ;;  %v2225_v39 = vmul.f32 0.6931472, %v3029_v62  ;;  %v1828_v21 = vmul.f32 1.2247449, %v1827_v55  ;;  %v4230_v62 = vsub.f32 %v4092_v53, %v4090_v57 }
  0x99   : >> { %1058 = vmatprep.mubr.f32.mxu0 %v5607_v46  ;;  %1219 = vmatprep.mubr.f32.mxu1 %v5607_v46  ;;  %v3033_v22 = vpop.eup %3032  ;;  %v2237_v44 = vmul.f32 0.6931472, %v3031_v41  ;;  %v2226_v56 = vmul.f32 0.5, %v2223_v38 }
  0x9a   : >> { %v2239_v37 = vmul.f32 0.6931472, %v3033_v22  ;;  %v2227_v48 = vmul.f32 0.5, %v2225_v39  ;;  %v4222_v50 = vadd.f32 %v1828_v21, %v1808_v58  ;;  %5612 = vst [vmem:[#allocation46_spill] sm:$0xff] %v4230_v62 }
  0x9b   : >> { %v2240_v43 = vmul.f32 1.2247449, %v2237_v44 }
  0x9c   : >> { %2916 = vmatmul.mubr.msk.f32.gmra.mxu0 %vm562_vm1, %v5577_v6  ;;  %2934 = vmatmul.mubr.msk.f32.gmra.mxu1 %vm562_vm1, %v5577_v6  ;;  %v2241_v60 = vmul.f32 1.2247449, %v2239_v37  ;;  %5611 = vst [vmem:[#allocation45_spill] sm:$0xff] %v4222_v50 }
  0x9d   : >> { %1064 = vmatprep.mubr.f32.mxu0 %v5607_v46  ;;  %1225 = vmatprep.mubr.f32.mxu1 %v5607_v46  ;;  %v2242_v52 = vadd.f32 %v2240_v43, %v2226_v56 }
  0x9e   : >> { %v2243_v34 = vadd.f32 %v2241_v60, %v2227_v48  ;;  %v4290_v5 = vpop.permute.xlu0 %559 }
  0x9f   : >> { %v2244_v41 = vsub.f32 %v2242_v52, %v4222_v50  ;;  %5622 = vst [vmem:[#allocation56_spill] sm:$0xff] %v4290_v5 }
  0xa0   : >> { %2917 = vmatmul.mubr.msk.f32.gmra.mxu0 %vm562_vm1, %v5576_v7  ;;  %2935 = vmatmul.mubr.msk.f32.gmra.mxu1 %vm562_vm1, %v5576_v7  ;;  %v2245_v22 = vsub.f32 %v2243_v34, %v4230_v62 }
  0xa1   : >> { %1070 = vmatprep.mubr.f32.mxu0 %v5607_v46  ;;  %1231 = vmatprep.mubr.f32.mxu1 %v5607_v46 }
  0xa3   : >> { %v3035_v49 = vpop.eup %3034 }
  0xa4   : >> { %2918 = vmatmul.mubr.msk.f32.gmra.mxu0 %vm562_vm1, %v5575_v8  ;;  %2936 = vmatmul.mubr.msk.f32.gmra.mxu1 %vm562_vm1, %v5575_v8  ;;  %v3037_v42 = vpop.eup %3036  ;;  %v2262_v55 = vmul.f32 %v3035_v49, %v2244_v41 }
  0xa5   : >> { %1076 = vmatprep.mubr.f32.mxu0 %v5607_v46  ;;  %1237 = vmatprep.mubr.f32.mxu1 %v5607_v46  ;;  %v2263_v38 = vmul.f32 %v3037_v42, %v2245_v22 }
  0xa6   : >> { %v2264_v44 = vsub.f32 %v4126_v59, %v2262_v55 }
  0xa7   : >> { %v2265_v39 = vsub.f32 %v4128_v20, %v2263_v38 }
  0xa8   : >> { %2919 = vmatmul.mubr.msk.f32.gmra.mxu0 %vm562_vm1, %v5574_v9  ;;  %2937 = vmatmul.mubr.msk.f32.gmra.mxu1 %vm562_vm1, %v5574_v9  ;;  %v2266_v37 = vmax.f32 %v2264_v44, 1e-08 }
  0xa9   : >> { %1082 = vmatprep.mubr.f32.mxu0 %v5607_v46  ;;  %1243 = vmatprep.mubr.f32.mxu1 %v5607_v46  ;;  %v2267_v57 = vmax.f32 %v2265_v39, 1e-08 }
  0xaa   : >> { %v4238_v53 = vmin.f32 %v2266_v37, 0.8164958 }
  0xab   : >> { %v4240_v58 = vmin.f32 %v2267_v57, 0.8164958 }
  0xac   : >> { %2920 = vmatmul.mubr.msk.f32.gmra.mxu0 %vm562_vm1, %v5573_v10  ;;  %2938 = vmatmul.mubr.msk.f32.gmra.mxu1 %vm562_vm1, %v5573_v10  ;;  %v2272_v21 = vsub.f32 1.0, %v4238_v53  ;;  %v2286_v43 = vsub.f32 0.8164966, %v4238_v53  ;;  %v2302_v59 = vmul.f32 %v4238_v53, %v4238_v53  ;;  %v2270_v34 = vadd.f32 1.0, %v4238_v53 }
  0xad   : >> { %1088 = vmatprep.mubr.f32.mxu0 %v5607_v46  ;;  %1249 = vmatprep.mubr.f32.mxu1 %v5607_v46  ;;  %v2273_v56 = vsub.f32 1.0, %v4240_v58  ;;  %v2287_v48 = vsub.f32 0.8164966, %v4240_v58  ;;  %v2303_v20 = vmul.f32 %v4240_v58, %v4240_v58  ;;  %v2271_v49 = vadd.f32 1.0, %v4240_v58 }
  0xae   : >> { %3038 = vrcp.f32 %v2272_v21  ;;  %v2308_v60 = vsub.f32 0.6666667, %v2302_v59  ;;  %v2284_v42 = vadd.f32 0.8164966, %v4238_v53  ;;  %v2304_v55 = vsub.f32 1.0, %v2302_v59 }
  0xaf   : >> { %3040 = vrcp.f32 %v2273_v56  ;;  %v2309_v52 = vsub.f32 0.6666667, %v2303_v20  ;;  %v2285_v44 = vadd.f32 0.8164966, %v4240_v58  ;;  %v2305_v39 = vsub.f32 1.0, %v2303_v20 }
  0xb0   : >> { %2921 = vmatmul.mubr.msk.f32.gmra.mxu0 %vm562_vm1, %v5572_v11  ;;  %2939 = vmatmul.mubr.msk.f32.gmra.mxu1 %vm562_vm1, %v5572_v11  ;;  %3042 = vrcp.f32 %v2286_v43 }
  0xb1   : >> { %1094 = vmatprep.mubr.f32.mxu0 %v5607_v46  ;;  %1255 = vmatprep.mubr.f32.mxu1 %v5607_v46  ;;  %3044 = vrcp.f32 %v2287_v48 }
  0xb2   : >> { %3046 = vrcp.f32 %v2308_v60 }
  0xb3   : >> { %3048 = vrcp.f32 %v2309_v52 }
  0xb4   : >> { %2922 = vmatmul.mubr.msk.f32.gmra.mxu0 %vm562_vm1, %v5571_v12  ;;  %2940 = vmatmul.mubr.msk.f32.gmra.mxu1 %vm562_vm1, %v5571_v12  ;;  %3050 = vrcp.f32 %v2304_v55 }
  0xb5   : >> { %1100 = vmatprep.mubr.f32.mxu0 %v5607_v46  ;;  %1261 = vmatprep.mubr.f32.mxu1 %v5607_v46  ;;  %3052 = vrcp.f32 %v2305_v39 }
  0xb8   : >> { %2923 = vmatmul.mubr.msk.f32.gmra.mxu0 %vm562_vm1, %v5570_v13  ;;  %2941 = vmatmul.mubr.msk.f32.gmra.mxu1 %vm562_vm1, %v5570_v13 }
  0xb9   : >> { %1106 = vmatprep.mubr.f32.mxu0 %v5607_v46  ;;  %1267 = vmatprep.mubr.f32.mxu1 %v5607_v46 }
  0xbb   : >> { %v3039_v41 = vpop.eup %3038 }
  0xbc   : >> { %2924 = vmatmul.mubr.msk.f32.gmra.mxu0 %vm562_vm1, %v5569_v14  ;;  %2942 = vmatmul.mubr.msk.f32.gmra.mxu1 %vm562_vm1, %v5569_v14  ;;  %v3041_v22 = vpop.eup %3040  ;;  %v2276_v57 = vmul.f32 %v3039_v41, %v2270_v34 }
  0xbd   : >> { %1112 = vmatprep.mubr.f32.mxu0 %v5607_v46  ;;  %1273 = vmatprep.mubr.f32.mxu1 %v5607_v46  ;;  %v3043_v38 = vpop.eup %3042  ;;  %v2277_v21 = vmul.f32 %v3041_v22, %v2271_v49 }
  0xbe   : >> { %v3045_v37 = vpop.eup %3044  ;;  %v2290_v56 = vmul.f32 %v3043_v38, %v2284_v42  ;;  %3054 = vlog2.f32 %v2276_v57 }
  0xbf   : >> { %v2291_v43 = vmul.f32 %v3045_v37, %v2285_v44  ;;  %3056 = vlog2.f32 %v2277_v21  ;;  %v3047_v48 = vpop.eup %3046 }
  0xc0   : >> { %2925 = vmatmul.mubr.msk.f32.gmra.mxu0 %vm562_vm1, %v5568_v15  ;;  %2943 = vmatmul.mubr.msk.f32.gmra.mxu1 %vm562_vm1, %v5568_v15  ;;  %3058 = vlog2.f32 %v2290_v56  ;;  %v3049_v0 = vpop.eup %3048  ;;  %v2312_v59 = vmul.f32 2.0, %v3047_v48 }
  0xc1   : >> { %1477 = vmatprep.mubr.f32.mxu0 %v5607_v46  ;;  %1548 = vmatprep.mubr.f32.mxu1 %v5607_v46  ;;  %3060 = vlog2.f32 %v2291_v43  ;;  %v3051_v60 = vpop.eup %3050  ;;  %v2313_v1 = vmul.f32 2.0, %v3049_v0 }
  0xc2   : >> { %v3053_v2 = vpop.eup %3052  ;;  %v2314_v52 = vadd.f32 %v3051_v60, %v2312_v59 }
  0xc3   : >> { %v2315_v34 = vadd.f32 %v3053_v2, %v2313_v1 }
  0xc4   : >> { %3062 = vrcp.f32 %v2314_v52 }
  0xc5   : >> { %3064 = vrcp.f32 %v2315_v34 }
  0xcb   : >> { %v3055_v3 = vpop.eup %3054 }
  0xcc   : >> { %v3057_v20 = vpop.eup %3056  ;;  %v2279_v49 = vmul.f32 0.6931472, %v3055_v3 }
  0xcd   : >> { %v3059_v4 = vpop.eup %3058  ;;  %v2281_v42 = vmul.f32 0.6931472, %v3057_v20 }
  0xce   : >> { %v3061_v41 = vpop.eup %3060  ;;  %v2293_v22 = vmul.f32 0.6931472, %v3059_v4  ;;  %v2282_v39 = vmul.f32 0.5, %v2279_v49 }
  0xcf   : >> { %v2295_v55 = vmul.f32 0.6931472, %v3061_v41  ;;  %v2283_v21 = vmul.f32 0.5, %v2281_v42 }
  0xd0   : >> { %v2296_v37 = vmul.f32 1.2247449, %v2293_v22 }
  0xd1   : >> { %v2297_v56 = vmul.f32 1.2247449, %v2295_v55  ;;  %v3063_v41 = vpop.eup %3062 }
  0xd2   : >> { %v2298_v3 = vadd.f32 %v2296_v37, %v2282_v39  ;;  %v3065_v22 = vpop.eup %3064  ;;  %v4284_v39 = vpop.permute.xlu1 %549 }
  0xd3   : >> { %v2299_v48 = vadd.f32 %v2297_v56, %v2283_v21  ;;  %5620 = vst [vmem:[#allocation54_spill] sm:$0xff] %v4284_v39 }
  0xd4   : >> { %v2300_v20 = vsub.f32 %v2298_v3, %v4222_v50 }
  0xd5   : >> { %v2301_v49 = vsub.f32 %v2299_v48, %v4230_v62 }
  0xd6   : >> { %v2318_v37 = vmul.f32 %v3063_v41, %v2300_v20  ;;  %v4302_v20 = vpop.permute.xlu1 %544 }
  0xd7   : >> { %v2319_v3 = vmul.f32 %v3065_v22, %v2301_v49  ;;  %5625 = vst [vmem:[#allocation59_spill] sm:$0xff] %v4302_v20  ;;  %v4308_v49 = vpop.permute.xlu0 %554 }
  0xd8   : >> { %v2320_v48 = vsub.f32 %v4238_v53, %v2318_v37  ;;  %5627 = vst [vmem:[#allocation61_spill] sm:$0xff] %v4308_v49 }
  0xd9   : >> { %v2321_v10 = vsub.f32 %v4240_v58, %v2319_v3 }
  0xda   : >> { %v2322_v22 = vmax.f32 %v2320_v48, 1e-08  ;;  %v4318_v15 = vpop.permute.xlu1 %534 }
  0xdb   : >> { %v2323_v53 = vmax.f32 %v2321_v10, 1e-08  ;;  %5630 = vst [vmem:[#allocation64_spill] sm:$0xff] %v4318_v15  ;;  %v4328_v48 = vpop.permute.xlu0 %539 }
  0xdc   : >> { %v4320_v58 = vmin.f32 %v2322_v22, 0.8164958  ;;  %5634 = vst [vmem:[#allocation68_spill] sm:$0xff] %v4328_v48 }
  0xdd   : >> { %v4326_v17 = vmin.f32 %v2323_v53, 0.8164958 }
  0xde   : >> { %5631 = vst [vmem:[#allocation65_spill] sm:$0xff] %v4320_v58  ;;  %v2358_v18 = vmul.f32 %v4320_v58, %v4320_v58  ;;  %v2328_v22 = vsub.f32 1.0, %v4320_v58  ;;  %v4344_v26 = vpop.permute.xlu1 %524  ;;  %v2342_v33 = vsub.f32 0.8164966, %v4320_v58 }
  0xdf   : >> { %5633 = vst [vmem:[#allocation67_spill] sm:$0xff] %v4326_v17  ;;  %v2359_v23 = vmul.f32 %v4326_v17, %v4326_v17  ;;  %v2329_v53 = vsub.f32 1.0, %v4326_v17  ;;  %v4350_v31 = vpop.permute.xlu0 %529  ;;  %v2343_v51 = vsub.f32 0.8164966, %v4326_v17 }
  0xe0   : >> { %v2364_v27 = vsub.f32 0.6666667, %v2358_v18  ;;  %5638 = vst [vmem:[#allocation72_spill] sm:$0xff] %v4350_v31  ;;  %3066 = vrcp.f32 %v2328_v22  ;;  %v2360_v47 = vsub.f32 1.0, %v2358_v18 }
  0xe1   : >> { %v2365_v30 = vsub.f32 0.6666667, %v2359_v23  ;;  %3068 = vrcp.f32 %v2329_v53  ;;  %v2361_v35 = vsub.f32 1.0, %v2359_v23 }
  0xe2   : >> { %3070 = vrcp.f32 %v2364_v27  ;;  %v4362_v45 = vpop.permute.xlu1 %514 }
  0xe3   : >> { %3072 = vrcp.f32 %v2365_v30  ;;  %v4368_v46 = vpop.permute.xlu0 %519 }
  0xe4   : >> { %3074 = vrcp.f32 %v2342_v33 }
  0xe5   : >> { %3076 = vrcp.f32 %v2343_v51 }
  0xe6   : >> { %3078 = vrcp.f32 %v2360_v47  ;;  %v4378_v30 = vpop.permute.xlu1 %504 }
  0xe7   : >> { %3080 = vrcp.f32 %v2361_v35  ;;  %v2326_v35 = vadd.f32 1.0, %v4320_v58 }
 0x104   : >> { %v4254_v38 = vpop.f32.mrf.mxu0  ;;  %v4256_v44 = vpop.f32.mrf.mxu1 }
 0x105   : >> { %5613 = vst [vmem:[#allocation47_spill] sm:$0xff] %v4256_v44  ;;  %v4384_v44 = vpop.permute.xlu0 %509 }
 0x106   : >> { %v4258_v0 = vpop.f32.mrf.mxu0  ;;  %v4260_v57 = vpop.f32.mrf.mxu1 }
 0x107   : >> { %5614 = vst [vmem:[#allocation48_spill] sm:$0xff] %v4260_v57  ;;  %v3067_v57 = vpop.eup %3066 }
 0x108   : >> { %v4262_v1 = vpop.f32.mrf.mxu0  ;;  %v4264_v2 = vpop.f32.mrf.mxu1 }
 0x109   : >> { %5615 = vst [vmem:[#allocation49_spill] sm:$0xff] %v4264_v2  ;;  %v3069_v2 = vpop.eup %3068  ;;  %v4404_v50 = vpop.permute.xlu0 %499 }
 0x10a   : >> { %v4266_v4 = vpop.f32.mrf.mxu0  ;;  %v4268_v43 = vpop.f32.mrf.mxu1 }
 0x10b   : >> { %5616 = vst [vmem:[#allocation50_spill] sm:$0xff] %v4268_v43 }
 0x10c   : >> { %v4270_v59 = vpop.f32.mrf.mxu0  ;;  %v4272_v60 = vpop.f32.mrf.mxu1 }
 0x10d   : >> { %5617 = vst [vmem:[#allocation51_spill] sm:$0xff] %v4272_v60 }
 0x10e   : >> { %v4275_v52 = vpop.f32.mrf.mxu0  ;;  %v4277_v34 = vpop.f32.mrf.mxu1 }
 0x10f   : >> { %5618 = vst [vmem:[#allocation52_spill] sm:$0xff] %v4277_v34  ;;  %v3071_v34 = vpop.eup %3070 }
 0x110   : >> { %v4280_v42 = vpop.f32.mrf.mxu0  ;;  %v4282_v55 = vpop.f32.mrf.mxu1 }
 0x111   : >> { %5619 = vst [vmem:[#allocation53_spill] sm:$0xff] %v4282_v55  ;;  %v2327_v55 = vadd.f32 1.0, %v4326_v17 }
 0x112   : >> { %v4286_v21 = vpop.f32.mrf.mxu0  ;;  %v4288_v56 = vpop.f32.mrf.mxu1 }
 0x113   : >> { %5621 = vst [vmem:[#allocation55_spill] sm:$0xff] %v4288_v56  ;;  %v4396_v56 = vpop.permute.xlu1 %494 }
 0x114   : >> { %v4292_v6 = vpop.f32.mrf.mxu0  ;;  %v4294_v7 = vpop.f32.mrf.mxu1 }
 0x115   : >> { %5623 = vst [vmem:[#allocation57_spill] sm:$0xff] %v4294_v7  ;;  %v3073_v7 = vpop.eup %3072 }
 0x116   : >> { %v4297_v8 = vpop.f32.mrf.mxu0  ;;  %v4299_v9 = vpop.f32.mrf.mxu1 }
 0x117   : >> { %5624 = vst [vmem:[#allocation58_spill] sm:$0xff] %v4299_v9  ;;  %v2340_v9 = vadd.f32 0.8164966, %v4320_v58  ;;  %v3075_v62 = vpop.eup %3074 }
 0x118   : >> { %v4304_v41 = vpop.f32.mrf.mxu0  ;;  %v4306_v11 = vpop.f32.mrf.mxu1 }
 0x119   : >> { %5626 = vst [vmem:[#allocation60_spill] sm:$0xff] %v4306_v11 }
 0x11a   : >> { %v4310_v12 = vpop.f32.mrf.mxu0  ;;  %v4312_v13 = vpop.f32.mrf.mxu1 }
 0x11b   : >> { %5628 = vst [vmem:[#allocation62_spill] sm:$0xff] %v4312_v13 }
 0x11c   : >> { %v4314_v37 = vpop.f32.mrf.mxu0  ;;  %v4316_v14 = vpop.f32.mrf.mxu1 }
 0x11d   : >> { %5629 = vst [vmem:[#allocation63_spill] sm:$0xff] %v4316_v14  ;;  %v2341_v14 = vadd.f32 0.8164966, %v4326_v17  ;;  %v4414_v17 = vpop.permute.xlu1 %484 }
 0x11e   : >> { %v4322_v3 = vpop.f32.mrf.mxu0  ;;  %v4324_v16 = vpop.f32.mrf.mxu1 }
 0x11f   : >> { %5632 = vst [vmem:[#allocation66_spill] sm:$0xff] %v4324_v16  ;;  %v3077_v16 = vpop.eup %3076 }
 0x120   : >> { %v4332_v10 = vpop.f32.mrf.mxu0  ;;  %v4334_v19 = vpop.f32.mrf.mxu1 }
 0x121   : >> { %5635 = vst [vmem:[#allocation69_spill] sm:$0xff] %v4334_v19  ;;  %v2332_v19 = vmul.f32 %v3067_v57, %v2326_v35 }
 0x122   : >> { %v4339_v24 = vpop.f32.mrf.mxu0  ;;  %v4341_v25 = vpop.f32.mrf.mxu1 }
 0x123   : >> { %5636 = vst [vmem:[#allocation70_spill] sm:$0xff] %v4341_v25  ;;  %v2368_v25 = vmul.f32 2.0, %v3071_v34  ;;  %3082 = vlog2.f32 %v2332_v19 }
 0x124   : >> { %v4346_v28 = vpop.f32.mrf.mxu0  ;;  %v4348_v29 = vpop.f32.mrf.mxu1 }
 0x125   : >> { %5637 = vst [vmem:[#allocation71_spill] sm:$0xff] %v4348_v29 }
 0x126   : >> { %v4353_v36 = vpop.f32.mrf.mxu0  ;;  %v4355_v54 = vpop.f32.mrf.mxu1 }
 0x127   : >> { %5639 = vst [vmem:[#allocation73_spill] sm:$0xff] %v4355_v54 }
 0x128   : >> { %v4358_v63 = vpop.f32.mrf.mxu0  ;;  %v4360_v61 = vpop.f32.mrf.mxu1 }
 0x129   : >> { %5640 = vst [vmem:[#allocation74_spill] sm:$0xff] %v4360_v61  ;;  %v3079_v61 = vpop.eup %3078 }
 0x12a   : >> { %v4364_v22 = vpop.f32.mrf.mxu0  ;;  %v4366_v40 = vpop.f32.mrf.mxu1 }
 0x12b   : >> { %5641 = vst [vmem:[#allocation75_spill] sm:$0xff] %v4366_v40  ;;  %v2333_v40 = vmul.f32 %v3069_v2, %v2327_v55  ;;  %v3081_v58 = vpop.eup %3080 }
 0x12c   : >> { %v4370_v53 = vpop.f32.mrf.mxu0  ;;  %v4372_v18 = vpop.f32.mrf.mxu1 }
 0x12d   : >> { %5642 = vst [vmem:[#allocation76_spill] sm:$0xff] %v4372_v18  ;;  %v2369_v18 = vmul.f32 2.0, %v3073_v7  ;;  %3084 = vlog2.f32 %v2333_v40  ;;  %v703_v7 = vadd.f32 %v4254_v38, %v4414_v17  ;;  %v715_v40 = vadd.f32 %v4270_v59, %v4396_v56 }
 0x12e   : >> { %v4374_v27 = vpop.f32.mrf.mxu0  ;;  %v4376_v23 = vpop.f32.mrf.mxu1  ;;  %v727_v59 = vadd.f32 %v4292_v6, %v4378_v30 }
 0x12f   : >> { %5643 = vst [vmem:[#allocation77_spill] sm:$0xff] %v4376_v23  ;;  %v2346_v23 = vmul.f32 %v3075_v62, %v2340_v9  ;;  %v2371_v35 = vadd.f32 %v3081_v58, %v2369_v18 }
 0x130   : >> { %v4380_v33 = vpop.f32.mrf.mxu0  ;;  %v4382_v32 = vpop.f32.mrf.mxu1 }
 0x131   : >> { %5644 = vst [vmem:[#allocation78_spill] sm:$0xff] %v4382_v32  ;;  %3086 = vlog2.f32 %v2346_v23  ;;  %v4464_v18 = vpop.eup %3082 }
 0x132   : >> { %v4386_v51 = vpop.f32.mrf.mxu0  ;;  %v4388_v47 = vpop.f32.mrf.mxu1 }
 0x133   : >> { %5645 = vst [vmem:[#allocation79_spill] sm:$0xff] %v4388_v47 }
 0x134   : >> { %v4391_v43 = vpop.f32.mrf.mxu0  ;;  %v4393_v60 = vpop.f32.mrf.mxu1 }
 0x135   : >> { %5646 = vst [vmem:[#allocation80_spill] sm:$0xff] %v4393_v60  ;;  %v2347_v60 = vmul.f32 %v3077_v16, %v2341_v14  ;;  %v705_v14 = vadd.f32 %v4258_v0, %v4414_v17  ;;  %v721_v0 = vadd.f32 %v4280_v42, %v4404_v50  ;;  %v733_v42 = vadd.f32 %v4304_v41, %v4384_v44 }
 0x136   : >> { %v4399_v11 = vpop.f32.mrf.mxu0  ;;  %v4401_v13 = vpop.f32.mrf.mxu1  ;;  %v741_v41 = vadd.f32 %v4322_v3, %v4362_v45  ;;  %v751_v3 = vadd.f32 %v4346_v28, %v4344_v26  ;;  %v759_v28 = vadd.f32 %v4364_v22, %v4350_v31  ;;  %v769_v22 = vadd.f32 %v4380_v33, %v4328_v48 }
 0x137   : >> { %5647 = vst [vmem:[#allocation81_spill] sm:$0xff] %v4401_v13  ;;  %v2370_v13 = vadd.f32 %v3079_v61, %v2368_v25  ;;  %3088 = vlog2.f32 %v2347_v60  ;;  %v777_v33 = vadd.f32 %v4399_v11, %v4302_v20 }
 0x138   : >> { %v4406_v29 = vpop.f32.mrf.mxu0  ;;  %v4408_v54 = vpop.f32.mrf.mxu1 }
 0x139   : >> { %5648 = vst [vmem:[#allocation82_spill] sm:$0xff] %v4408_v54  ;;  %v4420_v54 = vpop.permute.xlu0 %489  ;;  %3090 = vrcp.f32 %v2370_v13  ;;  %v717_v13 = vadd.f32 %v4275_v52, %v4396_v56  ;;  %v729_v52 = vadd.f32 %v4297_v8, %v4378_v30 }
 0x13a   : >> { %v4410_v32 = vpop.f32.mrf.mxu0  ;;  %v4412_v47 = vpop.f32.mrf.mxu1  ;;  %v709_v16 = vadd.f32 %v4262_v1, %v4420_v54  ;;  %3092 = vrcp.f32 %v2371_v35  ;;  %v711_v61 = vadd.f32 %v4266_v4, %v4420_v54  ;;  %v723_v4 = vadd.f32 %v4286_v21, %v4404_v50 }
 0x13b   : >> { %3094 = vtanh.f32 %v703_v7  ;;  %v735_v21 = vadd.f32 %v4310_v12, %v4384_v44  ;;  %v4470_v6 = vpop.eup %3084  ;;  %v739_v35 = vadd.f32 %v4314_v37, %v4362_v45  ;;  %v745_v12 = vadd.f32 %v4332_v10, %v4368_v46 }
 0x13c   : >> { %v4416_v57 = vpop.f32.mrf.mxu0  ;;  %v4418_v34 = vpop.f32.mrf.mxu1  ;;  %3096 = vtanh.f32 %v705_v14  ;;  %v747_v37 = vadd.f32 %v4339_v24, %v4368_v46  ;;  %v753_v10 = vadd.f32 %v4353_v36, %v4344_v26  ;;  %v757_v24 = vadd.f32 %v4358_v63, %v4350_v31 }
 0x13d   : >> { %3098 = vtanh.f32 %v709_v16  ;;  %v763_v36 = vadd.f32 %v4370_v53, %v4318_v15  ;;  %v765_v63 = vadd.f32 %v4374_v27, %v4318_v15  ;;  %v771_v53 = vadd.f32 %v4386_v51, %v4328_v48 }
 0x13e   : >> { %v4424_v9 = vpop.f32.mrf.mxu0  ;;  %v4426_v62 = vpop.f32.mrf.mxu1  ;;  %3100 = vtanh.f32 %v711_v61  ;;  %v775_v27 = vadd.f32 %v4391_v43, %v4302_v20  ;;  %v781_v51 = vadd.f32 %v4406_v29, %v4284_v39  ;;  %v783_v43 = vadd.f32 %v4410_v32, %v4284_v39 }
 0x13f   : >> { %3102 = vtanh.f32 %v715_v40  ;;  %v4476_v8 = vpop.eup %3086  ;;  %v787_v11 = vadd.f32 %v4416_v57, %v4308_v49  ;;  %v789_v29 = vadd.f32 %v4424_v9, %v4308_v49 }
 0x140   : >> { %v4432_v19 = vpop.f32.mrf.mxu0  ;;  %v4434_v25 = vpop.f32.mrf.mxu1  ;;  %3104 = vtanh.f32 %v717_v13 }
 0x141   : >> { %3106 = vtanh.f32 %v721_v0  ;;  %v793_v32 = vadd.f32 %v4432_v19, %v4290_v5  ;;  %v954_v19 = vadd.f32 %v4434_v25, %v4290_v5 }
 0x142   : >> { %v4440_v38 = vpop.f32.mrf.mxu0  ;;  %v4442_v2 = vpop.f32.mrf.mxu1  ;;  %3108 = vtanh.f32 %v723_v4 }
 0x143   : >> { %3110 = vtanh.f32 %v727_v59  ;;  %v795_v57 = vadd.f32 %v4440_v38, %v4290_v5  ;;  %v956_v9 = vadd.f32 %v4442_v2, %v4290_v5  ;;  %v950_v38 = vadd.f32 %v4426_v62, %v4308_v49  ;;  %v5666_v62 = vld [vmem:[#allocation82_spill] sm:$0xff] }
 0x144   : >> { %v4448_v1 = vpop.f32.mrf.mxu0  ;;  %v4450_v60 = vpop.f32.mrf.mxu1  ;;  %3112 = vtanh.f32 %v729_v52 }
 0x145   : >> { %5649 = vst [vmem:[#allocation83_spill] sm:$0xff] %v4450_v60  ;;  %v4480_v14 = vpop.eup %3088  ;;  %3114 = vtanh.f32 %v733_v42 }
 0x146   : >> { %v4456_v55 = vpop.f32.mrf.mxu0  ;;  %v4458_v58 = vpop.f32.mrf.mxu1  ;;  %3116 = vtanh.f32 %v735_v21 }
 0x147   : >> { %5650 = vst [vmem:[#allocation84_spill] sm:$0xff] %v4456_v55  ;;  %5651 = vst [vmem:[#allocation85_spill] sm:$0xff] %v4458_v58  ;;  %v4484_v16 = vpop.eup %3090  ;;  %3118 = vtanh.f32 %v739_v35 }
 0x148   : >> { %v4468_v23 = vpop.f32.mrf.mxu0  ;;  %v4474_v7 = vpop.f32.mrf.mxu1  ;;  %3120 = vtanh.f32 %v741_v41 }
 0x149   : >> { %5652 = vst [vmem:[#allocation86_spill] sm:$0xff] %v4468_v23  ;;  %5653 = vst [vmem:[#allocation87_spill] sm:$0xff] %v4474_v7  ;;  %v4490_v40 = vpop.eup %3092  ;;  %3122 = vtanh.f32 %v745_v12  ;;  %v5681_v23 = vld [vmem:[#allocation70_spill] sm:$0xff] }
 0x14a   : >> { %v4488_v61 = vpop.f32.mrf.mxu0  ;;  %v4494_v13 = vpop.f32.mrf.mxu1  ;;  %3124 = vtanh.f32 %v747_v37  ;;  %v908_v55 = vadd.f32 %v5681_v23, %v4368_v46  ;;  %v5686_v23 = vld [vmem:[#allocation63_spill] sm:$0xff] }
 0x14b   : >> { %5654 = vst [vmem:[#allocation88_spill] sm:$0xff] %v4488_v61  ;;  %5655 = vst [vmem:[#allocation89_spill] sm:$0xff] %v4494_v13  ;;  %v4496_v0 = vpop.eup %3094  ;;  %3126 = vtanh.f32 %v751_v3 }
 0x14c   : >> { %v4500_v4 = vpop.eup %3096  ;;  %v4508_v52 = vpop.f32.mrf.mxu0  ;;  %3128 = vtanh.f32 %v753_v10 }
 0x14d   : >> { %v4504_v59 = vpop.eup %3098  ;;  %5656 = vst [vmem:[#allocation90_spill] sm:$0xff] %v4508_v52  ;;  %v4514_v21 = vpop.f32.mrf.mxu1  ;;  %3130 = vtanh.f32 %v757_v24 }
 0x14e   : >> { %v4510_v42 = vpop.eup %3100  ;;  %5657 = vst [vmem:[#allocation91_spill] sm:$0xff] %v4514_v21  ;;  %3132 = vtanh.f32 %v759_v28  ;;  %v4528_v37 = vpop.f32.mrf.mxu0 }
 0x14f   : >> { %v4516_v35 = vpop.eup %3102  ;;  %5658 = vst [vmem:[#allocation92_spill] sm:$0xff] %v4528_v37  ;;  %3134 = vtanh.f32 %v763_v36  ;;  %v4534_v10 = vpop.f32.mrf.mxu1 }
 0x150   : >> { %v4520_v41 = vpop.eup %3104  ;;  %5659 = vst [vmem:[#allocation93_spill] sm:$0xff] %v4534_v10  ;;  %3136 = vtanh.f32 %v765_v63  ;;  %v4548_v36 = vpop.f32.mrf.mxu0 }
 0x151   : >> { %v4524_v12 = vpop.eup %3106  ;;  %3138 = vtanh.f32 %v769_v22  ;;  %5660 = vst [vmem:[#allocation94_spill] sm:$0xff] %v4548_v36  ;;  %v4554_v63 = vpop.f32.mrf.mxu1 }
 0x152   : >> { %v4530_v3 = vpop.eup %3108  ;;  %3140 = vtanh.f32 %v771_v53  ;;  %5661 = vst [vmem:[#allocation95_spill] sm:$0xff] %v4554_v63 }
 0x153   : >> { %v4536_v24 = vpop.eup %3110  ;;  %3142 = vtanh.f32 %v775_v27  ;;  %v4568_v27 = vpop.f32.mrf.mxu0 }
 0x154   : >> { %v4540_v28 = vpop.eup %3112  ;;  %3144 = vtanh.f32 %v777_v33  ;;  %5662 = vst [vmem:[#allocation96_spill] sm:$0xff] %v4568_v27  ;;  %v4574_v33 = vpop.f32.mrf.mxu1 }
 0x155   : >> { %v4544_v60 = vpop.eup %3114  ;;  %3146 = vtanh.f32 %v781_v51  ;;  %5663 = vst [vmem:[#allocation97_spill] sm:$0xff] %v4574_v33  ;;  %v4588_v2 = vpop.f32.mrf.mxu0 }
 0x156   : >> { %v4550_v58 = vpop.eup %3116  ;;  %3148 = vtanh.f32 %v783_v43  ;;  %5664 = vst [vmem:[#allocation98_spill] sm:$0xff] %v4588_v2  ;;  %v4594_v25 = vpop.f32.mrf.mxu1 }
 0x157   : >> { %v4556_v22 = vpop.eup %3118  ;;  %3150 = vtanh.f32 %v787_v11  ;;  %v948_v11 = vadd.f32 %v4418_v34, %v4308_v49  ;;  %5665 = vst [vmem:[#allocation99_spill] sm:$0xff] %v4594_v25  ;;  %v5667_v34 = vld [vmem:[#allocation81_spill] sm:$0xff]  ;;  %v2335_v49 = vmul.f32 0.6931472, %v4464_v18  ;;  %v4610_v2 = vpop.f32.mrf.mxu0 }
 0x158   : >> { %v4560_v53 = vpop.eup %3120  ;;  %3152 = vtanh.f32 %v789_v29  ;;  %v944_v29 = vadd.f32 %v4412_v47, %v4284_v39  ;;  %v2349_v47 = vmul.f32 0.6931472, %v4476_v8  ;;  %5669 = vst [vmem:[#allocation82_spill] sm:$0xff] %v4610_v2  ;;  %v4618_v27 = vpop.f32.mrf.mxu1  ;;  %v5672_v8 = vld [vmem:[#allocation78_spill] sm:$0xff] }
 0x159   : >> { %v4564_v7 = vpop.eup %3122  ;;  %3154 = vtanh.f32 %v793_v32  ;;  %v942_v32 = vadd.f32 %v5666_v62, %v4284_v39  ;;  %v2351_v39 = vmul.f32 0.6931472, %v4480_v14  ;;  %5671 = vst [vmem:[#allocation81_spill] sm:$0xff] %v4618_v27  ;;  %v2338_v14 = vmul.f32 0.5, %v2335_v49  ;;  %v4630_v27 = vpop.f32.mrf.mxu0 }
 0x15a   : >> { %v4570_v13 = vpop.eup %3124  ;;  %3156 = vtanh.f32 %v795_v57  ;;  %v938_v57 = vadd.f32 %v5667_v34, %v4302_v20  ;;  %v2352_v36 = vmul.f32 1.2247449, %v2349_v47 }
 0x15b   : >> { %v4576_v51 = vpop.eup %3126  ;;  %3158 = vtanh.f32 %v956_v9  ;;  %v5668_v9 = vld [vmem:[#allocation80_spill] sm:$0xff]  ;;  %v2353_v61 = vmul.f32 1.2247449, %v2351_v39  ;;  %v5680_v39 = vld [vmem:[#allocation71_spill] sm:$0xff] }
 0x15c   : >> { %v4580_v43 = vpop.eup %3128  ;;  %3160 = vtanh.f32 %v954_v19  ;;  %v936_v25 = vadd.f32 %v5668_v9, %v4302_v20  ;;  %v2337_v19 = vmul.f32 0.6931472, %v4470_v6  ;;  %v930_v9 = vadd.f32 %v5672_v8, %v4328_v48  ;;  %v5673_v20 = vld [vmem:[#allocation77_spill] sm:$0xff]  ;;  %5675 = vst [vmem:[#allocation80_spill] sm:$0xff] %v4630_v27 }
 0x15d   : >> { %v4584_v21 = vpop.eup %3130  ;;  %3162 = vtanh.f32 %v950_v38  ;;  %v5670_v38 = vld [vmem:[#allocation79_spill] sm:$0xff]  ;;  %v926_v2 = vadd.f32 %v5673_v20, %v4318_v15  ;;  %v2354_v27 = vadd.f32 %v2352_v36, %v2338_v14  ;;  %v5684_v14 = vld [vmem:[#allocation66_spill] sm:$0xff] }
 0x15e   : >> { %v4590_v10 = vpop.eup %3132  ;;  %3164 = vtanh.f32 %v948_v11  ;;  %v932_v34 = vadd.f32 %v5670_v38, %v4328_v48  ;;  %v5674_v38 = vld [vmem:[#allocation76_spill] sm:$0xff]  ;;  %v2339_v52 = vmul.f32 0.5, %v2337_v19  ;;  %v4634_v48 = vpop.f32.mrf.mxu1  ;;  %v912_v19 = vadd.f32 %v5680_v39, %v4344_v26 }
 0x15f   : >> { %v4596_v63 = vpop.eup %3134  ;;  %3166 = vtanh.f32 %v944_v29  ;;  %v924_v29 = vadd.f32 %v5674_v38, %v4318_v15  ;;  %5677 = vst [vmem:[#allocation79_spill] sm:$0xff] %v4634_v48  ;;  %v5679_v38 = vld [vmem:[#allocation73_spill] sm:$0xff] }
 0x160   : >> { %v4600_v33 = vpop.eup %3136  ;;  %3168 = vtanh.f32 %v942_v32  ;;  %v5676_v32 = vld [vmem:[#allocation75_spill] sm:$0xff]  ;;  %v2355_v48 = vadd.f32 %v2353_v61, %v2339_v52  ;;  %v5685_v52 = vld [vmem:[#allocation45_spill] sm:$0xff] }
 0x161   : >> { %v4604_v5 = vpop.eup %3138  ;;  %3170 = vtanh.f32 %v938_v57  ;;  %v920_v8 = vadd.f32 %v5676_v32, %v4350_v31  ;;  %v5678_v57 = vld [vmem:[#allocation74_spill] sm:$0xff]  ;;  %v4642_v32 = vpop.f32.mrf.mxu0  ;;  %v2356_v39 = vsub.f32 %v2354_v27, %v5685_v52 }
 0x162   : >> { %v4612_v62 = vpop.eup %3140  ;;  %3172 = vtanh.f32 %v936_v25  ;;  %v918_v49 = vadd.f32 %v5678_v57, %v4350_v31  ;;  %v914_v25 = vadd.f32 %v5679_v38, %v4344_v26  ;;  %v5683_v38 = vld [vmem:[#allocation69_spill] sm:$0xff]  ;;  %v5688_v31 = vld [vmem:[#allocation62_spill] sm:$0xff] }
 0x163   : >> { %v4620_v18 = vpop.eup %3142  ;;  %3174 = vtanh.f32 %v932_v34 }
 0x164   : >> { %v4624_v11 = vpop.eup %3144  ;;  %3176 = vtanh.f32 %v930_v9  ;;  %v4646_v9 = vpop.f32.mrf.mxu1 }
 0x165   : >> { %v3147_v6 = vpop.eup %3146  ;;  %3178 = vtanh.f32 %v926_v2  ;;  %5682 = vst [vmem:[#allocation78_spill] sm:$0xff] %v4646_v9  ;;  %v906_v2 = vadd.f32 %v5683_v38, %v4368_v46  ;;  %v4655_v9 = vpop.f32.mrf.mxu0 }
 0x166   : >> { %v3149_v37 = vpop.eup %3148  ;;  %3180 = vtanh.f32 %v924_v29  ;;  %v902_v29 = vadd.f32 %v5684_v14, %v4362_v45  ;;  %v896_v14 = vadd.f32 %v5688_v31, %v4384_v44 }
 0x167   : >> { %v3151_v20 = vpop.eup %3150  ;;  %3182 = vtanh.f32 %v920_v8  ;;  %v900_v8 = vadd.f32 %v5686_v23, %v4362_v45  ;;  %v5692_v23 = vld [vmem:[#allocation55_spill] sm:$0xff] }
 0x168   : >> { %v3153_v47 = vpop.eup %3152  ;;  %3184 = vtanh.f32 %v918_v49 }
 0x169   : >> { %v3155_v15 = vpop.eup %3154  ;;  %3186 = vtanh.f32 %v914_v25  ;;  %v5689_v25 = vld [vmem:[#allocation60_spill] sm:$0xff] }
 0x16a   : >> { %v3157_v34 = vpop.eup %3156  ;;  %3188 = vtanh.f32 %v912_v19  ;;  %v5690_v19 = vld [vmem:[#allocation58_spill] sm:$0xff] }
 0x16b   : >> { %v3159_v57 = vpop.eup %3158  ;;  %1413 = vmatprep.subr.mxu0 %v3157_v34  ;;  %v5687_v34 = vld [vmem:[#allocation46_spill] sm:$0xff]  ;;  %3190 = vtanh.f32 %v908_v55  ;;  %v5691_v55 = vld [vmem:[#allocation57_spill] sm:$0xff] }
 0x16c   : >> { %v3161_v36 = vpop.eup %3160  ;;  %1484 = vmatprep.subr.mxu1 %v3159_v57  ;;  %1414 = vmatpush1.msra.mxu0 %v3155_v15  ;;  %v2357_v38 = vsub.f32 %v2355_v48, %v5687_v34  ;;  %v4660_v15 = vpop.f32.mrf.mxu1  ;;  %v894_v57 = vadd.f32 %v5689_v25, %v4384_v44  ;;  %3192 = vtanh.f32 %v906_v2  ;;  %v2374_v48 = vmul.f32 %v4484_v16, %v2356_v39  ;;  %v5693_v39 = vld [vmem:[#allocation53_spill] sm:$0xff] }
 0x16d   : >> { %v3163_v61 = vpop.eup %3162  ;;  %1485 = vmatpush1.msra.mxu1 %v3161_v36  ;;  %1415 = vmatprep.subr.mxu0 %v3153_v47  ;;  %v890_v36 = vadd.f32 %v5690_v19, %v4378_v30  ;;  %3194 = vtanh.f32 %v902_v29  ;;  %v4670_v2 = vpop.f32.mrf.mxu0  ;;  %v884_v29 = vadd.f32 %v5692_v23, %v4404_v50 }
 0x16e   : >> { %v3165_v49 = vpop.eup %3164  ;;  %1486 = vmatprep.subr.mxu1 %v3163_v61  ;;  %1416 = vmatpush1.msra.mxu0 %v3151_v20  ;;  %v888_v20 = vadd.f32 %v5691_v55, %v4378_v30  ;;  %3196 = vtanh.f32 %v900_v8  ;;  %v2375_v61 = vmul.f32 %v4490_v40, %v2357_v38  ;;  %v4676_v16 = vpop.f32.mrf.mxu1  ;;  %v882_v8 = vadd.f32 %v5693_v39, %v4404_v50  ;;  %v5694_v40 = vld [vmem:[#allocation52_spill] sm:$0xff]  ;;  %v5699_v55 = vld [vmem:[#allocation49_spill] sm:$0xff] }
 0x16f   : >> { %v3167_v27 = vpop.eup %3166  ;;  %1487 = vmatpush1.msra.mxu1 %v3165_v49  ;;  %1417 = vmatprep.subr.mxu0 %v3149_v37  ;;  %3198 = vtanh.f32 %v896_v14  ;;  %v878_v49 = vadd.f32 %v5694_v40, %v4396_v56 }
 0x170   : >> { %v3169_v47 = vpop.eup %3168  ;;  %1488 = vmatprep.subr.mxu1 %v3167_v27  ;;  %1418 = vmatpush1.msra.mxu0 %v3147_v6  ;;  %3200 = vtanh.f32 %v894_v57  ;;  %v5696_v27 = vld [vmem:[#allocation51_spill] sm:$0xff]  ;;  %v4688_v57 = vpop.f32.mrf.mxu0 }
 0x171   : >> { %v3171_v31 = vpop.eup %3170  ;;  %1489 = vmatpush1.msra.mxu1 %v3169_v47  ;;  %1419 = vmatprep.subr.mxu0 %v4624_v11  ;;  %3202 = vtanh.f32 %v890_v36  ;;  %v876_v25 = vadd.f32 %v5696_v27, %v4396_v56  ;;  %v5697_v47 = vld [vmem:[#allocation67_spill] sm:$0xff]  ;;  %v5698_v36 = vld [vmem:[#allocation50_spill] sm:$0xff] }
 0x172   : >> { %v3173_v37 = vpop.eup %3172  ;;  %1490 = vmatprep.subr.mxu1 %v3171_v31  ;;  %1420 = vmatpush1.msra.mxu0 %v4620_v18  ;;  %v5695_v18 = vld [vmem:[#allocation65_spill] sm:$0xff]  ;;  %3204 = vtanh.f32 %v888_v20  ;;  %v2377_v19 = vsub.f32 %v5697_v47, %v2375_v61  ;;  %v872_v31 = vadd.f32 %v5698_v36, %v4420_v54  ;;  %v870_v20 = vadd.f32 %v5699_v55, %v4420_v54  ;;  %v4705_v39 = vpop.f32.mrf.mxu0 }
 0x173   : >> { %v3175_v6 = vpop.eup %3174  ;;  %1491 = vmatpush1.msra.mxu1 %v3173_v37  ;;  %1421 = vmatprep.subr.mxu0 %v4612_v62  ;;  %v2376_v14 = vsub.f32 %v5695_v18, %v2374_v48  ;;  %3206 = vtanh.f32 %v884_v29  ;;  %v5700_v37 = vld [vmem:[#allocation48_spill] sm:$0xff]  ;;  %v5701_v29 = vld [vmem:[#allocation47_spill] sm:$0xff] }
 0x174   : >> { %v3177_v11 = vpop.eup %3176  ;;  %1492 = vmatprep.subr.mxu1 %v3175_v6  ;;  %1422 = vmatpush1.msra.mxu0 %v4604_v5  ;;  %v4694_v5 = vpop.f32.mrf.mxu1  ;;  %3208 = vtanh.f32 %v882_v8  ;;  %v866_v61 = vadd.f32 %v5700_v37, %v4414_v17  ;;  %v864_v6 = vadd.f32 %v5701_v29, %v4414_v17  ;;  %v2379_v8 = vmax.f32 %v2377_v19, 1e-08 }
 0x175   : >> { %v3179_v38 = vpop.eup %3178  ;;  %1493 = vmatpush1.msra.mxu1 %v3177_v11  ;;  %1423 = vmatprep.subr.mxu0 %v4600_v33  ;;  %3210 = vtanh.f32 %v878_v49 }
 0x176   : >> { %v3181_v62 = vpop.eup %3180  ;;  %1494 = vmatprep.subr.mxu1 %v3179_v38  ;;  %1424 = vmatpush1.msra.mxu0 %v4596_v63  ;;  %v2378_v63 = vmax.f32 %v2376_v14, 1e-08  ;;  %3212 = vtanh.f32 %v876_v25  ;;  %v4707_v11 = vpop.f32.mrf.mxu1  ;;  %v4717_v18 = vmin.f32 %v2379_v8, 0.8164958 }
 0x177   : >> { %v3183_v48 = vpop.eup %3182  ;;  %1495 = vmatpush1.msra.mxu1 %v3181_v62  ;;  %1425 = vmatprep.subr.mxu0 %v4590_v10  ;;  %3214 = vtanh.f32 %v872_v31  ;;  %v4714_v38 = vpop.f32.mrf.mxu0 }
 0x178   : >> { %v3185_v33 = vpop.eup %3184  ;;  %1496 = vmatprep.subr.mxu1 %v3183_v48  ;;  %1426 = vmatpush1.msra.mxu0 %v4584_v21  ;;  %3216 = vtanh.f32 %v870_v20  ;;  %v4712_v49 = vmin.f32 %v2378_v63, 0.8164958  ;;  %5703 = vst [vmem:[#allocation76_spill] sm:$0xff] %v4717_v18  ;;  %v4719_v14 = vpop.f32.mrf.mxu1  ;;  %v2415_v25 = vmul.f32 %v4717_v18, %v4717_v18  ;;  %v2385_v19 = vsub.f32 1.0, %v4717_v18 }
 0x179   : >> { %v3187_v23 = vpop.eup %3186  ;;  %1497 = vmatpush1.msra.mxu1 %v3185_v33  ;;  %1427 = vmatprep.subr.mxu0 %v4580_v43  ;;  %3218 = vtanh.f32 %v866_v61  ;;  %v4729_v47 = vpop.f32.mrf.mxu0  ;;  %v2399_v33 = vsub.f32 0.8164966, %v4717_v18 }
 0x17a   : >> { %v3189_v10 = vpop.eup %3188  ;;  %1498 = vmatprep.subr.mxu1 %v3187_v23  ;;  %1428 = vmatpush1.msra.mxu0 %v4576_v51  ;;  %5702 = vst [vmem:[#allocation77_spill] sm:$0xff] %v4712_v49  ;;  %3220 = vtanh.f32 %v864_v6  ;;  %v2384_v62 = vsub.f32 1.0, %v4712_v49  ;;  %v4733_v36 = vpop.f32.mrf.mxu1  ;;  %v2421_v48 = vsub.f32 0.6666667, %v2415_v25  ;;  %v2417_v23 = vsub.f32 1.0, %v2415_v25 }
 0x17b   : >> { %v3191_v21 = vpop.eup %3190  ;;  %1499 = vmatpush1.msra.mxu1 %v3189_v10  ;;  %1429 = vmatprep.subr.mxu0 %v4570_v13  ;;  %v4739_v20 = vpop.f32.mrf.mxu0 }
 0x17c   : >> { %v3193_v40 = vpop.eup %3192  ;;  %1500 = vmatprep.subr.mxu1 %v3191_v21  ;;  %1430 = vmatpush1.msra.mxu0 %v4564_v7  ;;  %v2414_v7 = vmul.f32 %v4712_v49, %v4712_v49  ;;  %3222 = vrcp.f32 %v2384_v62  ;;  %v4743_v37 = vpop.f32.mrf.mxu1 }
 0x17d   : >> { %v3195_v43 = vpop.eup %3194  ;;  %1501 = vmatpush1.msra.mxu1 %v3193_v40  ;;  %1431 = vmatprep.subr.mxu0 %v4560_v53  ;;  %3224 = vrcp.f32 %v2385_v19  ;;  %v4748_v63 = vpop.f32.mrf.mxu0  ;;  %v2382_v40 = vadd.f32 1.0, %v4712_v49 }
 0x17e   : >> { %v3197_v51 = vpop.eup %3196  ;;  %1502 = vmatprep.subr.mxu1 %v3195_v43  ;;  %1432 = vmatpush1.msra.mxu0 %v4556_v22  ;;  %v2420_v31 = vsub.f32 0.6666667, %v2414_v7  ;;  %v4751_v29 = vpop.f32.mrf.mxu1 }
 0x17f   : >> { %v3199_v13 = vpop.eup %3198  ;;  %1503 = vmatpush1.msra.mxu1 %v3197_v51  ;;  %1433 = vmatprep.subr.mxu0 %v4550_v58  ;;  %v4757_v6 = vpop.f32.mrf.mxu0  ;;  %v2383_v51 = vadd.f32 1.0, %v4717_v18 }
 0x180   : >> { %v3201_v27 = vpop.eup %3200  ;;  %1504 = vmatprep.subr.mxu1 %v3199_v13  ;;  %1434 = vmatpush1.msra.mxu0 %v4544_v60  ;;  %3226 = vrcp.f32 %v2420_v31 }
 0x181   : >> { %v3203_v53 = vpop.eup %3202  ;;  %1505 = vmatpush1.msra.mxu1 %v3201_v27  ;;  %1435 = vmatprep.subr.mxu0 %v4540_v28  ;;  %v2398_v28 = vsub.f32 0.8164966, %v4712_v49  ;;  %3228 = vrcp.f32 %v2421_v48  ;;  %v4762_v10 = vpop.f32.mrf.mxu0 }
 0x182   : >> { %v3205_v22 = vpop.eup %3204  ;;  %1506 = vmatprep.subr.mxu1 %v3203_v53  ;;  %1436 = vmatpush1.msra.mxu0 %v4536_v24  ;;  %v2397_v53 = vadd.f32 0.8164966, %v4717_v18 }
 0x183   : >> { %v3207_v58 = vpop.eup %3206  ;;  %1507 = vmatpush1.msra.mxu1 %v3205_v22  ;;  %1437 = vmatprep.subr.mxu0 %v4530_v3  ;;  %3230 = vrcp.f32 %v2398_v28  ;;  %v4769_v27 = vpop.f32.mrf.mxu0 }
 0x184   : >> { %v3209_v60 = vpop.eup %3208  ;;  %1508 = vmatprep.subr.mxu1 %v3207_v58  ;;  %1438 = vmatpush1.msra.mxu0 %v4524_v12  ;;  %v2416_v12 = vsub.f32 1.0, %v2414_v7  ;;  %3232 = vrcp.f32 %v2399_v33  ;;  %v2396_v7 = vadd.f32 0.8164966, %v4712_v49 }
 0x185   : >> { %v3211_v55 = vpop.eup %3210  ;;  %1509 = vmatpush1.msra.mxu1 %v3209_v60  ;;  %1439 = vmatprep.subr.mxu0 %v4520_v41 }
 0x186   : >> { %v3213_v24 = vpop.eup %3212  ;;  %1510 = vmatprep.subr.mxu1 %v3211_v55  ;;  %1440 = vmatpush1.msra.mxu0 %v4516_v35  ;;  %3234 = vrcp.f32 %v2416_v12  ;;  %v334_v12 = vld [vmem:[%s4777_s18] sm:$0xff] }
 0x187   : >> { %v3215_v3 = vpop.eup %3214  ;;  %1511 = vmatpush1.msra.mxu1 %v3213_v24  ;;  %1441 = vmatprep.subr.mxu0 %v4510_v42  ;;  %v5704_v42 = vld [vmem:[#allocation34_spill] sm:$0xff]  ;;  %3236 = vrcp.f32 %v2417_v23  ;;  %v4779_v24 = vpop.f32.mrf.mxu0 }
 0x188   : >> { %v3217_v61 = vpop.eup %3216  ;;  %1512 = vmatprep.subr.mxu1 %v3215_v3  ;;  %1442 = vmatpush1.msra.mxu0 %v4504_v59  ;;  %v5705_v59 = vmov 0.0  }
 0x189   : >> { %v3219_v41 = vpop.eup %3218  ;;  %1513 = vmatpush1.msra.mxu1 %v3217_v61  ;;  %1443 = vmatprep.subr.mxu0 %v4500_v4  ;;  %v4760_v4 = vpop.f32.mrf.mxu1  ;;  %v336_v61 = vld [vmem:[%s4777_s18 + $0x10] sm:$0xff] }
 0x18a   : >> { %v3221_v35 = vpop.eup %3220  ;;  %1514 = vmatprep.subr.mxu1 %v3219_v41  ;;  %1444 = vmatpush1.msra.mxu0 %v4496_v0  ;;  %v338_v41 = vld [vmem:[%s4777_s18 + $0x20] sm:$0xff] }
 0x18b   : >> { %1515 = vmatpush1.msra.mxu1 %v3221_v35  ;;  %1478 = vmatmul.mubr.f32.vlgmr.msra.gmra.mxu0 %v5704_v42  ;;  %v3223_v8 = vpop.eup %3222  ;;  %v4764_v0 = vpop.f32.mrf.mxu1 }
 0x18c   : >> { %1549 = vmatmul.mubr.f32.vlgmr.msra.gmra.mxu1 %v5704_v42  ;;  %1619 = vmatprep.mubr.f32.mxu0 %v5705_v59  ;;  %v3225_v21 = vpop.eup %3224  ;;  %v2388_v19 = vmul.f32 %v3223_v8, %v2382_v40  ;;  %v1025_v8 = vadd.f32 %v4448_v1, %v4414_v17  ;;  %v5712_v1 = vld [vmem:[#allocation88_spill] sm:$0xff] }
 0x18d   : >> { %1690 = vmatprep.mubr.f32.mxu1 %v5705_v59  ;;  %v3227_v43 = vpop.eup %3226  ;;  %v4772_v62 = vpop.f32.mrf.mxu1  ;;  %v2389_v60 = vmul.f32 %v3225_v21, %v2383_v51  ;;  %v5706_v59 = vld [vmem:[#allocation42_spill] sm:$0xff]  ;;  %v5709_v51 = vld [vmem:[#allocation84_spill] sm:$0xff] }
 0x18e   : >> { %v3229_v13 = vpop.eup %3228  ;;  %v2424_v58 = vmul.f32 2.0, %v3227_v43  ;;  %3238 = vlog2.f32 %v2388_v19  ;;  %vm2743_vm6 = vcmp.ge.f32.partialorder %v5706_v59, 0.0  ;;  %v4789_v21 = vpop.f32.mrf.mxu0  ;;  %v1033_v19 = vadd.f32 %v5712_v1, %v4420_v54 }
 0x18f   : >> { %v2425_v48 = vmul.f32 2.0, %v3229_v13  ;;  %v4781_v3 = vpop.f32.mrf.mxu1  ;;  %3240 = vlog2.f32 %v2389_v60  ;;  %v4791_v40 = vsel %vm2743_vm6, %v334_v12, 0.0  ;;  %v4793_v43 = vsel %vm2743_vm6, %v336_v61, 0.0  ;;  %v5716_v61 = vld [vmem:[#allocation96_spill] sm:$0xff] }
 0x190   : >> { %v3231_v25 = vpop.eup %3230  ;;  %5707 = vst [vmem:[#allocation75_spill] sm:$0xff] %v4791_v40  ;;  %5708 = vst [vmem:[#allocation74_spill] sm:$0xff] %v4793_v43  ;;  %v1027_v13 = vadd.f32 %v5709_v51, %v4414_v17  ;;  %v4807_v60 = vpop.f32.mrf.mxu0  ;;  %v5718_v51 = vld [vmem:[#allocation82_spill] sm:$0xff] }
 0x191   : >> { %v3233_v22 = vpop.eup %3232  ;;  %v2402_v28 = vmul.f32 %v3231_v25, %v2396_v7  ;;  %v4797_v7 = vpop.f32.mrf.mxu1  ;;  %v4799_v25 = vsel %vm2743_vm6, %v338_v41, 0.0  ;;  %v5717_v41 = vld [vmem:[#allocation98_spill] sm:$0xff] }
 0x192   : >> { %v2403_v33 = vmul.f32 %v3233_v22, %v2397_v53  ;;  %5710 = vst [vmem:[#allocation73_spill] sm:$0xff] %v4799_v25  ;;  %v5711_v53 = vld [vmem:[#allocation86_spill] sm:$0xff] }
 0x193   : >> { %v3235_v31 = vpop.eup %3234  ;;  %3242 = vlog2.f32 %v2402_v28  ;;  %v1031_v22 = vadd.f32 %v5711_v53, %v4420_v54  ;;  %v4811_v28 = vpop.f32.mrf.mxu1 }
 0x194   : >> { %v3237_v55 = vpop.eup %3236  ;;  %v2426_v23 = vadd.f32 %v3235_v31, %v2424_v58  ;;  %3244 = vlog2.f32 %v2403_v33  ;;  %v5713_v58 = vld [vmem:[#allocation90_spill] sm:$0xff] }
 0x195   : >> { %v2427_v35 = vadd.f32 %v3237_v55, %v2425_v48  ;;  %v1037_v31 = vadd.f32 %v5713_v58, %v4396_v56  ;;  %v5714_v48 = vld [vmem:[#allocation92_spill] sm:$0xff]  ;;  %v5715_v33 = vld [vmem:[#allocation94_spill] sm:$0xff]  ;;  %v4821_v53 = vpop.f32.mrf.mxu1 }
 0x196   : >> { %3246 = vrcp.f32 %v2426_v23  ;;  %v1039_v55 = vadd.f32 %v5714_v48, %v4396_v56  ;;  %v1043_v12 = vadd.f32 %v5715_v33, %v4404_v50  ;;  %v1045_v23 = vadd.f32 %v5716_v61, %v4404_v50 }
 0x197   : >> { %3248 = vrcp.f32 %v2427_v35  ;;  %v1049_v35 = vadd.f32 %v5717_v41, %v4378_v30  ;;  %v1061_v48 = vadd.f32 %v4655_v9, %v4362_v45  ;;  %v4837_v61 = vpop.f32.mrf.mxu1  ;;  %v1069_v9 = vadd.f32 %v4705_v39, %v4368_v46 }
 0x198   : >> { %3250 = vtanh.f32 %v1025_v8  ;;  %v1102_v8 = vpop.f32.mrf.mxu0 }
 0x199   : >> { %3252 = vtanh.f32 %v1027_v13  ;;  %v1051_v13 = vadd.f32 %v5718_v51, %v4378_v30 }
 0x19a   : >> { %3254 = vtanh.f32 %v1031_v22  ;;  %v5719_v22 = vld [vmem:[#allocation80_spill] sm:$0xff] }
 0x19b   : >> { %3256 = vtanh.f32 %v1033_v19  ;;  %v1055_v1 = vadd.f32 %v5719_v22, %v4384_v44  ;;  %v4825_v58 = vpop.eup %3238  ;;  %v1057_v19 = vadd.f32 %v4642_v32, %v4384_v44  ;;  %v1067_v32 = vadd.f32 %v4688_v57, %v4368_v46  ;;  %v1269_v57 = vpop.f32.mrf.mxu1 }
 0x19c   : >> { %3258 = vtanh.f32 %v1037_v31  ;;  %v4829_v31 = vpop.eup %3240  ;;  %v1075_v22 = vadd.f32 %v4729_v47, %v4344_v26 }
 0x19d   : >> { %3260 = vtanh.f32 %v1039_v55  ;;  %v1104_v55 = vpop.f32.mrf.mxu0 }
 0x19e   : >> { %3262 = vtanh.f32 %v1043_v12  ;;  %v1063_v12 = vadd.f32 %v4670_v2, %v4362_v45  ;;  %v1073_v2 = vadd.f32 %v4714_v38, %v4344_v26 }
 0x19f   : >> { %3264 = vtanh.f32 %v1045_v23  ;;  %v1108_v51 = vpop.f32.mrf.mxu0 }
 0x1a0   : >> { %3266 = vtanh.f32 %v1049_v35  ;;  %v4833_v33 = vpop.eup %3242 }
 0x1a1   : >> { %3268 = vtanh.f32 %v1051_v13  ;;  %v4839_v41 = vpop.eup %3244  ;;  %v1110_v47 = vpop.f32.mrf.mxu0 }
 0x1a2   : >> { %3270 = vtanh.f32 %v1055_v1 }
 0x1a3   : >> { %v4843_v23 = vpop.eup %3246  ;;  %3272 = vtanh.f32 %v1057_v19  ;;  %v5724_v19 = vld [vmem:[#allocation72_spill] sm:$0xff] }
 0x1a4   : >> { %5720 = vst [vmem:[#allocation71_spill] sm:$0xff] %v4843_v23  ;;  %v4847_v35 = vpop.eup %3248  ;;  %3274 = vtanh.f32 %v1061_v48  ;;  %v1079_v39 = vadd.f32 %v4739_v20, %v5724_v19  ;;  %v1081_v38 = vadd.f32 %v4748_v63, %v5724_v19  ;;  %v1271_v20 = vpop.f32.mrf.mxu1 }
 0x1a5   : >> { %5721 = vst [vmem:[#allocation70_spill] sm:$0xff] %v4847_v35  ;;  %v4851_v13 = vpop.eup %3250  ;;  %3276 = vtanh.f32 %v1063_v12  ;;  %v5727_v12 = vld [vmem:[#allocation64_spill] sm:$0xff] }
 0x1a6   : >> { %5722 = vst [vmem:[#allocation69_spill] sm:$0xff] %v4851_v13  ;;  %v4855_v1 = vpop.eup %3252  ;;  %3278 = vtanh.f32 %v1067_v32  ;;  %v1085_v43 = vadd.f32 %v4757_v6, %v5727_v12  ;;  %v1087_v32 = vadd.f32 %v4762_v10, %v5727_v12  ;;  %v1114_v10 = vpop.f32.mrf.mxu0 }
 0x1a7   : >> { %5723 = vst [vmem:[#allocation66_spill] sm:$0xff] %v4855_v1  ;;  %v4859_v25 = vpop.eup %3254  ;;  %3280 = vtanh.f32 %v1069_v9  ;;  %v5728_v9 = vld [vmem:[#allocation68_spill] sm:$0xff] }
 0x1a8   : >> { %5725 = vst [vmem:[#allocation63_spill] sm:$0xff] %v4859_v25  ;;  %v4863_v48 = vpop.eup %3256  ;;  %3282 = vtanh.f32 %v1073_v2  ;;  %v1091_v63 = vadd.f32 %v4769_v27, %v5728_v9  ;;  %v1093_v6 = vadd.f32 %v4779_v24, %v5728_v9  ;;  %v1275_v27 = vpop.f32.mrf.mxu1 }
 0x1a9   : >> { %5726 = vst [vmem:[#allocation62_spill] sm:$0xff] %v4863_v48  ;;  %v4867_v40 = vpop.eup %3258  ;;  %3284 = vtanh.f32 %v1075_v22  ;;  %v5729_v22 = vld [vmem:[#allocation59_spill] sm:$0xff] }
 0x1aa   : >> { %v4871_v59 = vpop.eup %3260  ;;  %3286 = vtanh.f32 %v1079_v39  ;;  %v1097_v49 = vadd.f32 %v4789_v21, %v5729_v22  ;;  %v1099_v39 = vadd.f32 %v4807_v60, %v5729_v22  ;;  %v5731_v21 = vld [vmem:[#allocation61_spill] sm:$0xff]  ;;  %v1277_v25 = vpop.f32.mrf.mxu1 }
 0x1ab   : >> { %v4875_v18 = vpop.eup %3262  ;;  %3288 = vtanh.f32 %v1081_v38  ;;  %v5730_v38 = vld [vmem:[#allocation54_spill] sm:$0xff]  ;;  %v1109_v1 = vadd.f32 %v1108_v51, %v5731_v21  ;;  %v1111_v60 = vadd.f32 %v1110_v47, %v5731_v21 }
 0x1ac   : >> { %v4879_v2 = vpop.eup %3264  ;;  %3290 = vtanh.f32 %v1085_v43  ;;  %v1103_v23 = vadd.f32 %v1102_v8, %v5730_v38  ;;  %v1105_v43 = vadd.f32 %v1104_v55, %v5730_v38  ;;  %v5732_v8 = vld [vmem:[#allocation56_spill] sm:$0xff] }
 0x1ad   : >> { %v4883_v35 = vpop.eup %3266  ;;  %3292 = vtanh.f32 %v1087_v32  ;;  %v1116_v32 = vpop.f32.mrf.mxu0  ;;  %v1115_v48 = vadd.f32 %v1114_v10, %v5732_v8  ;;  %v1278_v51 = vadd.f32 %v1277_v25, %v5732_v8  ;;  %v1276_v47 = vadd.f32 %v1275_v27, %v5732_v8 }
 0x1ae   : >> { %v4887_v42 = vpop.eup %3268  ;;  %3294 = vtanh.f32 %v1091_v63  ;;  %v1117_v55 = vadd.f32 %v1116_v32, %v5732_v8  ;;  %v1266_v25 = vadd.f32 %v4837_v61, %v5730_v38  ;;  %v1264_v27 = vadd.f32 %v4821_v53, %v5730_v38 }
 0x1af   : >> { %v4890_v24 = vpop.eup %3270  ;;  %3296 = vtanh.f32 %v1093_v6  ;;  %v1252_v38 = vadd.f32 %v4772_v62, %v5728_v9  ;;  %v1240_v62 = vadd.f32 %v4743_v37, %v5724_v19  ;;  %v1228_v37 = vadd.f32 %v4694_v5, %v4368_v46 }
 0x1b0   : >> { %v4893_v13 = vpop.eup %3272  ;;  %3298 = vtanh.f32 %v1097_v49 }
 0x1b1   : >> { %v4896_v34 = vpop.eup %3274  ;;  %3300 = vtanh.f32 %v1099_v39 }
 0x1b2   : >> { %v4899_v63 = vpop.eup %3276  ;;  %3302 = vtanh.f32 %v1103_v23  ;;  %v1272_v23 = vadd.f32 %v1271_v20, %v5731_v21  ;;  %v1258_v20 = vadd.f32 %v4797_v7, %v5729_v22  ;;  %v1246_v7 = vadd.f32 %v4760_v4, %v5727_v12 }
 0x1b3   : >> { %v4902_v6 = vpop.eup %3278  ;;  %3304 = vtanh.f32 %v1105_v43  ;;  %v1270_v43 = vadd.f32 %v1269_v57, %v5731_v21  ;;  %v1254_v21 = vadd.f32 %v4781_v3, %v5728_v9  ;;  %v1242_v3 = vadd.f32 %v4751_v29, %v5724_v19 }
 0x1b4   : >> { %v4905_v49 = vpop.eup %3280  ;;  %3306 = vtanh.f32 %v1109_v1  ;;  %v1234_v4 = vadd.f32 %v4719_v14, %v4344_v26  ;;  %v1230_v29 = vadd.f32 %v4707_v11, %v4368_v46  ;;  %v1222_v14 = vadd.f32 %v4660_v15, %v4362_v45 }
 0x1b5   : >> { %v4908_v52 = vpop.eup %3282  ;;  %3308 = vtanh.f32 %v1111_v60 }
 0x1b6   : >> { %v4911_v39 = vpop.eup %3284  ;;  %3310 = vtanh.f32 %v1115_v48  ;;  %v1260_v48 = vadd.f32 %v4811_v28, %v5729_v22  ;;  %v1248_v28 = vadd.f32 %v4764_v0, %v5727_v12  ;;  %v1236_v0 = vadd.f32 %v4733_v36, %v4344_v26 }
 0x1b7   : >> { %v4914_v10 = vpop.eup %3286  ;;  %3312 = vtanh.f32 %v1117_v55  ;;  %v1224_v36 = vadd.f32 %v4676_v16, %v4362_v45  ;;  %v5734_v16 = vld [vmem:[#allocation79_spill] sm:$0xff]  ;;  %v5735_v45 = vld [vmem:[#allocation81_spill] sm:$0xff] }
 0x1b8   : >> { %v4917_v32 = vpop.eup %3288  ;;  %3314 = vtanh.f32 %v1278_v51  ;;  %v1212_v15 = vadd.f32 %v5735_v45, %v4378_v30  ;;  %v5750_v45 = vld [vmem:[#allocation69_spill] sm:$0xff] }
 0x1b9   : >> { %v4921_v1 = vpop.eup %3290  ;;  %3316 = vtanh.f32 %v1276_v47 }
 0x1ba   : >> { %v4925_v60 = vpop.eup %3292  ;;  %3318 = vtanh.f32 %v1272_v23 }
 0x1bb   : >> { %v4929_v57 = vpop.eup %3294  ;;  %3320 = vtanh.f32 %v1270_v43  ;;  %v5733_v43 = vld [vmem:[#allocation78_spill] sm:$0xff] }
 0x1bc   : >> { %v4933_v61 = vpop.eup %3296  ;;  %3322 = vtanh.f32 %v1266_v25  ;;  %v1218_v46 = vadd.f32 %v5733_v43, %v4384_v44  ;;  %v1216_v25 = vadd.f32 %v5734_v16, %v4384_v44  ;;  %v5737_v44 = vld [vmem:[#allocation97_spill] sm:$0xff]  ;;  %v5748_v16 = vld [vmem:[#allocation46_spill] sm:$0xff] }
 0x1bd   : >> { %v3299_v53 = vpop.eup %3298  ;;  %3324 = vtanh.f32 %v1264_v27 }
 0x1be   : >> { %v3301_v8 = vpop.eup %3300  ;;  %3326 = vtanh.f32 %v1260_v48 }
 0x1bf   : >> { %v3303_v55 = vpop.eup %3302  ;;  %3328 = vtanh.f32 %v1258_v20  ;;  %v5736_v20 = vld [vmem:[#allocation99_spill] sm:$0xff] }
 0x1c0   : >> { %v3305_v22 = vpop.eup %3304  ;;  %3330 = vtanh.f32 %v1254_v21  ;;  %v1210_v21 = vadd.f32 %v5736_v20, %v4378_v30  ;;  %v5739_v30 = vld [vmem:[#allocation93_spill] sm:$0xff]  ;;  %v5753_v20 = vld [vmem:[#allocation70_spill] sm:$0xff] }
 0x1c1   : >> { %v3307_v51 = vpop.eup %3306  ;;  %3332 = vtanh.f32 %v1252_v38 }
 0x1c2   : >> { %v3309_v9 = vpop.eup %3308  ;;  %3334 = vtanh.f32 %v1248_v28  ;;  %v1206_v28 = vadd.f32 %v5737_v44, %v4404_v50 }
 0x1c3   : >> { %v3311_v47 = vpop.eup %3310  ;;  %3336 = vtanh.f32 %v1246_v7 }
 0x1c4   : >> { %v3313_v12 = vpop.eup %3312  ;;  %3338 = vtanh.f32 %v1242_v3 }
 0x1c5   : >> { %v3315_v23 = vpop.eup %3314  ;;  %3340 = vtanh.f32 %v1240_v62  ;;  %1555 = vmatprep.subr.mxu0 %v3313_v12  ;;  %v5740_v62 = vld [vmem:[#allocation91_spill] sm:$0xff] }
 0x1c6   : >> { %v3317_v19 = vpop.eup %3316  ;;  %3342 = vtanh.f32 %v1236_v0  ;;  %1626 = vmatprep.subr.mxu1 %v3315_v23  ;;  %1556 = vmatpush1.msra.mxu0 %v3311_v47  ;;  %v5742_v47 = vld [vmem:[#allocation87_spill] sm:$0xff]  ;;  %v2391_v23 = vmul.f32 0.6931472, %v4825_v58 }
 0x1c7   : >> { %v3319_v26 = vpop.eup %3318  ;;  %3344 = vtanh.f32 %v1234_v4  ;;  %1627 = vmatpush1.msra.mxu1 %v3317_v19  ;;  %1557 = vmatprep.subr.mxu0 %v3309_v9  ;;  %v5741_v9 = vld [vmem:[#allocation89_spill] sm:$0xff]  ;;  %v2407_v19 = vmul.f32 0.6931472, %v4839_v41 }
 0x1c8   : >> { %v3321_v11 = vpop.eup %3320  ;;  %3346 = vtanh.f32 %v1230_v29  ;;  %1628 = vmatprep.subr.mxu1 %v3319_v26  ;;  %1558 = vmatpush1.msra.mxu0 %v3307_v51  ;;  %v1200_v51 = vadd.f32 %v5739_v30, %v4396_v56  ;;  %v5743_v4 = vld [vmem:[#allocation85_spill] sm:$0xff]  ;;  %v5744_v29 = vld [vmem:[#allocation83_spill] sm:$0xff] }
 0x1c9   : >> { %v3323_v5 = vpop.eup %3322  ;;  %3348 = vtanh.f32 %v1228_v37  ;;  %1629 = vmatpush1.msra.mxu1 %v3321_v11  ;;  %1559 = vmatprep.subr.mxu0 %v3305_v22  ;;  %v5738_v22 = vld [vmem:[#allocation95_spill] sm:$0xff]  ;;  %v2405_v37 = vmul.f32 0.6931472, %v4833_v33  ;;  %v2394_v33 = vmul.f32 0.5, %v2391_v23 }
 0x1ca   : >> { %v3325_v27 = vpop.eup %3324  ;;  %3350 = vtanh.f32 %v1224_v36  ;;  %1630 = vmatprep.subr.mxu1 %v3323_v5  ;;  %1560 = vmatpush1.msra.mxu0 %v3303_v55  ;;  %v1204_v3 = vadd.f32 %v5738_v22, %v4404_v50  ;;  %v2409_v36 = vmul.f32 1.2247449, %v2407_v19  ;;  %v5747_v5 = vld [vmem:[#allocation63_spill] sm:$0xff] }
 0x1cb   : >> { %v3327_v48 = vpop.eup %3326  ;;  %3352 = vtanh.f32 %v1222_v14  ;;  %1631 = vmatpush1.msra.mxu1 %v3325_v27  ;;  %1561 = vmatprep.subr.mxu0 %v3301_v8  ;;  %v5749_v27 = vld [vmem:[#allocation66_spill] sm:$0xff] }
 0x1cc   : >> { %v3329_v38 = vpop.eup %3328  ;;  %3354 = vtanh.f32 %v1218_v46  ;;  %1632 = vmatprep.subr.mxu1 %v3327_v48  ;;  %1562 = vmatpush1.msra.mxu0 %v3299_v53  ;;  %v1198_v53 = vadd.f32 %v5740_v62, %v4396_v56  ;;  %v5746_v46 = vld [vmem:[#allocation62_spill] sm:$0xff] }
 0x1cd   : >> { %v3331_v7 = vpop.eup %3330  ;;  %3356 = vtanh.f32 %v1216_v25  ;;  %1633 = vmatpush1.msra.mxu1 %v3329_v38  ;;  %1563 = vmatprep.subr.mxu0 %v4933_v61  ;;  %v1194_v61 = vadd.f32 %v5741_v9, %v4420_v54  ;;  %v5752_v48 = vld [vmem:[#allocation34_spill] sm:$0xff]  ;;  %v5754_v38 = vld [vmem:[#allocation77_spill] sm:$0xff] }
 0x1ce   : >> { %v3333_v55 = vpop.eup %3332  ;;  %3358 = vtanh.f32 %v1212_v15  ;;  %1634 = vmatprep.subr.mxu1 %v3331_v7  ;;  %1564 = vmatpush1.msra.mxu0 %v4929_v57  ;;  %v1192_v57 = vadd.f32 %v5742_v47, %v4420_v54 }
 0x1cf   : >> { %v3335_v8 = vpop.eup %3334  ;;  %3360 = vtanh.f32 %v1210_v21  ;;  %1635 = vmatpush1.msra.mxu1 %v3333_v55  ;;  %1565 = vmatprep.subr.mxu0 %v4925_v60  ;;  %v1188_v60 = vadd.f32 %v5743_v4, %v4414_v17 }
 0x1d0   : >> { %v3337_v50 = vpop.eup %3336  ;;  %3362 = vtanh.f32 %v1206_v28  ;;  %1636 = vmatprep.subr.mxu1 %v3335_v8  ;;  %1566 = vmatpush1.msra.mxu0 %v4921_v1  ;;  %v1186_v1 = vadd.f32 %v5744_v29, %v4414_v17  ;;  %v5755_v28 = vld [vmem:[#allocation76_spill] sm:$0xff] }
 0x1d1   : >> { %v3339_v0 = vpop.eup %3338  ;;  %3364 = vtanh.f32 %v1204_v3  ;;  %1637 = vmatpush1.msra.mxu1 %v3337_v50  ;;  %1567 = vmatprep.subr.mxu0 %v4917_v32 }
 0x1d2   : >> { %v3341_v56 = vpop.eup %3340  ;;  %3366 = vtanh.f32 %v1200_v51  ;;  %1638 = vmatprep.subr.mxu1 %v3339_v0  ;;  %1568 = vmatpush1.msra.mxu0 %v4914_v10 }
 0x1d3   : >> { %v3343_v12 = vpop.eup %3342  ;;  %3368 = vtanh.f32 %v1198_v53  ;;  %1639 = vmatpush1.msra.mxu1 %v3341_v56  ;;  %1569 = vmatprep.subr.mxu0 %v4911_v39  ;;  %v2393_v39 = vmul.f32 0.6931472, %v4829_v31 }
 0x1d4   : >> { %v3345_v54 = vpop.eup %3344  ;;  %3370 = vtanh.f32 %v1194_v61  ;;  %1640 = vmatprep.subr.mxu1 %v3343_v12  ;;  %1570 = vmatpush1.msra.mxu0 %v4908_v52 }
 0x1d5   : >> { %v3347_v32 = vpop.eup %3346  ;;  %3372 = vtanh.f32 %v1192_v57  ;;  %1641 = vmatpush1.msra.mxu1 %v3345_v54  ;;  %1571 = vmatprep.subr.mxu0 %v4905_v49  ;;  %v2408_v49 = vmul.f32 1.2247449, %v2405_v37  ;;  %v2395_v41 = vmul.f32 0.5, %v2393_v39 }
 0x1d6   : >> { %v3349_v10 = vpop.eup %3348  ;;  %3374 = vtanh.f32 %v1188_v60  ;;  %1642 = vmatprep.subr.mxu1 %v3347_v32  ;;  %1572 = vmatpush1.msra.mxu0 %v4902_v6 }
 0x1d7   : >> { %v3351_v17 = vpop.eup %3350  ;;  %3376 = vtanh.f32 %v1186_v1  ;;  %1643 = vmatpush1.msra.mxu1 %v3349_v10  ;;  %1573 = vmatprep.subr.mxu0 %v4899_v63  ;;  %v2410_v26 = vadd.f32 %v2408_v49, %v2394_v33  ;;  %v2411_v14 = vadd.f32 %v2409_v36, %v2395_v41 }
 0x1d8   : >> { %v3353_v52 = vpop.eup %3352  ;;  %1644 = vmatprep.subr.mxu1 %v3351_v17  ;;  %1574 = vmatpush1.msra.mxu0 %v4896_v34 }
 0x1d9   : >> { %v3355_v58 = vpop.eup %3354  ;;  %1645 = vmatpush1.msra.mxu1 %v3353_v52  ;;  %1575 = vmatprep.subr.mxu0 %v4893_v13  ;;  %v2413_v25 = vsub.f32 %v2411_v14, %v5748_v16 }
 0x1da   : >> { %v3357_v6 = vpop.eup %3356  ;;  %1646 = vmatprep.subr.mxu1 %v3355_v58  ;;  %1576 = vmatpush1.msra.mxu0 %v4890_v24 }
 0x1db   : >> { %v3359_v31 = vpop.eup %3358  ;;  %1647 = vmatpush1.msra.mxu1 %v3357_v6  ;;  %1577 = vmatprep.subr.mxu0 %v4887_v42  ;;  %v2431_v21 = vmul.f32 %v5753_v20, %v2413_v25 }
 0x1dc   : >> { %v3361_v63 = vpop.eup %3360  ;;  %1648 = vmatprep.subr.mxu1 %v3359_v31  ;;  %1578 = vmatpush1.msra.mxu0 %v4883_v35  ;;  %v5745_v35 = vld [vmem:[#allocation45_spill] sm:$0xff] }
 0x1dd   : >> { %v3363_v34 = vpop.eup %3362  ;;  %1649 = vmatpush1.msra.mxu1 %v3361_v63  ;;  %1579 = vmatprep.subr.mxu0 %v4879_v2  ;;  %v2412_v43 = vsub.f32 %v2410_v26, %v5745_v35  ;;  %v2433_v7 = vsub.f32 %v5755_v28, %v2431_v21 }
 0x1de   : >> { %v3365_v13 = vpop.eup %3364  ;;  %1650 = vmatprep.subr.mxu1 %v3363_v34  ;;  %1580 = vmatpush1.msra.mxu0 %v4875_v18 }
 0x1df   : >> { %v3367_v24 = vpop.eup %3366  ;;  %1651 = vmatpush1.msra.mxu1 %v3365_v13  ;;  %1581 = vmatprep.subr.mxu0 %v4871_v59  ;;  %v2435_v3 = vmax.f32 %v2433_v7, 1e-08 }
 0x1e0   : >> { %v3369_v11 = vpop.eup %3368  ;;  %1652 = vmatprep.subr.mxu1 %v3367_v24  ;;  %1582 = vmatpush1.msra.mxu0 %v4867_v40  ;;  %v5751_v40 = vld [vmem:[#allocation71_spill] sm:$0xff] }
 0x1e1   : >> { %v3371_v42 = vpop.eup %3370  ;;  %1653 = vmatpush1.msra.mxu1 %v3369_v11  ;;  %1583 = vmatprep.subr.mxu0 %v5746_v46  ;;  %v2430_v15 = vmul.f32 %v5751_v40, %v2412_v43  ;;  %v5021_v30 = vmin.f32 %v2435_v3, 0.8164958 }
 0x1e2   : >> { %v3373_v2 = vpop.eup %3372  ;;  %1654 = vmatprep.subr.mxu1 %v3371_v42  ;;  %1584 = vmatpush1.msra.mxu0 %v5747_v5 }
 0x1e3   : >> { %v3375_v18 = vpop.eup %3374  ;;  %1655 = vmatpush1.msra.mxu1 %v3373_v2  ;;  %1585 = vmatprep.subr.mxu0 %v5749_v27  ;;  %v2432_v44 = vsub.f32 %v5754_v38, %v2430_v15  ;;  %v2441_v62 = vsub.f32 1.0, %v5021_v30  ;;  %v2455_v53 = vsub.f32 0.8164966, %v5021_v30  ;;  %v2471_v9 = vmul.f32 %v5021_v30, %v5021_v30 }
 0x1e4   : >> { %v3377_v59 = vpop.eup %3376  ;;  %1656 = vmatprep.subr.mxu1 %v3375_v18  ;;  %1586 = vmatpush1.msra.mxu0 %v5750_v45  ;;  %v2439_v12 = vadd.f32 1.0, %v5021_v30  ;;  %v2453_v1 = vadd.f32 0.8164966, %v5021_v30 }
 0x1e5   : >> { %1657 = vmatpush1.msra.mxu1 %v3377_v59  ;;  %1620 = vmatmul.mubr.f32.vlgmr.msra.gmra.mxu0 %v5752_v48  ;;  %v2434_v22 = vmax.f32 %v2432_v44, 1e-08  ;;  %v2477_v0 = vsub.f32 0.6666667, %v2471_v9  ;;  %v2473_v54 = vsub.f32 1.0, %v2471_v9 }
 0x1e6   : >> { %1691 = vmatmul.mubr.f32.vlgmr.msra.gmra.mxu1 %v5752_v48 }
 0x1e7   : >> { %v5019_v55 = vmin.f32 %v2434_v22, 0.8164958 }
 0x1e9   : >> { %v2440_v51 = vsub.f32 1.0, %v5019_v55  ;;  %v2454_v8 = vsub.f32 0.8164966, %v5019_v55  ;;  %v2470_v50 = vmul.f32 %v5019_v55, %v5019_v55  ;;  %v2438_v47 = vadd.f32 1.0, %v5019_v55 }
 0x1ea   : >> { %v2452_v56 = vadd.f32 0.8164966, %v5019_v55 }
 0x1eb   : >> { %3378 = vrcp.f32 %v2440_v51  ;;  %v2476_v61 = vsub.f32 0.6666667, %v2470_v50  ;;  %v2472_v4 = vsub.f32 1.0, %v2470_v50 }
 0x1ec   : >> { %3380 = vrcp.f32 %v2454_v8 }
 0x1ed   : >> { %3382 = vrcp.f32 %v2441_v62 }
 0x1ee   : >> { %3384 = vrcp.f32 %v2455_v53 }
 0x1ef   : >> { %3386 = vrcp.f32 %v2476_v61 }
 0x1f0   : >> { %3388 = vrcp.f32 %v2477_v0 }
 0x1f1   : >> { %3390 = vrcp.f32 %v2472_v4 }
 0x1f2   : >> { %3392 = vrcp.f32 %v2473_v54 }
 0x1f8   : >> { %v3379_v57 = vpop.eup %3378 }
 0x1f9   : >> { %v3381_v60 = vpop.eup %3380  ;;  %v2444_v23 = vmul.f32 %v3379_v57, %v2438_v47 }
 0x1fa   : >> { %v3383_v29 = vpop.eup %3382  ;;  %v2458_v37 = vmul.f32 %v3381_v60, %v2452_v56 }
 0x1fb   : >> { %v3385_v32 = vpop.eup %3384  ;;  %v2445_v10 = vmul.f32 %v3383_v29, %v2439_v12  ;;  %3394 = vlog2.f32 %v2444_v23 }
 0x1fc   : >> { %v2459_v17 = vmul.f32 %v3385_v32, %v2453_v1  ;;  %3396 = vlog2.f32 %v2458_v37  ;;  %v3387_v39 = vpop.eup %3386 }
 0x1fd   : >> { %3398 = vlog2.f32 %v2445_v10  ;;  %v3389_v19 = vpop.eup %3388  ;;  %v2480_v52 = vmul.f32 2.0, %v3387_v39 }
 0x1fe   : >> { %3400 = vlog2.f32 %v2459_v17  ;;  %v3391_v58 = vpop.eup %3390  ;;  %v2481_v33 = vmul.f32 2.0, %v3389_v19 }
 0x1ff   : >> { %v3393_v49 = vpop.eup %3392  ;;  %v2482_v31 = vadd.f32 %v3391_v58, %v2480_v52 }
 0x200   : >> { %v2483_v63 = vadd.f32 %v3393_v49, %v2481_v33 }
 0x201   : >> { %3402 = vrcp.f32 %v2482_v31 }
 0x202   : >> { %3404 = vrcp.f32 %v2483_v63 }
 0x208   : >> { %v3395_v6 = vpop.eup %3394 }
 0x209   : >> { %v3397_v41 = vpop.eup %3396  ;;  %v2447_v26 = vmul.f32 0.6931472, %v3395_v6 }
 0x20a   : >> { %v3399_v36 = vpop.eup %3398  ;;  %v2461_v13 = vmul.f32 0.6931472, %v3397_v41 }
 0x20b   : >> { %v3401_v34 = vpop.eup %3400  ;;  %v2449_v24 = vmul.f32 0.6931472, %v3399_v36  ;;  %v2450_v11 = vmul.f32 0.5, %v2447_v26 }
 0x20c   : >> { %v2463_v14 = vmul.f32 0.6931472, %v3401_v34  ;;  %v2464_v42 = vmul.f32 1.2247449, %v2461_v13 }
 0x20d   : >> { %v2451_v43 = vmul.f32 0.5, %v2449_v24 }
 0x20e   : >> { %v2465_v46 = vmul.f32 1.2247449, %v2463_v14  ;;  %v2466_v2 = vadd.f32 %v2464_v42, %v2450_v11  ;;  %v3403_v25 = vpop.eup %3402 }
 0x20f   : >> { %v3405_v59 = vpop.eup %3404 }
 0x210   : >> { %v2467_v5 = vadd.f32 %v2465_v46, %v2451_v43  ;;  %v2468_v18 = vsub.f32 %v2466_v2, %v5745_v35 }
 0x212   : >> { %v2469_v27 = vsub.f32 %v2467_v5, %v5748_v16  ;;  %v2486_v45 = vmul.f32 %v3403_v25, %v2468_v18 }
 0x214   : >> { %v2487_v40 = vmul.f32 %v3405_v59, %v2469_v27  ;;  %v2488_v15 = vsub.f32 %v5019_v55, %v2486_v45 }
 0x216   : >> { %v2489_v20 = vsub.f32 %v5021_v30, %v2487_v40  ;;  %v2490_v21 = vmax.f32 %v2488_v15, 1e-08 }
 0x218   : >> { %v2491_v38 = vmax.f32 %v2489_v20, 1e-08  ;;  %v5039_v44 = vmin.f32 %v2490_v21, 0.8164958 }
 0x21a   : >> { %v5041_v28 = vmin.f32 %v2491_v38, 0.8164958  ;;  %v2496_v7 = vsub.f32 1.0, %v5039_v44  ;;  %v2510_v22 = vsub.f32 0.8164966, %v5039_v44  ;;  %v2526_v55 = vmul.f32 %v5039_v44, %v5039_v44 }
 0x21b   : >> { %v2494_v53 = vadd.f32 1.0, %v5039_v44  ;;  %v2508_v9 = vadd.f32 0.8164966, %v5039_v44 }
 0x21c   : >> { %v2497_v3 = vsub.f32 1.0, %v5041_v28  ;;  %v2511_v51 = vsub.f32 0.8164966, %v5041_v28  ;;  %3406 = vrcp.f32 %v2496_v7  ;;  %v2527_v30 = vmul.f32 %v5041_v28, %v5041_v28 }
 0x21d   : >> { %3408 = vrcp.f32 %v2510_v22  ;;  %v2532_v8 = vsub.f32 0.6666667, %v2526_v55  ;;  %v2528_v61 = vsub.f32 1.0, %v2526_v55  ;;  %v2495_v47 = vadd.f32 1.0, %v5041_v28 }
 0x21e   : >> { %3410 = vrcp.f32 %v2497_v3  ;;  %v2533_v62 = vsub.f32 0.6666667, %v2527_v30  ;;  %v2509_v56 = vadd.f32 0.8164966, %v5041_v28  ;;  %v2529_v4 = vsub.f32 1.0, %v2527_v30 }
 0x21f   : >> { %3412 = vrcp.f32 %v2511_v51 }
 0x220   : >> { %3414 = vrcp.f32 %v2532_v8 }
 0x221   : >> { %3416 = vrcp.f32 %v2533_v62 }
 0x222   : >> { %3418 = vrcp.f32 %v2528_v61 }
 0x223   : >> { %3420 = vrcp.f32 %v2529_v4 }
 0x229   : >> { %v3407_v50 = vpop.eup %3406 }
 0x22a   : >> { %v3409_v0 = vpop.eup %3408  ;;  %v2500_v12 = vmul.f32 %v3407_v50, %v2494_v53 }
 0x22b   : >> { %v3411_v57 = vpop.eup %3410  ;;  %v2514_v29 = vmul.f32 %v3409_v0, %v2508_v9 }
 0x22c   : >> { %v3413_v60 = vpop.eup %3412  ;;  %v2501_v1 = vmul.f32 %v3411_v57, %v2495_v47  ;;  %3422 = vlog2.f32 %v2500_v12 }
 0x22d   : >> { %v2515_v54 = vmul.f32 %v3413_v60, %v2509_v56  ;;  %3424 = vlog2.f32 %v2514_v29  ;;  %v3415_v32 = vpop.eup %3414 }
 0x22e   : >> { %3426 = vlog2.f32 %v2501_v1  ;;  %v3417_v23 = vpop.eup %3416  ;;  %v2536_v37 = vmul.f32 2.0, %v3415_v32 }
 0x22f   : >> { %3428 = vlog2.f32 %v2515_v54  ;;  %v3419_v10 = vpop.eup %3418  ;;  %v2537_v17 = vmul.f32 2.0, %v3417_v23  ;;  %v1411_v54 = vpop.permute.xlu0 %1410 }
 0x230   : >> { %v3421_v39 = vpop.eup %3420  ;;  %v2538_v52 = vadd.f32 %v3419_v10, %v2536_v37 }
 0x231   : >> { %v2539_v49 = vadd.f32 %v3421_v39, %v2537_v17 }
 0x232   : >> { %3430 = vrcp.f32 %v2538_v52 }
 0x233   : >> { %3432 = vrcp.f32 %v2539_v49 }
 0x239   : >> { %v3423_v19 = vpop.eup %3422 }
 0x23a   : >> { %v3425_v58 = vpop.eup %3424  ;;  %v2503_v31 = vmul.f32 0.6931472, %v3423_v19 }
 0x23b   : >> { %v3427_v33 = vpop.eup %3426  ;;  %v2517_v41 = vmul.f32 0.6931472, %v3425_v58 }
 0x23c   : >> { %v3429_v6 = vpop.eup %3428  ;;  %v2505_v36 = vmul.f32 0.6931472, %v3427_v33  ;;  %v2506_v34 = vmul.f32 0.5, %v2503_v31 }
 0x23d   : >> { %v2519_v63 = vmul.f32 0.6931472, %v3429_v6  ;;  %v2520_v26 = vmul.f32 1.2247449, %v2517_v41 }
 0x23e   : >> { %v2507_v13 = vmul.f32 0.5, %v2505_v36 }
 0x23f   : >> { %v2521_v24 = vmul.f32 1.2247449, %v2519_v63  ;;  %v2522_v14 = vadd.f32 %v2520_v26, %v2506_v34  ;;  %v3431_v43 = vpop.eup %3430  ;;  %v5756_v26 = vld [vmem:[#allocation36_spill] sm:$0xff] }
 0x240   : >> { %v3433_v2 = vpop.eup %3432 }
 0x241   : >> { %v2523_v11 = vadd.f32 %v2521_v24, %v2507_v13  ;;  %v2524_v42 = vsub.f32 %v2522_v14, %v5745_v35 }
 0x243   : >> { %v2525_v46 = vsub.f32 %v2523_v11, %v5748_v16  ;;  %v2542_v5 = vmul.f32 %v3431_v43, %v2524_v42 }
 0x245   : >> { %v2543_v18 = vmul.f32 %v3433_v2, %v2525_v46  ;;  %v2544_v25 = vsub.f32 %v5039_v44, %v2542_v5 }
 0x247   : >> { %v2545_v27 = vsub.f32 %v5041_v28, %v2543_v18  ;;  %v2546_v59 = vmax.f32 %v2544_v25, 1e-08 }
 0x249   : >> { %v2547_v45 = vmax.f32 %v2545_v27, 1e-08  ;;  %v5059_v40 = vmin.f32 %v2546_v59, 0.8164958 }
 0x24b   : >> { %v5061_v15 = vmin.f32 %v2547_v45, 0.8164958  ;;  %v2552_v20 = vsub.f32 1.0, %v5059_v40  ;;  %v2566_v21 = vsub.f32 0.8164966, %v5059_v40  ;;  %v2582_v44 = vmul.f32 %v5059_v40, %v5059_v40  ;;  %v1479_v0 = vpop.f32.mrf.mxu0 }
 0x24c   : >> { %v2550_v51 = vadd.f32 1.0, %v5059_v40  ;;  %v2564_v30 = vadd.f32 0.8164966, %v5059_v40  ;;  %v1550_v47 = vpop.f32.mrf.mxu1  ;;  %v1480_v37 = vadd.f32 %v1479_v0, %v1411_v54 }
 0x24d   : >> { %v2553_v38 = vsub.f32 1.0, %v5061_v15  ;;  %v2567_v7 = vsub.f32 0.8164966, %v5061_v15  ;;  %3434 = vrcp.f32 %v2552_v20  ;;  %v2583_v28 = vmul.f32 %v5061_v15, %v5061_v15  ;;  %v1481_v29 = vpop.f32.mrf.mxu0 }
 0x24e   : >> { %3436 = vrcp.f32 %v2566_v21  ;;  %v2588_v22 = vsub.f32 0.6666667, %v2582_v44  ;;  %v2584_v8 = vsub.f32 1.0, %v2582_v44  ;;  %v2551_v53 = vadd.f32 1.0, %v5061_v15  ;;  %v1552_v1 = vpop.f32.mrf.mxu1 }
 0x24f   : >> { %3438 = vrcp.f32 %v2553_v38  ;;  %v2589_v3 = vsub.f32 0.6666667, %v2583_v28  ;;  %v2565_v9 = vadd.f32 0.8164966, %v5061_v15  ;;  %v2585_v61 = vsub.f32 1.0, %v2583_v28 }
 0x250   : >> { %3440 = vrcp.f32 %v2567_v7  ;;  %v1482_v32 = vadd.f32 %v1481_v29, %v1411_v54  ;;  %v1553_v23 = vadd.f32 %v1552_v1, %v1411_v54  ;;  %v1551_v10 = vadd.f32 %v1550_v47, %v1411_v54 }
 0x251   : >> { %3442 = vrcp.f32 %v2588_v22 }
 0x252   : >> { %3444 = vrcp.f32 %v2589_v3  ;;  %v1705_v39 = vcombine.low %v1482_v32, %v1553_v23  ;;  %v1697_v49 = vcombine.low %v1480_v37, %v1551_v10  ;;  %v5757_v3 = vld [vmem:[#allocation39_spill] sm:$0xff] }
 0x253   : >> { %3446 = vrcp.f32 %v2584_v8 }
 0x254   : >> { %3448 = vrcp.f32 %v2585_v61  ;;  %v1712_v13 = vrot.slane %v1705_v39, %v5756_v26  ;;  %v1704_v43 = vrot.slane %v1697_v49, %v5756_v26  ;;  %v3632_v49 = vld [vmem:[%s3895_s17 + $0x10] sm:$0xff] }
 0x256   : >> { %v1729_v25 = vcombine.low %v1704_v43, %v1712_v13  ;;  %v1730_v27 = vcombine.high %v1704_v43, %v1712_v13 }
 0x25a   : >> { %v3435_v55 = vpop.eup %3434 }
 0x25b   : >> { %v3437_v62 = vpop.eup %3436  ;;  %v2556_v56 = vmul.f32 %v3435_v55, %v2550_v51  ;;  %v1737_v51 = vrot.slane %v1729_v25, %v5757_v3  ;;  %v1744_v55 = vrot.slane %v1730_v27, %v5757_v3 }
 0x25c   : >> { %v3439_v50 = vpop.eup %3438  ;;  %v2570_v4 = vmul.f32 %v3437_v62, %v2564_v30 }
 0x25d   : >> { %v3441_v57 = vpop.eup %3440  ;;  %v2557_v60 = vmul.f32 %v3439_v50, %v2551_v53  ;;  %3450 = vlog2.f32 %v2556_v56 }
 0x25e   : >> { %v2571_v12 = vmul.f32 %v3441_v57, %v2565_v9  ;;  %3452 = vlog2.f32 %v2570_v4  ;;  %v3443_v17 = vpop.eup %3442 }
 0x25f   : >> { %3454 = vlog2.f32 %v2557_v60  ;;  %v3445_v33 = vpop.eup %3444  ;;  %v2592_v41 = vmul.f32 2.0, %v3443_v17 }
 0x260   : >> { %3456 = vlog2.f32 %v2571_v12  ;;  %v3447_v34 = vpop.eup %3446  ;;  %v2593_v11 = vmul.f32 2.0, %v3445_v33 }
 0x261   : >> { %v3449_v42 = vpop.eup %3448  ;;  %v2594_v5 = vadd.f32 %v3447_v34, %v2592_v41 }
 0x262   : >> { %v2595_v21 = vadd.f32 %v3449_v42, %v2593_v11 }
 0x263   : >> { %3458 = vrcp.f32 %v2594_v5 }
 0x264   : >> { %3460 = vrcp.f32 %v2595_v21 }
 0x26a   : >> { %v3451_v2 = vpop.eup %3450 }
 0x26b   : >> { %v3453_v18 = vpop.eup %3452  ;;  %v2559_v28 = vmul.f32 0.6931472, %v3451_v2 }
 0x26c   : >> { %v3455_v20 = vpop.eup %3454  ;;  %v2573_v22 = vmul.f32 0.6931472, %v3453_v18 }
 0x26d   : >> { %v3457_v38 = vpop.eup %3456  ;;  %v2561_v62 = vmul.f32 0.6931472, %v3455_v20  ;;  %v2562_v47 = vmul.f32 0.5, %v2559_v28 }
 0x26e   : >> { %v2575_v53 = vmul.f32 0.6931472, %v3457_v38  ;;  %v2576_v57 = vmul.f32 1.2247449, %v2573_v22 }
 0x26f   : >> { %v2563_v12 = vmul.f32 0.5, %v2561_v62 }
 0x270   : >> { %v2577_v29 = vmul.f32 1.2247449, %v2575_v53  ;;  %v3459_v37 = vpop.eup %3458  ;;  %v5758_v53 = vld [vmem:[#allocation37_spill] sm:$0xff] }
 0x271   : >> { %v3461_v17 = vpop.eup %3460 }
 0x272   : >> { %v2579_v32 = vadd.f32 %v2577_v29, %v2563_v12 }
 0x274   : >> { %v2581_v10 = vsub.f32 %v2579_v32, %v5748_v16 }
 0x2a5   : >> { %v1621_v19 = vpop.f32.mrf.mxu0 }
 0x2a6   : >> { %v1622_v52 = vadd.f32 %v1621_v19, %v1411_v54  ;;  %v1692_v58 = vpop.f32.mrf.mxu1  ;;  %v2599_v19 = vmul.f32 %v3461_v17, %v2581_v10 }
 0x2a7   : >> { %v1693_v6 = vadd.f32 %v1692_v58, %v1411_v54  ;;  %v1623_v31 = vpop.f32.mrf.mxu0 }
 0x2a8   : >> { %v1624_v36 = vadd.f32 %v1623_v31, %v1411_v54  ;;  %v1694_v63 = vpop.f32.mrf.mxu1 }
 0x2a9   : >> { %v1713_v24 = vcombine.low %v1622_v52, %v1693_v6  ;;  %v1695_v14 = vadd.f32 %v1694_v63, %v1411_v54  ;;  %v2578_v54 = vadd.f32 %v2576_v57, %v2562_v47  ;;  %v3633_v6 = vld [vmem:[%s3895_s17 + $0x18] sm:$0xff]  ;;  %v2601_v63 = vsub.f32 %v5061_v15, %v2599_v19 }
 0x2aa   : >> { %v1839_v31 = vmin.f32 %v3632_v49, %v3633_v6 }
 0x2ab   : >> { %v1721_v46 = vcombine.low %v1624_v36, %v1695_v14  ;;  %v1720_v59 = vrot.slane %v1713_v24, %v5756_v26  ;;  %v2580_v23 = vsub.f32 %v2578_v54, %v5745_v35  ;;  %v2603_v2 = vmax.f32 %v2601_v63, 1e-08 }
 0x2ad   : >> { %v1728_v45 = vrot.slane %v1721_v46, %v5756_v26  ;;  %v2598_v39 = vmul.f32 %v3459_v37, %v2580_v23  ;;  %v5102_v27 = vmin.f32 %v2603_v2, 0.8164958 }
 0x2af   : >> { %v1745_v7 = vcombine.low %v1720_v59, %v1728_v45  ;;  %v1746_v44 = vcombine.high %v1720_v59, %v1728_v45  ;;  %v2600_v58 = vsub.f32 %v5059_v40, %v2598_v39  ;;  %v2609_v45 = vsub.f32 1.0, %v5102_v27 }
 0x2b0   : >> { %v2623_v38 = vsub.f32 0.8164966, %v5102_v27  ;;  %v2607_v6 = vadd.f32 1.0, %v5102_v27 }
 0x2b1   : >> { %v1753_v30 = vrot.slane %v1745_v7, %v5757_v3  ;;  %v1760_v8 = vrot.slane %v1746_v44, %v5757_v3  ;;  %v2602_v14 = vmax.f32 %v2600_v58, 1e-08  ;;  %v2639_v7 = vmul.f32 %v5102_v27, %v5102_v27 }
 0x2b3   : >> { %v1761_v50 = vcombine.low %v1737_v51, %v1753_v30  ;;  %v1762_v9 = vcombine.high %v1737_v51, %v1753_v30  ;;  %v1763_v61 = vcombine.low %v1744_v55, %v1760_v8  ;;  %v1764_v0 = vcombine.high %v1744_v55, %v1760_v8 }
 0x2b4   : >> { %v5096_v25 = vmin.f32 %v2602_v14, 0.8164958  ;;  %v2645_v62 = vsub.f32 0.6666667, %v2639_v7  ;;  %v2641_v63 = vsub.f32 1.0, %v2639_v7 }
 0x2b5   : >> { %v1840_v56 = vmul.f32 0.5, %v1761_v50  ;;  %v1911_v4 = vmul.f32 0.5, %v1762_v9  ;;  %v1986_v60 = vmul.f32 0.5, %v1763_v61  ;;  %v2061_v1 = vmul.f32 0.5, %v1764_v0  ;;  %v5759_v9 = vld [vmem:[#allocation38_spill] sm:$0xff] }
 0x2b6   : >> { %v2608_v59 = vsub.f32 1.0, %v5096_v25  ;;  %v2622_v20 = vsub.f32 0.8164966, %v5096_v25  ;;  %v2638_v21 = vmul.f32 %v5096_v25, %v5096_v25 }
 0x2b7   : >> { %3462 = vtanh.f32 %v1840_v56 }
 0x2b8   : >> { %3464 = vtanh.f32 %v1911_v4  ;;  %v2644_v28 = vsub.f32 0.6666667, %v2638_v21  ;;  %v2640_v55 = vsub.f32 1.0, %v2638_v21 }
 0x2b9   : >> { %3466 = vtanh.f32 %v1986_v60 }
 0x2ba   : >> { %3468 = vtanh.f32 %v2061_v1  ;;  %v2606_v1 = vadd.f32 1.0, %v5096_v25 }
 0x2c4   : >> { %v3463_v52 = vpop.eup %3462 }
 0x2c5   : >> { %v3465_v33 = vpop.eup %3464  ;;  %v1842_v41 = vadd.f32 1.0, %v3463_v52 }
 0x2c6   : >> { %v3467_v36 = vpop.eup %3466  ;;  %v1913_v34 = vadd.f32 1.0, %v3465_v33 }
 0x2c7   : >> { %v3469_v26 = vpop.eup %3468  ;;  %v1843_v13 = vmul.f32 0.5, %v1842_v41  ;;  %v1988_v24 = vadd.f32 1.0, %v3467_v36  ;;  %v2620_v36 = vadd.f32 0.8164966, %v5096_v25 }
 0x2c8   : >> { %v1914_v11 = vmul.f32 0.5, %v1913_v34  ;;  %v2063_v42 = vadd.f32 1.0, %v3469_v26 }
 0x2c9   : >> { %v5089_v43 = vmul.f32 %v1843_v13, %v1839_v31  ;;  %v1989_v46 = vmul.f32 0.5, %v1988_v24 }
 0x2ca   : >> { %v5091_v40 = vmul.f32 %v1914_v11, %v1839_v31  ;;  %v2064_v5 = vmul.f32 0.5, %v2063_v42  ;;  %v2621_v11 = vadd.f32 0.8164966, %v5102_v27 }
 0x2cb   : >> { %3470 = vlog2.f32 %v5089_v43  ;;  %v5094_v18 = vmul.f32 %v1989_v46, %v1839_v31 }
 0x2cc   : >> { %3472 = vlog2.f32 %v5091_v40  ;;  %v5099_v15 = vmul.f32 %v2064_v5, %v1839_v31 }
 0x2cd   : >> { %3474 = vlog2.f32 %v5094_v18 }
 0x2ce   : >> { %3476 = vlog2.f32 %v5099_v15 }
 0x2cf   : >> { %3478 = vrcp.f32 %v2608_v59 }
 0x2d0   : >> { %3480 = vrcp.f32 %v2609_v45 }
 0x2d1   : >> { %3482 = vrcp.f32 %v2622_v20 }
 0x2d2   : >> { %3484 = vrcp.f32 %v2623_v38 }
 0x2d3   : >> { %3486 = vrcp.f32 %v2644_v28  ;;  %v5760_v28 = vld [vmem:[#allocation40_spill] sm:$0xff] }
 0x2d4   : >> { %3488 = vrcp.f32 %v2640_v55 }
 0x2d5   : >> { %3490 = vrcp.f32 %v2645_v62 }
 0x2d8   : >> { %v3471_v44 = vpop.eup %3470 }
 0x2d9   : >> { %v3473_v22 = vpop.eup %3472  ;;  %v5113_v3 = vmul.f32 0.6931472, %v3471_v44 }
 0x2da   : >> { %v3475_v51 = vpop.eup %3474  ;;  %v5115_v30 = vmul.f32 0.6931472, %v3473_v22 }
 0x2db   : >> { %v3477_v8 = vpop.eup %3476  ;;  %v1847_v50 = vsub.f32 %v5113_v3, %v5758_v53  ;;  %v1878_v61 = vsub.f32 %v5113_v3, %v5759_v9  ;;  %v5121_v0 = vmul.f32 0.6931472, %v3475_v51 }
 0x2dc   : >> { %v1918_v47 = vsub.f32 %v5115_v30, %v5758_v53  ;;  %v1948_v57 = vsub.f32 %v5115_v30, %v5759_v9  ;;  %v5127_v56 = vmul.f32 0.6931472, %v3477_v8  ;;  %v3479_v58 = vpop.eup %3478  ;;  %v5761_v8 = vld [vmem:[#allocation41_spill] sm:$0xff] }
 0x2dd   : >> { %v1848_v4 = vmul.f32 0.2, %v1847_v50  ;;  %v1879_v60 = vmul.f32 0.2, %v1878_v61  ;;  %v1993_v12 = vsub.f32 %v5121_v0, %v5758_v53  ;;  %v2023_v29 = vsub.f32 %v5121_v0, %v5759_v9  ;;  %v3481_v41 = vpop.eup %3480 }
 0x2de   : >> { %v1919_v54 = vmul.f32 0.2, %v1918_v47  ;;  %v1949_v32 = vmul.f32 0.2, %v1948_v57  ;;  %v2068_v23 = vsub.f32 %v5127_v56, %v5758_v53  ;;  %v3483_v34 = vpop.eup %3482  ;;  %v2612_v26 = vmul.f32 %v3479_v58, %v2606_v1 }
 0x2df   : >> { %v1849_v37 = vmul.f32 1.442695, %v1848_v4  ;;  %v1880_v10 = vmul.f32 1.442695, %v1879_v60  ;;  %v1994_v17 = vmul.f32 0.2, %v1993_v12  ;;  %v2098_v24 = vsub.f32 %v5127_v56, %v5759_v9  ;;  %v3485_v42 = vpop.eup %3484 }
 0x2e0   : >> { %v1920_v39 = vmul.f32 1.442695, %v1919_v54  ;;  %v1950_v19 = vmul.f32 1.442695, %v1949_v32  ;;  %v2024_v52 = vmul.f32 0.2, %v2023_v29  ;;  %v2613_v14 = vmul.f32 %v3481_v41, %v2607_v6  ;;  %v3487_v2 = vpop.eup %3486 }
 0x2e1   : >> { %3492 = vpow2.f32 %v1849_v37  ;;  %v1995_v33 = vmul.f32 1.442695, %v1994_v17  ;;  %v2069_v49 = vmul.f32 0.2, %v2068_v23  ;;  %v2626_v46 = vmul.f32 %v3483_v34, %v2620_v36  ;;  %v3489_v45 = vpop.eup %3488 }
 0x2e2   : >> { %3494 = vpow2.f32 %v1880_v10  ;;  %v2025_v31 = vmul.f32 1.442695, %v2024_v52  ;;  %v2099_v5 = vmul.f32 0.2, %v2098_v24  ;;  %v2627_v59 = vmul.f32 %v3485_v42, %v2621_v11  ;;  %v3491_v21 = vpop.eup %3490 }
 0x2e3   : >> { %3496 = vpow2.f32 %v1920_v39  ;;  %v2070_v13 = vmul.f32 1.442695, %v2069_v49  ;;  %v2648_v20 = vmul.f32 2.0, %v3487_v2  ;;  %v2649_v29 = vmul.f32 2.0, %v3491_v21 }
 0x2e4   : >> { %3498 = vpow2.f32 %v1950_v19  ;;  %v2100_v38 = vmul.f32 1.442695, %v2099_v5 }
 0x2e5   : >> { %3500 = vpow2.f32 %v1995_v33  ;;  %v2650_v55 = vadd.f32 %v3489_v45, %v2648_v20 }
 0x2e6   : >> { %3502 = vpow2.f32 %v2025_v31 }
 0x2e7   : >> { %3504 = vrcp.f32 %v2641_v63 }
 0x2e8   : >> { %3506 = vlog2.f32 %v2612_v26 }
 0x2e9   : >> { %3508 = vpow2.f32 %v2070_v13 }
 0x2ea   : >> { %3510 = vlog2.f32 %v2613_v14 }
 0x2eb   : >> { %3512 = vlog2.f32 %v2626_v46 }
 0x2ec   : >> { %3514 = vlog2.f32 %v2627_v59 }
 0x2ed   : >> { %3516 = vpow2.f32 %v2100_v38 }
 0x2ee   : >> { %v3493_v7 = vpop.eup %3492  ;;  %3518 = vrcp.f32 %v2650_v55 }
 0x2ef   : >> { %v3495_v44 = vpop.eup %3494  ;;  %v1851_v22 = vmul.f32 %v3493_v7, %v5760_v28 }
 0x2f0   : >> { %v3497_v51 = vpop.eup %3496  ;;  %v1882_v62 = vmul.f32 %v3495_v44, %v5761_v8 }
 0x2f1   : >> { %v3499_v50 = vpop.eup %3498  ;;  %v1852_v61 = vmul.f32 %v3493_v7, %v1851_v22  ;;  %v1922_v47 = vmul.f32 %v3497_v51, %v5760_v28 }
 0x2f2   : >> { %v3501_v57 = vpop.eup %3500  ;;  %v1883_v4 = vmul.f32 %v3495_v44, %v1882_v62  ;;  %v1952_v60 = vmul.f32 %v3499_v50, %v5761_v8 }
 0x2f3   : >> { %v3503_v12 = vpop.eup %3502  ;;  %v1853_v1 = vmul.f32 2.5, %v1852_v61  ;;  %v5145_v54 = vmul.f32 1.6666666, %v1852_v61  ;;  %v1923_v32 = vmul.f32 %v3497_v51, %v1922_v47  ;;  %v1997_v52 = vmul.f32 %v3501_v57, %v5760_v28 }
 0x2f4   : >> { %v3505_v23 = vpop.eup %3504  ;;  %v1884_v37 = vmul.f32 2.5, %v1883_v4  ;;  %v5147_v10 = vmul.f32 1.6666666, %v1883_v4  ;;  %v1953_v17 = vmul.f32 %v3499_v50, %v1952_v60  ;;  %v2027_v58 = vmul.f32 %v3503_v12, %v5761_v8 }
 0x2f5   : >> { %v3507_v39 = vpop.eup %3506  ;;  %v1854_v19 = vadd.f32 1.0, %v1853_v1  ;;  %3520 = vrsqrt.f32 %v5145_v54  ;;  %v2651_v31 = vadd.f32 %v3505_v23, %v2649_v29  ;;  %v1924_v41 = vmul.f32 2.5, %v1923_v32 }
 0x2f6   : >> { %v3509_v33 = vpop.eup %3508  ;;  %v1885_v49 = vadd.f32 1.0, %v1884_v37  ;;  %3522 = vrsqrt.f32 %v5147_v10  ;;  %v5153_v63 = vmul.f32 1.6666666, %v1923_v32  ;;  %v1954_v34 = vmul.f32 2.5, %v1953_v17 }
 0x2f7   : >> { %v3511_v6 = vpop.eup %3510  ;;  %3524 = vrsqrt.f32 %v1854_v19  ;;  %v5155_v26 = vmul.f32 1.6666666, %v1953_v17  ;;  %v1925_v13 = vadd.f32 1.0, %v1924_v41  ;;  %v1998_v24 = vmul.f32 %v3501_v57, %v1997_v52 }
 0x2f8   : >> { %v3513_v36 = vpop.eup %3512  ;;  %3526 = vrsqrt.f32 %v1885_v49  ;;  %v2028_v14 = vmul.f32 %v3503_v12, %v2027_v58  ;;  %v2072_v11 = vmul.f32 %v3509_v33, %v5760_v28  ;;  %v2615_v46 = vmul.f32 0.6931472, %v3507_v39 }
 0x2f9   : >> { %3528 = vrsqrt.f32 %v5153_v63  ;;  %v3515_v42 = vpop.eup %3514  ;;  %v2617_v2 = vmul.f32 0.6931472, %v3511_v6  ;;  %v2629_v5 = vmul.f32 0.6931472, %v3513_v36  ;;  %v1955_v59 = vadd.f32 1.0, %v1954_v34 }
 0x2fa   : >> { %3530 = vrcp.f32 %v2651_v31  ;;  %v1999_v45 = vmul.f32 2.5, %v1998_v24  ;;  %v5160_v20 = vmul.f32 1.6666666, %v1998_v24  ;;  %v2029_v21 = vmul.f32 2.5, %v2028_v14  ;;  %v3517_v44 = vpop.eup %3516 }
 0x2fb   : >> { %3532 = vrsqrt.f32 %v5155_v26  ;;  %v5162_v38 = vmul.f32 1.6666666, %v2028_v14  ;;  %v2073_v7 = vmul.f32 %v3509_v33, %v2072_v11  ;;  %v2631_v22 = vmul.f32 0.6931472, %v3515_v42  ;;  %v5168_v61 = vpop.eup %3518 }
 0x2fc   : >> { %3534 = vrsqrt.f32 %v1925_v13  ;;  %v2000_v51 = vadd.f32 1.0, %v1999_v45  ;;  %v5166_v55 = vmul.f32 0.5, %v2615_v46  ;;  %v2030_v62 = vadd.f32 1.0, %v2029_v21 }
 0x2fd   : >> { %3536 = vrsqrt.f32 %v5160_v20  ;;  %v2074_v50 = vmul.f32 2.5, %v2073_v7  ;;  %v5170_v47 = vmul.f32 0.5, %v2617_v2  ;;  %v5172_v57 = vmul.f32 1.2247449, %v2629_v5 }
 0x2fe   : >> { %3538 = vrsqrt.f32 %v5162_v38  ;;  %v5174_v4 = vmul.f32 1.6666666, %v2073_v7  ;;  %v2102_v60 = vmul.f32 %v3517_v44, %v5761_v8  ;;  %v5177_v29 = vmul.f32 1.2247449, %v2631_v22 }
 0x2ff   : >> { %3540 = vrsqrt.f32 %v1955_v59  ;;  %vm1858_vm7 = vcmp.eq.f32.partialorder %v5145_v54, inf  ;;  %vm1860_vm8 = vcmp.eq.f32.partialorder %v5145_v54, 0.0  ;;  %v1861_v23 = vand.u32 2147483648, %v5145_v54 }
 0x300   : >> { %3542 = vrsqrt.f32 %v2000_v51  ;;  %v2075_v37 = vadd.f32 1.0, %v2074_v50  ;;  %vm1889_vm9 = vcmp.eq.f32.partialorder %v5147_v10, inf  ;;  %v2103_v19 = vmul.f32 %v3517_v44, %v2102_v60 }
 0x301   : >> { %3544 = vrsqrt.f32 %v5174_v4  ;;  %vm1891_vm10 = vcmp.eq.f32.partialorder %v5147_v10, 0.0  ;;  %v1892_v33 = vand.u32 2147483648, %v5147_v10  ;;  %vm1929_vm11 = vcmp.eq.f32.partialorder %v5153_v63, inf }
 0x302   : >> { %v3521_v12 = vpop.eup %3520  ;;  %3546 = vrsqrt.f32 %v2030_v62  ;;  %v2104_v31 = vmul.f32 2.5, %v2103_v19  ;;  %v5193_v41 = vmul.f32 1.6666666, %v2103_v19  ;;  %vm1931_vm12 = vcmp.eq.f32.partialorder %v5153_v63, 0.0 }
 0x303   : >> { %v3523_v1 = vpop.eup %3522  ;;  %v1857_v32 = vmul.f32 %v3521_v12, %v5145_v54  ;;  %3548 = vrsqrt.f32 %v2075_v37  ;;  %vm1959_vm13 = vcmp.eq.f32.partialorder %v5155_v26, inf  ;;  %vm1961_vm14 = vcmp.eq.f32.partialorder %v5155_v26, 0.0 }
 0x304   : >> { %v3525_v17 = vpop.eup %3524  ;;  %v1888_v39 = vmul.f32 %v3523_v1, %v5147_v10  ;;  %3550 = vrsqrt.f32 %v5193_v41  ;;  %v2105_v46 = vadd.f32 1.0, %v2104_v31  ;;  %v1962_v21 = vand.u32 2147483648, %v5155_v26 }
 0x305   : >> { %v3527_v52 = vpop.eup %3526  ;;  %v1859_v58 = vsel %vm1858_vm7, %v5145_v54, %v1857_v32  ;;  %v1932_v54 = vand.u32 2147483648, %v5153_v63  ;;  %vm2004_vm15 = vcmp.eq.f32.partialorder %v5160_v20, inf  ;;  %vm2006_vm0 = vcmp.eq.f32.partialorder %v5160_v20, 0.0 }
 0x306   : >> { %v1862_v49 = vsel %vm1860_vm8, %v1861_v23, %v1859_v58  ;;  %v1890_v6 = vsel %vm1889_vm9, %v5147_v10, %v1888_v39  ;;  %v3529_v36 = vpop.eup %3528  ;;  %v2007_v12 = vand.u32 2147483648, %v5160_v20  ;;  %vm2034_vm1 = vcmp.eq.f32.partialorder %v5162_v38, inf }
 0x307   : >> { %v5195_v34 = vmul.f32 %v3525_v17, %v1862_v49  ;;  %v1893_v13 = vsel %vm1891_vm10, %v1892_v33, %v1890_v6  ;;  %v5198_v24 = vpop.eup %3530  ;;  %v1928_v11 = vmul.f32 %v3529_v36, %v5153_v63  ;;  %v2634_v39 = vadd.f32 %v5172_v57, %v5166_v55 }
 0x308   : >> { %v5200_v14 = vmul.f32 %v3527_v52, %v1893_v13  ;;  %v3533_v10 = vpop.eup %3532  ;;  %v2037_v52 = vand.u32 2147483648, %v5162_v38  ;;  %vm2036_vm2 = vcmp.eq.f32.partialorder %v5162_v38, 0.0  ;;  %v2635_v31 = vadd.f32 %v5177_v29, %v5170_v47 }
 0x309   : >> { %v1867_v42 = vsub.f32 0.8164966, %v5195_v34  ;;  %v3535_v2 = vpop.eup %3534  ;;  %v1930_v59 = vsel %vm1929_vm11, %v5153_v63, %v1928_v11  ;;  %v1958_v45 = vmul.f32 %v3533_v10, %v5155_v26  ;;  %vm2079_vm3 = vcmp.eq.f32.partialorder %v5174_v4, inf }
 0x30a   : >> { %v1898_v5 = vsub.f32 0.8164966, %v5200_v14  ;;  %v3537_v7 = vpop.eup %3536  ;;  %v1933_v44 = vsel %vm1931_vm12, %v1932_v54, %v1930_v59  ;;  %v2082_v13 = vand.u32 2147483648, %v5174_v4  ;;  %vm2081_vm4 = vcmp.eq.f32.partialorder %v5174_v4, 0.0 }
 0x30b   : >> { %3552 = vrcp.f32 %v1867_v42  ;;  %v3539_v22 = vpop.eup %3538  ;;  %v5222_v51 = vmul.f32 %v3535_v2, %v1933_v44  ;;  %v1960_v62 = vsel %vm1959_vm13, %v5155_v26, %v1958_v45  ;;  %v2003_v50 = vmul.f32 %v3537_v7, %v5160_v20 }
 0x30c   : >> { %3554 = vrcp.f32 %v1898_v5  ;;  %v3541_v60 = vpop.eup %3540  ;;  %v1963_v63 = vsel %vm1961_vm14, %v1962_v21, %v1960_v62  ;;  %v2033_v1 = vmul.f32 %v3539_v22, %v5162_v38  ;;  %v2636_v54 = vsub.f32 %v2634_v39, %v5745_v35 }
 0x30d   : >> { %3556 = vrsqrt.f32 %v2105_v46  ;;  %v1937_v32 = vsub.f32 0.8164966, %v5222_v51  ;;  %v5233_v23 = vmul.f32 %v3541_v60, %v1963_v63  ;;  %v2005_v37 = vsel %vm2004_vm15, %v5160_v20, %v2003_v50  ;;  %v3543_v17 = vpop.eup %3542 }
 0x30e   : >> { %v2008_v26 = vsel %vm2006_vm0, %v2007_v12, %v2005_v37  ;;  %v2035_v19 = vsel %vm2034_vm1, %v5162_v38, %v2033_v1  ;;  %v3545_v58 = vpop.eup %3544  ;;  %v2637_v46 = vsub.f32 %v2635_v31, %v5748_v16  ;;  %vm2109_vm5 = vcmp.eq.f32.partialorder %v5193_v41, inf }
 0x30f   : >> { %3558 = vrcp.f32 %v1937_v32  ;;  %v1967_v33 = vsub.f32 0.8164966, %v5233_v23  ;;  %v5244_v49 = vmul.f32 %v3543_v17, %v2008_v26  ;;  %v3547_v6 = vpop.eup %3546  ;;  %v2038_v55 = vsel %vm2036_vm2, %v2037_v52, %v2035_v19 }
 0x310   : >> { %v2078_v20 = vmul.f32 %v3545_v58, %v5174_v4  ;;  %v5252_v36 = vmul.f32 %v3547_v6, %v2038_v55  ;;  %v3549_v38 = vpop.eup %3548  ;;  %v2654_v7 = vmul.f32 %v5168_v61, %v2636_v54  ;;  %vm2111_vm6 = vcmp.eq.f32.partialorder %v5193_v41, 0.0 }
 0x311   : >> { %3560 = vrcp.f32 %v1967_v33  ;;  %v2012_v57 = vsub.f32 0.8164966, %v5244_v49  ;;  %v3551_v10 = vpop.eup %3550  ;;  %v2655_v16 = vmul.f32 %v5198_v24, %v2637_v46  ;;  %v1866_v24 = vadd.f32 0.8164966, %v5195_v34 }
 0x312   : >> { %v2080_v11 = vsel %vm2079_vm3, %v5174_v4, %v2078_v20  ;;  %v2042_v47 = vsub.f32 0.8164966, %v5252_v36  ;;  %v2108_v59 = vmul.f32 %v3551_v10, %v5193_v41  ;;  %v2112_v4 = vand.u32 2147483648, %v5193_v41 }
 0x313   : >> { %3562 = vrcp.f32 %v2012_v57  ;;  %v2083_v29 = vsel %vm2081_vm4, %v2082_v13, %v2080_v11  ;;  %v2656_v61 = vsub.f32 %v5096_v25, %v2654_v7  ;;  %v1897_v26 = vadd.f32 0.8164966, %v5200_v14 }
 0x314   : >> { %v5260_v2 = vmul.f32 %v3549_v38, %v2083_v29  ;;  %3564 = vrcp.f32 %v2042_v47  ;;  %v2110_v44 = vsel %vm2109_vm5, %v5193_v41, %v2108_v59  ;;  %v2657_v41 = vsub.f32 %v5102_v27, %v2655_v16 }
 0x315   : >> { %v2113_v50 = vsel %vm2111_vm6, %v2112_v4, %v2110_v44  ;;  %v2658_v20 = vmax.f32 %v2656_v61, 1e-08  ;;  %v1936_v27 = vadd.f32 0.8164966, %v5222_v51  ;;  %v1966_v14 = vadd.f32 0.8164966, %v5233_v23 }
 0x316   : >> { %v2087_v45 = vsub.f32 0.8164966, %v5260_v2  ;;  %v2659_v13 = vmax.f32 %v2657_v41, 1e-08  ;;  %v2011_v4 = vadd.f32 0.8164966, %v5244_v49 }
 0x317   : >> { %v5283_v59 = vmin.f32 %v2658_v20, 0.8164958  ;;  %v2041_v23 = vadd.f32 0.8164966, %v5252_v36 }
 0x318   : >> { %v3553_v21 = vpop.eup %3552  ;;  %3566 = vrcp.f32 %v2087_v45 }
 0x319   : >> { %v3555_v22 = vpop.eup %3554  ;;  %v1869_v62 = vmul.f32 %v3553_v21, %v1867_v42 }
 0x31a   : >> { %v3557_v60 = vpop.eup %3556  ;;  %v1900_v63 = vmul.f32 %v3555_v22, %v1898_v5 }
 0x31b   : >> { %v1870_v12 = vsub.f32 2.0, %v1869_v62  ;;  %v5274_v1 = vmul.f32 %v3557_v60, %v2113_v50  ;;  %v2086_v60 = vadd.f32 0.8164966, %v5260_v2 }
 0x31c   : >> { %v1901_v37 = vsub.f32 2.0, %v1900_v63  ;;  %v3559_v17 = vpop.eup %3558 }
 0x31d   : >> { %v1871_v39 = vmul.f32 %v3553_v21, %v1870_v12  ;;  %v2117_v42 = vsub.f32 0.8164966, %v5274_v1  ;;  %v1939_v52 = vmul.f32 %v3559_v17, %v1937_v32 }
 0x31e   : >> { %v1902_v19 = vmul.f32 %v3555_v22, %v1901_v37  ;;  %v3561_v58 = vpop.eup %3560 }
 0x31f   : >> { %v1872_v5 = vmul.f32 %v1871_v39, %v1866_v24  ;;  %3568 = vrcp.f32 %v2117_v42  ;;  %v1940_v31 = vsub.f32 2.0, %v1939_v52  ;;  %v1969_v55 = vmul.f32 %v3561_v58, %v1967_v33 }
 0x320   : >> { %v1903_v6 = vmul.f32 %v1902_v19, %v1897_v26  ;;  %v3563_v25 = vpop.eup %3562  ;;  %v5285_v33 = vmin.f32 %v2659_v13, 0.8164958  ;;  %v5762_v13 = vld [vmem:[#allocation44_spill] sm:$0xff] }
 0x321   : >> { %3570 = vlog2.f32 %v1872_v5  ;;  %v1941_v34 = vmul.f32 %v3559_v17, %v1940_v31  ;;  %v1970_v11 = vsub.f32 2.0, %v1969_v55  ;;  %v2014_v38 = vmul.f32 %v3563_v25, %v2012_v57  ;;  %v3565_v54 = vpop.eup %3564 }
 0x322   : >> { %3572 = vlog2.f32 %v1903_v6  ;;  %v2044_v46 = vmul.f32 %v3565_v54, %v2042_v47  ;;  %v5291_v47 = vmul.f32 %v5283_v59, %v5283_v59  ;;  %v5295_v50 = vmul.f32 %v5285_v33, %v5285_v33 }
 0x323   : >> { %v1942_v32 = vmul.f32 %v1941_v34, %v1936_v27  ;;  %v1971_v29 = vmul.f32 %v3561_v58, %v1970_v11  ;;  %v2015_v10 = vsub.f32 2.0, %v2014_v38  ;;  %v2116_v58 = vadd.f32 0.8164966, %v5274_v1 }
 0x324   : >> { %v2045_v44 = vsub.f32 2.0, %v2044_v46  ;;  %v2666_v12 = vsub.f32 0.6666667, %v5291_v47  ;;  %v2667_v17 = vsub.f32 0.6666667, %v5295_v50 }
 0x325   : >> { %v3567_v21 = vpop.eup %3566  ;;  %3574 = vlog2.f32 %v1942_v32  ;;  %v1972_v51 = vmul.f32 %v1971_v29, %v1966_v14  ;;  %v2016_v7 = vmul.f32 %v3563_v25, %v2015_v10 }
 0x326   : >> { %v2089_v22 = vmul.f32 %v3567_v21, %v2087_v45  ;;  %v2046_v16 = vmul.f32 %v3565_v54, %v2045_v44  ;;  %v2668_v19 = vmul.f32 1.6666666, %v2666_v12  ;;  %v2669_v5 = vmul.f32 1.6666666, %v2667_v17 }
 0x327   : >> { %3576 = vlog2.f32 %v1972_v51  ;;  %v2017_v57 = vmul.f32 %v2016_v7, %v2011_v4 }
 0x328   : >> { %v2090_v62 = vsub.f32 2.0, %v2089_v22  ;;  %v2047_v49 = vmul.f32 %v2046_v16, %v2041_v23 }
 0x329   : >> { %3578 = vlog2.f32 %v2017_v57 }
 0x32a   : >> { %v2091_v63 = vmul.f32 %v3567_v21, %v2090_v62  ;;  %3580 = vlog2.f32 %v2047_v49 }
 0x32c   : >> { %v3569_v45 = vpop.eup %3568  ;;  %v2092_v36 = vmul.f32 %v2091_v63, %v2086_v60 }
 0x32d   : >> { %v2119_v61 = vmul.f32 %v3569_v45, %v2117_v42 }
 0x32e   : >> { %v3571_v37 = vpop.eup %3570  ;;  %3582 = vlog2.f32 %v2092_v36 }
 0x32f   : >> { %v3573_v41 = vpop.eup %3572  ;;  %v1874_v24 = vmul.f32 0.6931472, %v3571_v37  ;;  %v2120_v39 = vsub.f32 2.0, %v2119_v61  ;;  %3584 = vrcp.f32 %v5760_v28 }
 0x330   : >> { %v1905_v26 = vmul.f32 0.6931472, %v3573_v41  ;;  %3586 = vrcp.f32 %v2668_v19 }
 0x331   : >> { %v1875_v52 = vmul.f32 1.2247449, %v1874_v24  ;;  %v2121_v2 = vmul.f32 %v3569_v45, %v2120_v39  ;;  %3588 = vrcp.f32 %v2669_v5 }
 0x332   : >> { %v1906_v6 = vmul.f32 1.2247449, %v1905_v26  ;;  %v3575_v31 = vpop.eup %3574 }
 0x333   : >> { %v2122_v55 = vmul.f32 %v2121_v2, %v2116_v58  ;;  %v1876_v42 = vsub.f32 %v5745_v35, %v1875_v52  ;;  %v1944_v25 = vmul.f32 0.6931472, %v3575_v31 }
 0x334   : >> { %v3577_v20 = vpop.eup %3576  ;;  %v1907_v27 = vadd.f32 %v1906_v6, %v5762_v13 }
 0x335   : >> { %v1945_v34 = vmul.f32 1.2247449, %v1944_v25  ;;  %v1974_v11 = vmul.f32 0.6931472, %v3577_v20  ;;  %3590 = vlog2.f32 %v2122_v55  ;;  %v2665_v20 = vmul.f32 0.6666667, %v5295_v50 }
 0x336   : >> { %v3579_v38 = vpop.eup %3578  ;;  %3592 = vtanh.f32 %v1876_v42  ;;  %v2664_v42 = vmul.f32 0.6666667, %v5291_v47 }
 0x337   : >> { %v1946_v1 = vsub.f32 %v5745_v35, %v1945_v34  ;;  %v1975_v54 = vmul.f32 1.2247449, %v1974_v11  ;;  %v2019_v14 = vmul.f32 0.6931472, %v3579_v38  ;;  %v3581_v32 = vpop.eup %3580  ;;  %3594 = vtanh.f32 %v1907_v27 }
 0x338   : >> { %v2049_v46 = vmul.f32 0.6931472, %v3581_v32 }
 0x339   : >> { %3596 = vtanh.f32 %v1946_v1  ;;  %v1976_v29 = vadd.f32 %v1975_v54, %v5762_v13  ;;  %v2020_v10 = vmul.f32 1.2247449, %v2019_v14 }
 0x33a   : >> { %3598 = vrcp.f32 %v5761_v8  ;;  %v2050_v51 = vmul.f32 1.2247449, %v2049_v46 }
 0x33b   : >> { %v3583_v4 = vpop.eup %3582  ;;  %3600 = vtanh.f32 %v1976_v29  ;;  %v2021_v21 = vsub.f32 %v5745_v35, %v2020_v10 }
 0x33c   : >> { %v2094_v7 = vmul.f32 0.6931472, %v3583_v4  ;;  %v2051_v44 = vadd.f32 %v2050_v51, %v5762_v13  ;;  %v3585_v22 = vpop.eup %3584 }
 0x33d   : >> { %3602 = vtanh.f32 %v2021_v21  ;;  %v3587_v23 = vpop.eup %3586  ;;  %v2682_v52 = vmul.f32 %v3585_v22, %v5760_v28 }
 0x33e   : >> { %3604 = vtanh.f32 %v2051_v44  ;;  %v2095_v57 = vmul.f32 1.2247449, %v2094_v7  ;;  %v3589_v16 = vpop.eup %3588  ;;  %v2672_v12 = vmul.f32 %v3587_v23, %v2668_v19 }
 0x33f   : >> { %v2673_v17 = vmul.f32 %v3589_v16, %v2669_v5  ;;  %v2684_v25 = vsub.f32 2.0, %v2682_v52 }
 0x340   : >> { %v2096_v60 = vsub.f32 %v5745_v35, %v2095_v57  ;;  %v2674_v26 = vsub.f32 2.0, %v2672_v12 }
 0x341   : >> { %v2675_v2 = vsub.f32 2.0, %v2673_v17  ;;  %v2686_v1 = vmul.f32 %v3585_v22, %v2684_v25 }
 0x342   : >> { %v3591_v62 = vpop.eup %3590  ;;  %3606 = vtanh.f32 %v2096_v60  ;;  %v2676_v5 = vmul.f32 %v3587_v23, %v2674_v26 }
 0x343   : >> { %v3593_v49 = vpop.eup %3592  ;;  %v2124_v63 = vmul.f32 0.6931472, %v3591_v62  ;;  %v2677_v27 = vmul.f32 %v3589_v16, %v2675_v2 }
 0x344   : >> { %v3595_v45 = vpop.eup %3594  ;;  %v5319_v38 = vmul.f32 %v2676_v5, %v2664_v42  ;;  %v3634_v5 = vld [vmem:[%s3895_s17] sm:$0xff] }
 0x345   : >> { %v2125_v61 = vmul.f32 1.2247449, %v2124_v63  ;;  %v1909_v24 = vsub.f32 %v3593_v49, %v3595_v45  ;;  %v5321_v54 = vmul.f32 %v2677_v27, %v2665_v20  ;;  %v3635_v20 = vld [vmem:[%s3895_s17 + $0x8] sm:$0xff] }
 0x346   : >> { %v3597_v36 = vpop.eup %3596  ;;  %v2688_v46 = vmul.f32 %v2686_v1, %v5319_v38 }
 0x347   : >> { %v3599_v37 = vpop.eup %3598  ;;  %v2126_v39 = vadd.f32 %v2125_v61, %v5762_v13  ;;  %v1910_v31 = vand.u32 2147483647, %v1909_v24 }
 0x348   : >> { %v3601_v41 = vpop.eup %3600  ;;  %v2683_v35 = vmul.f32 %v3599_v37, %v5761_v8  ;;  %vm2694_vm10 = vcmp.eq.f32.partialorder %v2688_v46, inf  ;;  %vm2696_vm12 = vcmp.eq.f32.partialorder %v2688_v46, 0.0  ;;  %v2690_v25 = vmul.f32 %v3634_v5, %v2688_v46 }
 0x349   : >> { %v1978_v58 = vsub.f32 %v3597_v36, %v3601_v41  ;;  %3608 = vtanh.f32 %v2126_v39 }
 0x34a   : >> { %v3603_v6 = vpop.eup %3602  ;;  %v2685_v13 = vsub.f32 2.0, %v2683_v35  ;;  %3610 = vrsqrt.f32 %v2688_v46 }
 0x34b   : >> { %v1979_v19 = vand.u32 2147483647, %v1978_v58  ;;  %v3605_v55 = vpop.eup %3604 }
 0x34c   : >> { %v2053_v11 = vsub.f32 %v3603_v6, %v3605_v55  ;;  %v2687_v14 = vmul.f32 %v3599_v37, %v2685_v13  ;;  %v2715_v37 = vsub.f32 1.0, %v5295_v50  ;;  %v2697_v50 = vand.u32 2147483648, %v2688_v46 }
 0x34d   : >> { %vm5315_vm7 = vcmp.lt.f32.partialorder %v1979_v19, %v1910_v31 }
 0x34e   : >> { %v1981_v32 = vsel %vm5315_vm7, %v1979_v19, %v1910_v31  ;;  %v2054_v29 = vand.u32 2147483647, %v2053_v11  ;;  %v2689_v51 = vmul.f32 %v2687_v14, %v5321_v54  ;;  %v1983_v7 = vsel %vm5315_vm7, %v5115_v30, %v5113_v3 }
 0x34f   : >> { %v3607_v10 = vpop.eup %3606  ;;  %v1984_v44 = vsel %vm5315_vm7, %v3597_v36, %v3593_v49  ;;  %v1985_v22 = vsel %vm5315_vm7, %v3601_v41, %v3595_v45  ;;  %v2714_v45 = vsub.f32 1.0, %v5291_v47 }
 0x350   : >> { %vm5326_vm8 = vcmp.lt.f32.partialorder %v2054_v29, %v1981_v32  ;;  %3612 = vrsqrt.f32 %v2689_v51  ;;  %vm2701_vm11 = vcmp.eq.f32.partialorder %v2689_v51, inf  ;;  %v2704_v2 = vand.u32 2147483648, %v2689_v51 }
 0x351   : >> { %v2056_v23 = vsel %vm5326_vm8, %v2054_v29, %v1981_v32  ;;  %v2058_v16 = vsel %vm5326_vm8, %v5121_v0, %v1983_v7  ;;  %v2059_v62 = vsel %vm5326_vm8, %v3603_v6, %v1984_v44  ;;  %v2060_v3 = vsel %vm5326_vm8, %v3605_v55, %v1985_v22 }
 0x352   : >> { %3614 = vrsqrt.f32 %v2714_v45  ;;  %vm2703_vm13 = vcmp.eq.f32.partialorder %v2689_v51, 0.0  ;;  %v2710_v55 = vmul.f32 2.5, %v5319_v38  ;;  %v2691_v27 = vmul.f32 %v3635_v20, %v2689_v51 }
 0x353   : >> { %3616 = vrsqrt.f32 %v2715_v37  ;;  %v2711_v32 = vmul.f32 2.5, %v5321_v54 }
 0x356   : >> { %v3609_v21 = vpop.eup %3608 }
 0x357   : >> { %v2128_v57 = vsub.f32 %v3607_v10, %v3609_v21  ;;  %v3611_v26 = vpop.eup %3610 }
 0x359   : >> { %v2129_v30 = vand.u32 2147483647, %v2128_v57 }
 0x35b   : >> { %vm5348_vm9 = vcmp.lt.f32.partialorder %v2129_v30, %v2056_v23 }
 0x35c   : >> { %v2132_v60 = vsel %vm5348_vm9, %v5127_v56, %v2058_v16  ;;  %v2133_v63 = vsel %vm5348_vm9, %v3607_v10, %v2059_v62  ;;  %v2134_v0 = vsel %vm5348_vm9, %v3609_v21, %v2060_v3  ;;  %v2712_v21 = vadd.f32 1.0, %v2710_v55 }
 0x35d   : >> { %v2135_v12 = vsub.f32 %v2132_v60, %v5758_v53  ;;  %v2156_v36 = vsub.f32 %v2132_v60, %v5759_v9  ;;  %v2177_v61 = vadd.f32 %v2134_v0, %v2133_v63  ;;  %v3613_v53 = vpop.eup %3612  ;;  %v2693_v9 = vmul.f32 %v3611_v26, %v2688_v46 }
 0x35e   : >> { %v2700_v58 = vmul.f32 %v3613_v53, %v2689_v51  ;;  %v2713_v3 = vadd.f32 1.0, %v2711_v32 }
 0x35f   : >> { %v2136_v17 = vmul.f32 0.2, %v2135_v12  ;;  %v2157_v41 = vmul.f32 0.2, %v2156_v36  ;;  %v5363_v24 = vmul.f32 0.5, %v2177_v61  ;;  %v3615_v35 = vpop.eup %3614  ;;  %v2695_v6 = vsel %vm2694_vm10, %v2688_v46, %v2693_v9 }
 0x360   : >> { %v2702_v31 = vsel %vm2701_vm11, %v2689_v51, %v2700_v58  ;;  %v3617_v19 = vpop.eup %3616  ;;  %v2698_v11 = vsel %vm2696_vm12, %v2697_v50, %v2695_v6  ;;  %v2724_v7 = vmul.f32 %v3615_v35, %v3615_v35  ;;  %v2720_v63 = vmul.f32 %v3615_v35, %v2712_v21 }
 0x361   : >> { %v2137_v56 = vmul.f32 1.442695, %v2136_v17  ;;  %v2158_v39 = vmul.f32 1.442695, %v2157_v41  ;;  %v2183_v47 = vmul.f32 %v5363_v24, %v5363_v24  ;;  %v2705_v1 = vsel %vm2703_vm13, %v2704_v2, %v2702_v31 }
 0x362   : >> { %v2706_v57 = vmul.f32 %v2698_v11, %v2690_v25  ;;  %v2707_v23 = vmul.f32 %v2705_v1, %v2691_v27  ;;  %v2725_v16 = vmul.f32 %v3617_v19, %v3617_v19  ;;  %v2721_v37 = vmul.f32 %v3617_v19, %v2713_v3 }
 0x363   : >> { %3618 = vpow2.f32 %v2137_v56  ;;  %v2184_v52 = vsub.f32 1.0, %v2183_v47  ;;  %v2946_v56 = vadd.f32 -1.0, %v2720_v63  ;;  %vm2748_vm4 = vcmp.gt.f32.partialorder %v5363_v24, 0.0 }
 0x364   : >> { %3620 = vpow2.f32 %v2158_v39  ;;  %v2726_v45 = vmul.f32 %v2724_v7, %v2706_v57  ;;  %v2727_v12 = vmul.f32 %v2725_v16, %v2707_v23  ;;  %v2718_v41 = vmul.f32 %v3615_v35, %v2706_v57  ;;  %v5770_v7 = vld [vmem:[#allocation43_spill] sm:$0xff] }
 0x365   : >> { %3622 = vrsqrt.f32 %v2184_v52  ;;  %v2734_v52 = vsub.f32 0.0, %v5285_v33  ;;  %v2719_v58 = vmul.f32 %v3617_v19, %v2707_v23  ;;  %v2947_v50 = vadd.f32 -1.0, %v2721_v37 }
 0x366   : >> { %v2728_v47 = vmul.f32 %v2726_v45, %v2712_v21  ;;  %v2729_v26 = vmul.f32 %v2727_v12, %v2713_v3  ;;  %v2736_v2 = vmul.f32 %v2946_v56, %v2718_v41  ;;  %v2708_v35 = vmul.f32 %v2706_v57, %v5319_v38  ;;  %v5769_v38 = vld [vmem:[#allocation42_spill] sm:$0xff] }
 0x367   : >> { %v2709_v25 = vmul.f32 %v2707_v23, %v5321_v54  ;;  %v5394_v11 = vmul.f32 %v2734_v52, %v2719_v58  ;;  %v2740_v1 = vmul.f32 %v2947_v50, %v2719_v58  ;;  %vm2744_vm14 = vcmp.lt.f32.partialorder %v5769_v38, 0.0  ;;  %v5774_v58 = vld [vmem:[#allocation74_spill] sm:$0xff] }
 0x368   : >> { %v2730_v31 = vmul.f32 %v2728_v47, %v5283_v59  ;;  %v2731_v55 = vmul.f32 %v2729_v26, %v5285_v33  ;;  %vm2754_vm1 = vcmp.gt.f32.partialorder %v5770_v7, 0.0  ;;  %vm2750_vm5 = vcmp.le.f32.partialorder %v5363_v24, 0.0  ;;  %v335_v26 = vld [vmem:[%s4777_s18 + $0x8] sm:$0xff] }
 0x369   : >> { %vm2756_vm12 = vcmp.le.f32.partialorder %v5770_v7, 0.0 }
 0x36a   : >> { %v2733_v34 = vmul.f32 %v2731_v55, %v5285_v33  ;;  %v339_v55 = vld [vmem:[%s4777_s18 + $0x28] sm:$0xff] }
 0x370   : >> { %v3619_v42 = vpop.eup %3618 }
 0x371   : >> { %v3621_v13 = vpop.eup %3620  ;;  %v2142_v14 = vmul.f32 %v3619_v42, %v5760_v28  ;;  %v2139_v29 = vmul.f32 %v3634_v5, %v3619_v42 }
 0x372   : >> { %v2163_v10 = vmul.f32 %v3621_v13, %v5761_v8  ;;  %v2160_v22 = vmul.f32 %v3635_v20, %v3621_v13  ;;  %v3623_v61 = vpop.eup %3622  ;;  %v5389_v20 = vmul.f32 %v2718_v41, %v5283_v59 }
 0x373   : >> { %v2143_v44 = vmul.f32 %v3619_v42, %v2142_v14  ;;  %v2140_v30 = vmul.f32 %v3619_v42, %v2139_v29  ;;  %v2188_v53 = vmul.f32 %v3623_v61, %v3623_v61 }
 0x374   : >> { %v2164_v46 = vmul.f32 %v3621_v13, %v2163_v10  ;;  %v2161_v8 = vmul.f32 %v3621_v13, %v2160_v22 }
 0x375   : >> { %v2144_v62 = vmul.f32 2.5, %v2143_v44  ;;  %v5373_v51 = vmul.f32 1.6666666, %v2143_v44  ;;  %v2141_v17 = vmul.f32 %v3619_v42, %v2140_v30  ;;  %v1982_v42 = vsel %vm5315_vm7, %v5091_v40, %v5089_v43 }
 0x376   : >> { %v2165_v60 = vmul.f32 2.5, %v2164_v46  ;;  %v5375_v28 = vmul.f32 1.6666666, %v2164_v46  ;;  %v2162_v39 = vmul.f32 %v3621_v13, %v2161_v8  ;;  %v5392_v13 = vmul.f32 %v2736_v2, %v5283_v59  ;;  %v5775_v2 = vld [vmem:[#allocation73_spill] sm:$0xff] }
 0x377   : >> { %v2145_v0 = vadd.f32 1.0, %v2144_v62  ;;  %3624 = vrsqrt.f32 %v5373_v51  ;;  %v2189_v9 = vmul.f32 %v2188_v53, %v2141_v17  ;;  %v2057_v43 = vsel %vm5326_vm8, %v5094_v18, %v1982_v42 }
 0x378   : >> { %v2166_v36 = vadd.f32 1.0, %v2165_v60  ;;  %3626 = vrsqrt.f32 %v5375_v28  ;;  %v2192_v6 = vmul.f32 %v2188_v53, %v2162_v39  ;;  %vm2149_vm15 = vcmp.eq.f32.partialorder %v5373_v51, inf }
 0x379   : >> { %3628 = vrsqrt.f32 %v2145_v0  ;;  %v2196_v5 = vmul.f32 %v3623_v61, %v2145_v0  ;;  %v2190_v19 = vmul.f32 %v2189_v9, %v2145_v0  ;;  %v2732_v40 = vmul.f32 %v2730_v31, %v5283_v59  ;;  %v337_v31 = vld [vmem:[%s4777_s18 + $0x18] sm:$0xff] }
 0x37a   : >> { %3630 = vrsqrt.f32 %v2166_v36  ;;  %v2203_v27 = vmul.f32 %v3623_v61, %v2166_v36  ;;  %v2193_v14 = vmul.f32 %v2192_v6, %v2166_v36  ;;  %vm2151_vm0 = vcmp.eq.f32.partialorder %v5373_v51, 0.0 }
 0x37b   : >> { %v2152_v10 = vand.u32 2147483648, %v5373_v51  ;;  %v2944_v21 = vadd.f32 -1.0, %v2196_v5  ;;  %vm2170_vm2 = vcmp.eq.f32.partialorder %v5375_v28, inf  ;;  %v2191_v18 = vmul.f32 %v2190_v19, %v5363_v24 }
 0x37c   : >> { %v2945_v4 = vadd.f32 -1.0, %v2203_v27  ;;  %v2173_v33 = vand.u32 2147483648, %v5375_v28  ;;  %v2186_v22 = vmul.f32 %v3623_v61, %v2141_v17  ;;  %v2194_v57 = vmul.f32 %v2193_v14, %v5363_v24 }
 0x37d   : >> { %vm2172_vm3 = vcmp.eq.f32.partialorder %v5375_v28, 0.0  ;;  %v2187_v62 = vmul.f32 %v3623_v61, %v2162_v39  ;;  %v2741_v30 = vmul.f32 %v2740_v1, %v2734_v52  ;;  %v2738_v12 = vadd.f32 %v2732_v40, %v2708_v35  ;;  %v5773_v52 = vld [vmem:[#allocation75_spill] sm:$0xff] }
 0x37e   : >> { %v2198_v0 = vmul.f32 %v2944_v21, %v2186_v22  ;;  %v2131_v36 = vsel %vm5348_vm9, %v5099_v15, %v2057_v43  ;;  %v2742_v61 = vadd.f32 %v2733_v34, %v2709_v25  ;;  %v2195_v41 = vmul.f32 %v2186_v22, %v5363_v24 }
 0x37f   : >> { %v2205_v45 = vmul.f32 %v2945_v4, %v2187_v62  ;;  %v2202_v15 = vmul.f32 %v2187_v62, %v5363_v24 }
 0x380   : >> { %v2199_v56 = vmul.f32 %v2198_v0, %v5363_v24 }
 0x381   : >> { %v2206_v39 = vmul.f32 %v2205_v45, %v5363_v24 }
 0x384   : >> { %v3625_v32 = vpop.eup %3624 }
 0x385   : >> { %v3627_v54 = vpop.eup %3626  ;;  %v2148_v29 = vmul.f32 %v3625_v32, %v5373_v51 }
 0x386   : >> { %v2169_v44 = vmul.f32 %v3627_v54, %v5375_v28  ;;  %v3629_v23 = vpop.eup %3628 }
 0x387   : >> { %v2150_v59 = vsel %vm2149_vm15, %v5373_v51, %v2148_v29  ;;  %v3631_v3 = vpop.eup %3630  ;;  %v2200_v51 = vmul.f32 %v2191_v18, %v5363_v24 }
 0x388   : >> { %v2153_v16 = vsel %vm2151_vm0, %v2152_v10, %v2150_v59  ;;  %v2171_v46 = vsel %vm2170_vm2, %v5375_v28, %v2169_v44  ;;  %v2207_v28 = vmul.f32 %v2194_v57, %v5363_v24 }
 0x389   : >> { %v2155_v60 = vmul.f32 %v3629_v23, %v2153_v16  ;;  %v2174_v63 = vsel %vm2172_vm3, %v2173_v33, %v2171_v46  ;;  %v2201_v49 = vadd.f32 %v2200_v51, %v2131_v36 }
 0x38a   : >> { %v2176_v8 = vmul.f32 %v3631_v3, %v2174_v63  ;;  %v2208_v53 = vadd.f32 %v2207_v28, %v2131_v36 }
 0x38b   : >> { %v2180_v37 = vsub.f32 %v5363_v24, %v2155_v60 }
 0x38c   : >> { %v2181_v17 = vadd.f32 %v5363_v24, %v2176_v8 }
 0x38d   : >> { %vm2745_vm6 = vcmp.ge.f32.partialorder %v2180_v37, 0.0  ;;  %vm2747_vm7 = vcmp.lt.f32.partialorder %v2180_v37, 0.0 }
 0x38e   : >> { %vm5431_vm8 = vmand %vm2744_vm14, %vm2745_vm6  ;;  %vm2751_vm9 = vcmp.gt.f32.partialorder %v2181_v17, 0.0  ;;  %vm2753_vm10 = vcmp.le.f32.partialorder %v2181_v17, 0.0 }
 0x38f   : >> { %vm2749_vm11 = vmand %vm2747_vm7, %vm2748_vm4  ;;  %v2758_v9 = vsel %vm5431_vm8, %v5389_v20, %v5773_v52  ;;  %v2764_v50 = vsel %vm5431_vm8, %v5392_v13, %v5774_v58  ;;  %v2770_v6 = vsel %vm5431_vm8, %v2738_v12, %v5775_v2 }
 0x390   : >> { %vm2752_vm13 = vmand %vm2750_vm5, %vm2751_vm9  ;;  %v2759_v35 = vsel %vm2749_vm11, %v2195_v41, %v2758_v9  ;;  %v2765_v42 = vsel %vm2749_vm11, %v2199_v56, %v2764_v50  ;;  %v2771_v5 = vsel %vm2749_vm11, %v2201_v49, %v2770_v6 }
 0x391   : >> { %vm2755_vm14 = vmand %vm2753_vm10, %vm2754_vm1  ;;  %v2760_v25 = vsel %vm2752_vm13, %v2202_v15, %v2759_v35  ;;  %v2766_v20 = vsel %vm2752_vm13, %v2206_v39, %v2765_v42  ;;  %v2772_v19 = vsel %vm2752_vm13, %v2208_v53, %v2771_v5  ;;  %323 = sbr.rel (!%p321_p4) target bundleno = 29 (0x1d), region = 87 }
 0x392   : >> { %v2761_v27 = vsel %vm2755_vm14, %v5394_v11, %v2760_v25  ;;  %v2767_v13 = vsel %vm2755_vm14, %v2741_v30, %v2766_v20  ;;  %v2773_v1 = vsel %vm2755_vm14, %v2742_v61, %v2772_v19 }
 0x393   : >> { %v2762_v38 = vsel %vm2756_vm12, %v335_v26, %v2761_v27  ;;  %v2768_v24 = vsel %vm2756_vm12, %v337_v31, %v2767_v13  ;;  %v2774_v14 = vsel %vm2756_vm12, %v339_v55, %v2773_v1 }
 0x394   : >> { %2777 = vst [vmem:[%s2776_s20] sm:$0xff] %v2762_v38  ;;  %2778 = vst [vmem:[%s2776_s20 + $0x8] sm:$0xff] %v2768_v24 }
 0x395   : >> { %2779 = vst [vmem:[%s2776_s20 + $0x10] sm:$0xff] %v2774_v14 }
 0x396 PF: > { %s16_s21 = sadd.s32 1, %s3646_s21  }
 0x397   : > { %p13_p5 = scmp.ge.s32.totalorder %s16_s21, 6  }
 0x399   :  { %15 = sbr.rel (!%p13_p5) target bundleno = 1 (0x1), region = 98 }

</bundles_post_ra>
